<compile_context>
chip_gen: v5e
topology: v5e:2x2
jax: 0.10.0
libtpu: 0.0.40
codegen_flags: <defaults>
</compile_context>

<pallas_src>
import functools

import jax
import jax.numpy as jnp
from jax.experimental import pallas as pl
from jax.experimental.pallas import tpu as pltpu

# Pad the 3 RGB input channels up to 16 so every in-kernel sublane concat is
# aligned to the bf16 (16, 128) tile.
_IN_CH_PAD = 16


# ----------------------------------------------------------------------------
# Pallas kernels
# ----------------------------------------------------------------------------
def _conv_taps_matmul(x_parts, w_ref, b_ref, wp, length):
    """x_parts: list of (C_i, P) bf16 blocks of the padded-flat input.
    Builds the (9*sum(C_i), length) tap matrix with static lane shifts and runs
    a single MXU matmul; returns the f32 (Cout, length) pre-activation."""
    pieces = []
    for ky in range(3):
        for kx in range(3):
            off = ky * wp + kx
            for xp in x_parts:
                pieces.append(xp[:, off:off + length])
    taps = jnp.concatenate(pieces, axis=0)                     # (9*Cin, L) bf16
    acc = jnp.dot(w_ref[...], taps, preferred_element_type=jnp.float32)
    return acc + b_ref[...]                                    # (Cout, L) f32


def _store_padded(o_ref, y, mask, wp, length):
    """Write y (Cout, L) back in the padded-flat layout (zeroed halo), so the
    next conv consumes this output directly with no HBM re-padding."""
    cout = o_ref.shape[1]
    p_out = o_ref.shape[2]
    tail = p_out - (wp + 1) - length
    ym = (y * mask).astype(o_ref.dtype)   # zero the 2 out-of-row columns / row
    o_ref[0, :, pl.ds(0, wp + 1)] = jnp.zeros((cout, wp + 1), o_ref.dtype)
    o_ref[0, :, pl.ds(wp + 1, length)] = ym
    o_ref[0, :, pl.ds(wp + 1 + length, tail)] = jnp.zeros((cout, tail), o_ref.dtype)


def _conv3x3_bn_relu_kernel(x_ref, w_ref, b_ref, mask_ref, o_ref, *, wp, length):
    y = jnp.maximum(_conv_taps_matmul([x_ref[0]], w_ref, b_ref, wp, length), 0.0)
    _store_padded(o_ref, y, mask_ref[...], wp, length)


def _conv3x3_bn_relu_cat_kernel(xa_ref, xb_ref, w_ref, b_ref, mask_ref, o_ref, *,
                                wp, length):
    # Channel concat (upsampled, skip) fused here: two input refs, taps built in
    # VMEM -> the (N, C1+C2, H, W) concat tensor is never materialised in HBM.
    y = jnp.maximum(
        _conv_taps_matmul([xa_ref[0], xb_ref[0]], w_ref, b_ref, wp, length), 0.0)
    _store_padded(o_ref, y, mask_ref[...], wp, length)


def _conv3x3_head_kernel(x_ref, w1_ref, b1_ref, w2_ref, b2_ref, o_ref, *, wp, length):
    # Last 3x3 conv + BN + ReLU fused with the 1x1 conv + sigmoid head.
    y = jnp.maximum(_conv_taps_matmul([x_ref[0]], w1_ref, b1_ref, wp, length), 0.0)
    z = jnp.dot(w2_ref[...], y.astype(w2_ref.dtype),
                preferred_element_type=jnp.float32) + b2_ref[...]     # (1, L) f32
    o_ref[0] = 1.0 / (1.0 + jnp.exp(-z))


# ----------------------------------------------------------------------------
# Layout helpers (JAX glue)
# ----------------------------------------------------------------------------
def _conv_dims(h, w):
    wp = w + 2
    return wp, h * wp, (h + 3) * wp


def _pad_flat(x):
    """(N, C, H, W) -> padded-flat (N, C, (H+3)*(W+2)): 1-pixel zero halo plus
    two extra zero rows at the bottom so every tap slice stays in range."""
    n, c, h, w = x.shape
    xp = jnp.pad(x, ((0, 0), (0, 0), (1, 2), (1, 1)))
    return xp.reshape(n, c, (h + 3) * (w + 2))


def _unpad(y, h, w):
    """padded-flat (N, C, (H+3)*(W+2)) -> compact (N, C, H, W)."""
    n, c, _ = y.shape
    wp = w + 2
    core = y[:, :, wp + 1: wp + 1 + h * wp].reshape(n, c, h, wp)
    return core[:, :, :, :w]


def _valid_mask(h, w):
    """(1, H*(W+2)) f32 mask: 1 on valid output columns, 0 on the 2 wrap cols."""
    wp = w + 2
    col = jnp.arange(h * wp, dtype=jnp.int32) % wp
    return (col < w).astype(jnp.float32).reshape(1, h * wp)


# ----------------------------------------------------------------------------
# pallas_call wrappers
# ----------------------------------------------------------------------------
def conv3x3_bn_relu(xpad, w_mat, bias, h, w):
    """xpad: (N, Cin, (H+3)*(W+2)) bf16 padded-flat -> same layout, Cout channels."""
    n, cin, p_in = xpad.shape
    cout = w_mat.shape[0]
    wp, length, p_out = _conv_dims(h, w)
    assert p_in == p_out
    return pl.pallas_call(
        functools.partial(_conv3x3_bn_relu_kernel, wp=wp, length=length),
        out_shape=jax.ShapeDtypeStruct((n, cout, p_out), jnp.bfloat16),
        grid=(n,),
        in_specs=[
            pl.BlockSpec((1, cin, p_in), lambda b: (b, 0, 0)),
            pl.BlockSpec((cout, 9 * cin), lambda b: (0, 0)),
            pl.BlockSpec((cout, 1), lambda b: (0, 0)),
            pl.BlockSpec((1, length), lambda b: (0, 0)),
        ],
        out_specs=pl.BlockSpec((1, cout, p_out), lambda b: (b, 0, 0)),
        compiler_params=pltpu.CompilerParams(dimension_semantics=("parallel",)),
    )(xpad, w_mat, bias, _valid_mask(h, w))


def conv3x3_bn_relu_cat(xa, xb, w_mat, bias, h, w):
    """Conv over the channel-concat of two padded-flat inputs (fused concat)."""
    n, ca, p_in = xa.shape
    _, cb, p_in_b = xb.shape
    assert p_in == p_in_b
    cout = w_mat.shape[0]
    wp, length, p_out = _conv_dims(h, w)
    assert p_in == p_out
    return pl.pallas_call(
        functools.partial(_conv3x3_bn_relu_cat_kernel, wp=wp, length=length),
        out_shape=jax.ShapeDtypeStruct((n, cout, p_out), jnp.bfloat16),
        grid=(n,),
        in_specs=[
            pl.BlockSpec((1, ca, p_in), lambda b: (b, 0, 0)),
            pl.BlockSpec((1, cb, p_in), lambda b: (b, 0, 0)),
            pl.BlockSpec((cout, 9 * (ca + cb)), lambda b: (0, 0)),
            pl.BlockSpec((cout, 1), lambda b: (0, 0)),
            pl.BlockSpec((1, length), lambda b: (0, 0)),
        ],
        out_specs=pl.BlockSpec((1, cout, p_out), lambda b: (b, 0, 0)),
        compiler_params=pltpu.CompilerParams(dimension_semantics=("parallel",)),
    )(xa, xb, w_mat, bias, _valid_mask(h, w))


def conv_head(xpad, w1, b1, w2, b2, h, w):
    """Fused: 3x3 conv + BN + ReLU (16->16) then 1x1 conv (16->1) + sigmoid.
    Returns compact (N, 1, H, W) float32."""
    n, cin, p_in = xpad.shape
    cout = w1.shape[0]
    wp, length, p_out = _conv_dims(h, w)
    assert p_in == p_out
    out_wide = pl.pallas_call(
        functools.partial(_conv3x3_head_kernel, wp=wp, length=length),
        out_shape=jax.ShapeDtypeStruct((n, 1, length), jnp.float32),
        grid=(n,),
        in_specs=[
            pl.BlockSpec((1, cin, p_in), lambda b: (b, 0, 0)),
            pl.BlockSpec((cout, 9 * cin), lambda b: (0, 0)),
            pl.BlockSpec((cout, 1), lambda b: (0, 0)),
            pl.BlockSpec((1, cin), lambda b: (0, 0)),
            pl.BlockSpec((1, 1), lambda b: (0, 0)),
        ],
        out_specs=pl.BlockSpec((1, 1, length), lambda b: (b, 0, 0)),
        compiler_params=pltpu.CompilerParams(dimension_semantics=("parallel",)),
    )(xpad, w1, b1, w2, b2)
    return out_wide.reshape(n, 1, h, wp)[:, :, :, :w]


# ----------------------------------------------------------------------------
# Cheap data-movement glue (plain JAX)
# ----------------------------------------------------------------------------
def maxpool2x2(x):
    """NCHW MaxPool2d(2, 2)."""
    n, c, h, w = x.shape
    return jnp.max(x.reshape(n, c, h // 2, 2, w // 2, 2), axis=(3, 5))


def upsample2x_bilinear(x):
    """NCHW bilinear 2x upsample matching nn.Upsample(scale_factor=2,
    mode='bilinear', align_corners=False): out[2j] = .25*x[j-1] + .75*x[j],
    out[2j+1] = .75*x[j] + .25*x[j+1] (edge-clamped)."""
    def up_axis(a, axis):
        m = a.shape[axis]
        idx = jnp.arange(m)
        lo = jnp.clip(idx - 1, 0, m - 1)
        hi = jnp.clip(idx + 1, 0, m - 1)
        a_lo = jnp.take(a, lo, axis=axis)
        a_hi = jnp.take(a, hi, axis=axis)
        even = 0.25 * a_lo + 0.75 * a
        odd = 0.75 * a + 0.25 * a_hi
        stacked = jnp.stack([even, odd], axis=axis + 1)
        shp = list(a.shape)
        shp[axis] = 2 * m
        return stacked.reshape(shp)
    return up_axis(up_axis(x, 2), 3)


# ----------------------------------------------------------------------------
# Parameter construction (deterministic, synthetic)
# ----------------------------------------------------------------------------
def _make_conv_bn(key, cin, cout, cin_pad=None):
    """Conv2d(cin,cout,3,padding=1) + BatchNorm2d(cout) folded into
    (w_mat (cout, 9*cin_pad) bf16, bias (cout, 1) f32).  Eval-mode BN with
    running_mean=0, running_var=1, eps=1e-5; the BN scale is folded into the
    weights so the kernel epilogue is only bias + ReLU."""
    cin_pad = cin if cin_pad is None else cin_pad
    k1, k2, k3, k4 = jax.random.split(key, 4)
    w = jax.random.normal(k1, (cout, cin, 3, 3), jnp.float32) * (1.0 / (cin * 9.0)) ** 0.5
    b = jax.random.normal(k2, (cout,), jnp.float32) * 0.01
    gamma = 1.0 + 0.1 * jax.random.normal(k3, (cout,), jnp.float32)
    beta = 0.1 * jax.random.normal(k4, (cout,), jnp.float32)
    rm = jnp.zeros((cout,), jnp.float32)
    rv = jnp.ones((cout,), jnp.float32)
    eps = 1e-5
    scale = gamma / jnp.sqrt(rv + eps)
    bias_eff = (b - rm) * scale + beta
    w_folded = w * scale[:, None, None, None]
    if cin_pad != cin:
        w_folded = jnp.pad(w_folded, ((0, 0), (0, cin_pad - cin), (0, 0), (0, 0)))
    # (cout, cin, 3, 3) -> (cout, ky, kx, cin) -> (cout, 9*cin): K = t*cin + c,
    # matching the in-kernel tap order (tap-major, channel within tap).
    w_mat = jnp.transpose(w_folded, (0, 2, 3, 1)).reshape(cout, 9 * cin_pad)
    return (w_mat.astype(jnp.bfloat16), bias_eff.reshape(cout, 1))


def init_params(key):
    layer_defs = [
        ("d1c1", 3, 16), ("d1c2", 16, 16), ("d1c3", 16, 16),
        ("d2c1", 16, 32), ("d2c2", 32, 32), ("d2c3", 32, 32),
        ("mc1", 32, 64), ("mc2", 64, 64), ("mc3", 64, 64),
        ("u1c1", 96, 32), ("u1c2", 32, 32), ("u1c3", 32, 32),
        ("u2c1", 48, 16), ("u2c2", 16, 16), ("u2c3", 16, 16),
        ("last1", 16, 16),
    ]
    keys = jax.random.split(key, len(layer_defs) + 2)
    params = {}
    for (name, cin, cout), k in zip(layer_defs, keys[:len(layer_defs)]):
        cin_pad = _IN_CH_PAD if name == "d1c1" else None
        params[name] = _make_conv_bn(k, cin, cout, cin_pad=cin_pad)
    # last_conv2: Conv2d(16, 1, 1, padding=0), bias=True, no BN
    kw, kb = keys[-2], keys[-1]
    w2 = jax.random.normal(kw, (1, 16, 1, 1), jnp.float32) * 0.25
    b2 = jax.random.normal(kb, (1,), jnp.float32) * 0.01
    params["last2_w"] = w2.reshape(1, 16).astype(jnp.bfloat16)
    params["last2_b"] = b2.reshape(1, 1)
    return params


# ----------------------------------------------------------------------------
# Full UNet3 forward
# ----------------------------------------------------------------------------
def unet3_forward(params, x_nchw):
    n, c_in, h, w = x_nchw.shape
    x = x_nchw.astype(jnp.bfloat16)
    x = jnp.pad(x, ((0, 0), (0, _IN_CH_PAD - c_in), (0, 0), (0, 0)))

    # --- down block 1 @ (H, W) ---
    t = conv3x3_bn_relu(_pad_flat(x), *params["d1c1"], h, w)
    t = conv3x3_bn_relu(t, *params["d1c2"], h, w)
    skip1 = conv3x3_bn_relu(t, *params["d1c3"], h, w)   # padded-flat, reused below
    p1 = maxpool2x2(_unpad(skip1, h, w))

    h2, w2 = h // 2, w // 2
    # --- down block 2 @ (H/2, W/2) ---
    t = conv3x3_bn_relu(_pad_flat(p1), *params["d2c1"], h2, w2)
    t = conv3x3_bn_relu(t, *params["d2c2"], h2, w2)
    skip2 = conv3x3_bn_relu(t, *params["d2c3"], h2, w2)
    p2 = maxpool2x2(_unpad(skip2, h2, w2))

    h4, w4 = h2 // 2, w2 // 2
    # --- middle block @ (H/4, W/4) ---
    t = conv3x3_bn_relu(_pad_flat(p2), *params["mc1"], h4, w4)
    t = conv3x3_bn_relu(t, *params["mc2"], h4, w4)
    t = conv3x3_bn_relu(t, *params["mc3"], h4, w4)

    # --- up block 1 @ (H/2, W/2): upsample, concat-with-skip fused into conv ---
    u = upsample2x_bilinear(_unpad(t, h4, w4))
    t = conv3x3_bn_relu_cat(_pad_flat(u), skip2, *params["u1c1"], h2, w2)
    t = conv3x3_bn_relu(t, *params["u1c2"], h2, w2)
    t = conv3x3_bn_relu(t, *params["u1c3"], h2, w2)

    # --- up block 2 @ (H, W) ---
    u = upsample2x_bilinear(_unpad(t, h2, w2))
    t = conv3x3_bn_relu_cat(_pad_flat(u), skip1, *params["u2c1"], h, w)
    t = conv3x3_bn_relu(t, *params["u2c2"], h, w)
    t = conv3x3_bn_relu(t, *params["u2c3"], h, w)

    # --- head: last 3x3 conv+BN+ReLU fused with 1x1 conv + sigmoid ---
    return conv_head(t, *params["last1"],
                     params["last2_w"], params["last2_b"], h, w)   # (N, 1, H, W)


if __name__ == "__main__":
    root = jax.random.PRNGKey(0)
    k_params, k_input = jax.random.split(root)
    params = init_params(k_params)

    x = jax.random.normal(k_input, (2, 3, 16, 16), jnp.float32)  # NCHW like PyTorch
    fwd = jax.jit(unet3_forward)
    y = jax.block_until_ready(fwd(params, x))

    assert y.shape == (2, 1, 16, 16), y.shape
    assert bool(jnp.all(jnp.isfinite(y)))
    assert bool(jnp.all((y >= 0.0) & (y <= 1.0)))  # sigmoid output range
    print("KERNEL_OK")
</pallas_src>

<mosaic_0001>
module attributes {stable_mosaic.version = 11 : i64} {
  func.func @_conv3x3_bn_relu_kernel(%arg0: i32, %arg1: memref<1x16x342xbf16, #tpu.memory_space<vmem>>, %arg2: memref<16x144xbf16, #tpu.memory_space<vmem>>, %arg3: memref<16x1xf32, #tpu.memory_space<vmem>>, %arg4: memref<1x288xf32, #tpu.memory_space<vmem>>, %arg5: memref<1x16x342xbf16, #tpu.memory_space<vmem>>) attributes {dimension_semantics = [#tpu.dimension_semantics<parallel>], iteration_bounds = array<i64: 2>, scalar_prefetch = 0 : i64, scratch_operands = 0 : i64, tpu.core_type = #tpu.core_type<tc>, window_params = [{transform_indices = @transform_0, window_bounds = array<i64: 1, 16, 342>}, {pipeline_mode = #tpu.pipeline_mode<synchronous>, transform_indices = @transform_1, window_bounds = array<i64: 16, 144>}, {pipeline_mode = #tpu.pipeline_mode<synchronous>, transform_indices = @transform_2, window_bounds = array<i64: 16, 1>}, {pipeline_mode = #tpu.pipeline_mode<synchronous>, transform_indices = @transform_3, window_bounds = array<i64: 1, 288>}, {transform_indices = @transform_4, window_bounds = array<i64: 1, 16, 342>}]} {
    %c0 = arith.constant 0 : index
    %c0_0 = arith.constant 0 : index
    %c0_1 = arith.constant 0 : index
    %0 = vector.load %arg1[%c0, %c0_0, %c0_1] : memref<1x16x342xbf16, #tpu.memory_space<vmem>>, vector<1x16x342xbf16>
    %1 = vector.shape_cast %0 : vector<1x16x342xbf16> to vector<16x342xbf16>
    %2 = vector.extract_strided_slice %1 {offsets = [0, 0], sizes = [16, 288], strides = [1, 1]} : vector<16x342xbf16> to vector<16x288xbf16>
    %3 = vector.extract_strided_slice %1 {offsets = [0, 1], sizes = [16, 288], strides = [1, 1]} : vector<16x342xbf16> to vector<16x288xbf16>
    %4 = vector.extract_strided_slice %1 {offsets = [0, 2], sizes = [16, 288], strides = [1, 1]} : vector<16x342xbf16> to vector<16x288xbf16>
    %5 = vector.extract_strided_slice %1 {offsets = [0, 18], sizes = [16, 288], strides = [1, 1]} : vector<16x342xbf16> to vector<16x288xbf16>
    %6 = vector.extract_strided_slice %1 {offsets = [0, 19], sizes = [16, 288], strides = [1, 1]} : vector<16x342xbf16> to vector<16x288xbf16>
    %7 = vector.extract_strided_slice %1 {offsets = [0, 20], sizes = [16, 288], strides = [1, 1]} : vector<16x342xbf16> to vector<16x288xbf16>
    %8 = vector.extract_strided_slice %1 {offsets = [0, 36], sizes = [16, 288], strides = [1, 1]} : vector<16x342xbf16> to vector<16x288xbf16>
    %9 = vector.extract_strided_slice %1 {offsets = [0, 37], sizes = [16, 288], strides = [1, 1]} : vector<16x342xbf16> to vector<16x288xbf16>
    %10 = vector.extract_strided_slice %1 {offsets = [0, 38], sizes = [16, 288], strides = [1, 1]} : vector<16x342xbf16> to vector<16x288xbf16>
    %11 = tpu.concatenate %2, %3, %4, %5, %6, %7, %8, %9, %10 in 0 : vector<16x288xbf16>, vector<16x288xbf16>, vector<16x288xbf16>, vector<16x288xbf16>, vector<16x288xbf16>, vector<16x288xbf16>, vector<16x288xbf16>, vector<16x288xbf16>, vector<16x288xbf16> -> vector<144x288xbf16>
    %c0_2 = arith.constant 0 : index
    %c0_3 = arith.constant 0 : index
    %12 = vector.load %arg2[%c0_2, %c0_3] : memref<16x144xbf16, #tpu.memory_space<vmem>>, vector<16x144xbf16>
    %cst = arith.constant dense<0.000000e+00> : vector<16x288xf32>
    %13 = tpu.matmul %12, %11, %cst {dimension_numbers = #tpu.dot_dimension_numbers<[1], [0], [0], [1], [0, 0, 1, 1], [], []>} : vector<16x144xbf16>, vector<144x288xbf16>, vector<16x288xf32> -> vector<16x288xf32>
    %c0_4 = arith.constant 0 : index
    %c0_5 = arith.constant 0 : index
    %14 = vector.load %arg3[%c0_4, %c0_5] : memref<16x1xf32, #tpu.memory_space<vmem>>, vector<16x1xf32>
    %15 = vector.broadcast %14 : vector<16x1xf32> to vector<16x288xf32>
    %16 = arith.addf %13, %15 : vector<16x288xf32>
    %cst_6 = arith.constant 0.000000e+00 : f32
    %17 = vector.broadcast %cst_6 : f32 to vector<16x288xf32>
    %18 = arith.maximumf %16, %17 : vector<16x288xf32>
    %c0_7 = arith.constant 0 : index
    %c0_8 = arith.constant 0 : index
    %19 = vector.load %arg4[%c0_7, %c0_8] : memref<1x288xf32, #tpu.memory_space<vmem>>, vector<1x288xf32>
    %20 = vector.broadcast %19 : vector<1x288xf32> to vector<16x288xf32>
    %21 = arith.mulf %18, %20 : vector<16x288xf32>
    %22 = arith.truncf %21 : vector<16x288xf32> to vector<16x288xbf16>
    %cst_9 = arith.constant 0.000000e+00 : bf16
    %23 = vector.broadcast %cst_9 : bf16 to vector<16x19xbf16>
    %c0_10 = arith.constant 0 : index
    %c0_11 = arith.constant 0 : index
    %c0_12 = arith.constant 0 : index
    %24 = vector.load %arg5[%c0_10, %c0_11, %c0_12] : memref<1x16x342xbf16, #tpu.memory_space<vmem>>, vector<1x16x19xbf16>
    %25 = vector.shape_cast %24 : vector<1x16x19xbf16> to vector<16x19xbf16>
    %26 = vector.shape_cast %23 : vector<16x19xbf16> to vector<1x16x19xbf16>
    tpu.vector_store %arg5[%c0_10, %c0_11, %c0_12], %26 {strides = array<i32>} : memref<1x16x342xbf16, #tpu.memory_space<vmem>>, vector<1x16x19xbf16>,
    %c0_13 = arith.constant 0 : index
    %c0_14 = arith.constant 0 : index
    %c19 = arith.constant 19 : index
    %27 = vector.load %arg5[%c0_13, %c0_14, %c19] : memref<1x16x342xbf16, #tpu.memory_space<vmem>>, vector<1x16x288xbf16>
    %28 = vector.shape_cast %27 : vector<1x16x288xbf16> to vector<16x288xbf16>
    %29 = vector.shape_cast %22 : vector<16x288xbf16> to vector<1x16x288xbf16>
    tpu.vector_store %arg5[%c0_13, %c0_14, %c19], %29 {strides = array<i32>} : memref<1x16x342xbf16, #tpu.memory_space<vmem>>, vector<1x16x288xbf16>,
    %cst_15 = arith.constant 0.000000e+00 : bf16
    %30 = vector.broadcast %cst_15 : bf16 to vector<16x35xbf16>
    %c0_16 = arith.constant 0 : index
    %c0_17 = arith.constant 0 : index
    %c307 = arith.constant 307 : index
    %31 = vector.load %arg5[%c0_16, %c0_17, %c307] : memref<1x16x342xbf16, #tpu.memory_space<vmem>>, vector<1x16x35xbf16>
    %32 = vector.shape_cast %31 : vector<1x16x35xbf16> to vector<16x35xbf16>
    %33 = vector.shape_cast %30 : vector<16x35xbf16> to vector<1x16x35xbf16>
    tpu.vector_store %arg5[%c0_16, %c0_17, %c307], %33 {strides = array<i32>} : memref<1x16x342xbf16, #tpu.memory_space<vmem>>, vector<1x16x35xbf16>,
    return
  }
  func.func @transform_0(%arg0: i32) -> (i32, i32, i32) {
    %c0_i32 = arith.constant 0 : i32
    %c0_i32_0 = arith.constant 0 : i32
    %c0_i32_1 = arith.constant 0 : i32
    return %arg0, %c0_i32, %c0_i32_0 : i32, i32, i32
  }
  func.func @transform_1(%arg0: i32) -> (i32, i32) {
    %c0_i32 = arith.constant 0 : i32
    %c0_i32_0 = arith.constant 0 : i32
    %c0_i32_1 = arith.constant 0 : i32
    return %c0_i32, %c0_i32_0 : i32, i32
  }
  func.func @transform_2(%arg0: i32) -> (i32, i32) {
    %c0_i32 = arith.constant 0 : i32
    %c0_i32_0 = arith.constant 0 : i32
    %c0_i32_1 = arith.constant 0 : i32
    return %c0_i32, %c0_i32_0 : i32, i32
  }
  func.func @transform_3(%arg0: i32) -> (i32, i32) {
    %c0_i32 = arith.constant 0 : i32
    %c0_i32_0 = arith.constant 0 : i32
    %c0_i32_1 = arith.constant 0 : i32
    return %c0_i32, %c0_i32_0 : i32, i32
  }
  func.func @transform_4(%arg0: i32) -> (i32, i32, i32) {
    %c0_i32 = arith.constant 0 : i32
    %c0_i32_0 = arith.constant 0 : i32
    %c0_i32_1 = arith.constant 0 : i32
    return %arg0, %c0_i32, %c0_i32_0 : i32, i32, i32
  }
}

module attributes {stable_mosaic.version = 11 : i64} {
  func.func @_conv3x3_bn_relu_kernel(%arg0: i32, %arg1: memref<1x32x110xbf16, #tpu.memory_space<vmem>>, %arg2: memref<32x288xbf16, #tpu.memory_space<vmem>>, %arg3: memref<32x1xf32, #tpu.memory_space<vmem>>, %arg4: memref<1x80xf32, #tpu.memory_space<vmem>>, %arg5: memref<1x32x110xbf16, #tpu.memory_space<vmem>>) attributes {dimension_semantics = [#tpu.dimension_semantics<parallel>], iteration_bounds = array<i64: 2>, scalar_prefetch = 0 : i64, scratch_operands = 0 : i64, tpu.core_type = #tpu.core_type<tc>, window_params = [{transform_indices = @transform_0, window_bounds = array<i64: 1, 32, 110>}, {pipeline_mode = #tpu.pipeline_mode<synchronous>, transform_indices = @transform_1, window_bounds = array<i64: 32, 288>}, {pipeline_mode = #tpu.pipeline_mode<synchronous>, transform_indices = @transform_2, window_bounds = array<i64: 32, 1>}, {pipeline_mode = #tpu.pipeline_mode<synchronous>, transform_indices = @transform_3, window_bounds = array<i64: 1, 80>}, {transform_indices = @transform_4, window_bounds = array<i64: 1, 32, 110>}]} {
    %c0 = arith.constant 0 : index
    %c0_0 = arith.constant 0 : index
    %c0_1 = arith.constant 0 : index
    %0 = vector.load %arg1[%c0, %c0_0, %c0_1] : memref<1x32x110xbf16, #tpu.memory_space<vmem>>, vector<1x32x110xbf16>
    %1 = vector.shape_cast %0 : vector<1x32x110xbf16> to vector<32x110xbf16>
    %2 = vector.extract_strided_slice %1 {offsets = [0, 0], sizes = [32, 80], strides = [1, 1]} : vector<32x110xbf16> to vector<32x80xbf16>
    %3 = vector.extract_strided_slice %1 {offsets = [0, 1], sizes = [32, 80], strides = [1, 1]} : vector<32x110xbf16> to vector<32x80xbf16>
    %4 = vector.extract_strided_slice %1 {offsets = [0, 2], sizes = [32, 80], strides = [1, 1]} : vector<32x110xbf16> to vector<32x80xbf16>
    %5 = vector.extract_strided_slice %1 {offsets = [0, 10], sizes = [32, 80], strides = [1, 1]} : vector<32x110xbf16> to vector<32x80xbf16>
    %6 = vector.extract_strided_slice %1 {offsets = [0, 11], sizes = [32, 80], strides = [1, 1]} : vector<32x110xbf16> to vector<32x80xbf16>
    %7 = vector.extract_strided_slice %1 {offsets = [0, 12], sizes = [32, 80], strides = [1, 1]} : vector<32x110xbf16> to vector<32x80xbf16>
    %8 = vector.extract_strided_slice %1 {offsets = [0, 20], sizes = [32, 80], strides = [1, 1]} : vector<32x110xbf16> to vector<32x80xbf16>
    %9 = vector.extract_strided_slice %1 {offsets = [0, 21], sizes = [32, 80], strides = [1, 1]} : vector<32x110xbf16> to vector<32x80xbf16>
    %10 = vector.extract_strided_slice %1 {offsets = [0, 22], sizes = [32, 80], strides = [1, 1]} : vector<32x110xbf16> to vector<32x80xbf16>
    %11 = tpu.concatenate %2, %3, %4, %5, %6, %7, %8, %9, %10 in 0 : vector<32x80xbf16>, vector<32x80xbf16>, vector<32x80xbf16>, vector<32x80xbf16>, vector<32x80xbf16>, vector<32x80xbf16>, vector<32x80xbf16>, vector<32x80xbf16>, vector<32x80xbf16> -> vector<288x80xbf16>
    %c0_2 = arith.constant 0 : index
    %c0_3 = arith.constant 0 : index
    %12 = vector.load %arg2[%c0_2, %c0_3] : memref<32x288xbf16, #tpu.memory_space<vmem>>, vector<32x288xbf16>
    %cst = arith.constant dense<0.000000e+00> : vector<32x80xf32>
    %13 = tpu.matmul %12, %11, %cst {dimension_numbers = #tpu.dot_dimension_numbers<[1], [0], [0], [1], [0, 0, 1, 1], [], []>} : vector<32x288xbf16>, vector<288x80xbf16>, vector<32x80xf32> -> vector<32x80xf32>
    %c0_4 = arith.constant 0 : index
    %c0_5 = arith.constant 0 : index
    %14 = vector.load %arg3[%c0_4, %c0_5] : memref<32x1xf32, #tpu.memory_space<vmem>>, vector<32x1xf32>
    %15 = vector.broadcast %14 : vector<32x1xf32> to vector<32x80xf32>
    %16 = arith.addf %13, %15 : vector<32x80xf32>
    %cst_6 = arith.constant 0.000000e+00 : f32
    %17 = vector.broadcast %cst_6 : f32 to vector<32x80xf32>
    %18 = arith.maximumf %16, %17 : vector<32x80xf32>
    %c0_7 = arith.constant 0 : index
    %c0_8 = arith.constant 0 : index
    %19 = vector.load %arg4[%c0_7, %c0_8] : memref<1x80xf32, #tpu.memory_space<vmem>>, vector<1x80xf32>
    %20 = vector.broadcast %19 : vector<1x80xf32> to vector<32x80xf32>
    %21 = arith.mulf %18, %20 : vector<32x80xf32>
    %22 = arith.truncf %21 : vector<32x80xf32> to vector<32x80xbf16>
    %cst_9 = arith.constant 0.000000e+00 : bf16
    %23 = vector.broadcast %cst_9 : bf16 to vector<32x11xbf16>
    %c0_10 = arith.constant 0 : index
    %c0_11 = arith.constant 0 : index
    %c0_12 = arith.constant 0 : index
    %24 = vector.load %arg5[%c0_10, %c0_11, %c0_12] : memref<1x32x110xbf16, #tpu.memory_space<vmem>>, vector<1x32x11xbf16>
    %25 = vector.shape_cast %24 : vector<1x32x11xbf16> to vector<32x11xbf16>
    %26 = vector.shape_cast %23 : vector<32x11xbf16> to vector<1x32x11xbf16>
    tpu.vector_store %arg5[%c0_10, %c0_11, %c0_12], %26 {strides = array<i32>} : memref<1x32x110xbf16, #tpu.memory_space<vmem>>, vector<1x32x11xbf16>,
    %c0_13 = arith.constant 0 : index
    %c0_14 = arith.constant 0 : index
    %c11 = arith.constant 11 : index
    %27 = vector.load %arg5[%c0_13, %c0_14, %c11] : memref<1x32x110xbf16, #tpu.memory_space<vmem>>, vector<1x32x80xbf16>
    %28 = vector.shape_cast %27 : vector<1x32x80xbf16> to vector<32x80xbf16>
    %29 = vector.shape_cast %22 : vector<32x80xbf16> to vector<1x32x80xbf16>
    tpu.vector_store %arg5[%c0_13, %c0_14, %c11], %29 {strides = array<i32>} : memref<1x32x110xbf16, #tpu.memory_space<vmem>>, vector<1x32x80xbf16>,
    %cst_15 = arith.constant 0.000000e+00 : bf16
    %30 = vector.broadcast %cst_15 : bf16 to vector<32x19xbf16>
    %c0_16 = arith.constant 0 : index
    %c0_17 = arith.constant 0 : index
    %c91 = arith.constant 91 : index
    %31 = vector.load %arg5[%c0_16, %c0_17, %c91] : memref<1x32x110xbf16, #tpu.memory_space<vmem>>, vector<1x32x19xbf16>
    %32 = vector.shape_cast %31 : vector<1x32x19xbf16> to vector<32x19xbf16>
    %33 = vector.shape_cast %30 : vector<32x19xbf16> to vector<1x32x19xbf16>
    tpu.vector_store %arg5[%c0_16, %c0_17, %c91], %33 {strides = array<i32>} : memref<1x32x110xbf16, #tpu.memory_space<vmem>>, vector<1x32x19xbf16>,
    return
  }
  func.func @transform_0(%arg0: i32) -> (i32, i32, i32) {
    %c0_i32 = arith.constant 0 : i32
    %c0_i32_0 = arith.constant 0 : i32
    %c0_i32_1 = arith.constant 0 : i32
    return %arg0, %c0_i32, %c0_i32_0 : i32, i32, i32
  }
  func.func @transform_1(%arg0: i32) -> (i32, i32) {
    %c0_i32 = arith.constant 0 : i32
    %c0_i32_0 = arith.constant 0 : i32
    %c0_i32_1 = arith.constant 0 : i32
    return %c0_i32, %c0_i32_0 : i32, i32
  }
  func.func @transform_2(%arg0: i32) -> (i32, i32) {
    %c0_i32 = arith.constant 0 : i32
    %c0_i32_0 = arith.constant 0 : i32
    %c0_i32_1 = arith.constant 0 : i32
    return %c0_i32, %c0_i32_0 : i32, i32
  }
  func.func @transform_3(%arg0: i32) -> (i32, i32) {
    %c0_i32 = arith.constant 0 : i32
    %c0_i32_0 = arith.constant 0 : i32
    %c0_i32_1 = arith.constant 0 : i32
    return %c0_i32, %c0_i32_0 : i32, i32
  }
  func.func @transform_4(%arg0: i32) -> (i32, i32, i32) {
    %c0_i32 = arith.constant 0 : i32
    %c0_i32_0 = arith.constant 0 : i32
    %c0_i32_1 = arith.constant 0 : i32
    return %arg0, %c0_i32, %c0_i32_0 : i32, i32, i32
  }
}

module attributes {stable_mosaic.version = 11 : i64} {
  func.func @_conv3x3_bn_relu_kernel(%arg0: i32, %arg1: memref<1x16x110xbf16, #tpu.memory_space<vmem>>, %arg2: memref<32x144xbf16, #tpu.memory_space<vmem>>, %arg3: memref<32x1xf32, #tpu.memory_space<vmem>>, %arg4: memref<1x80xf32, #tpu.memory_space<vmem>>, %arg5: memref<1x32x110xbf16, #tpu.memory_space<vmem>>) attributes {dimension_semantics = [#tpu.dimension_semantics<parallel>], iteration_bounds = array<i64: 2>, scalar_prefetch = 0 : i64, scratch_operands = 0 : i64, tpu.core_type = #tpu.core_type<tc>, window_params = [{transform_indices = @transform_0, window_bounds = array<i64: 1, 16, 110>}, {pipeline_mode = #tpu.pipeline_mode<synchronous>, transform_indices = @transform_1, window_bounds = array<i64: 32, 144>}, {pipeline_mode = #tpu.pipeline_mode<synchronous>, transform_indices = @transform_2, window_bounds = array<i64: 32, 1>}, {pipeline_mode = #tpu.pipeline_mode<synchronous>, transform_indices = @transform_3, window_bounds = array<i64: 1, 80>}, {transform_indices = @transform_4, window_bounds = array<i64: 1, 32, 110>}]} {
    %c0 = arith.constant 0 : index
    %c0_0 = arith.constant 0 : index
    %c0_1 = arith.constant 0 : index
    %0 = vector.load %arg1[%c0, %c0_0, %c0_1] : memref<1x16x110xbf16, #tpu.memory_space<vmem>>, vector<1x16x110xbf16>
    %1 = vector.shape_cast %0 : vector<1x16x110xbf16> to vector<16x110xbf16>
    %2 = vector.extract_strided_slice %1 {offsets = [0, 0], sizes = [16, 80], strides = [1, 1]} : vector<16x110xbf16> to vector<16x80xbf16>
    %3 = vector.extract_strided_slice %1 {offsets = [0, 1], sizes = [16, 80], strides = [1, 1]} : vector<16x110xbf16> to vector<16x80xbf16>
    %4 = vector.extract_strided_slice %1 {offsets = [0, 2], sizes = [16, 80], strides = [1, 1]} : vector<16x110xbf16> to vector<16x80xbf16>
    %5 = vector.extract_strided_slice %1 {offsets = [0, 10], sizes = [16, 80], strides = [1, 1]} : vector<16x110xbf16> to vector<16x80xbf16>
    %6 = vector.extract_strided_slice %1 {offsets = [0, 11], sizes = [16, 80], strides = [1, 1]} : vector<16x110xbf16> to vector<16x80xbf16>
    %7 = vector.extract_strided_slice %1 {offsets = [0, 12], sizes = [16, 80], strides = [1, 1]} : vector<16x110xbf16> to vector<16x80xbf16>
    %8 = vector.extract_strided_slice %1 {offsets = [0, 20], sizes = [16, 80], strides = [1, 1]} : vector<16x110xbf16> to vector<16x80xbf16>
    %9 = vector.extract_strided_slice %1 {offsets = [0, 21], sizes = [16, 80], strides = [1, 1]} : vector<16x110xbf16> to vector<16x80xbf16>
    %10 = vector.extract_strided_slice %1 {offsets = [0, 22], sizes = [16, 80], strides = [1, 1]} : vector<16x110xbf16> to vector<16x80xbf16>
    %11 = tpu.concatenate %2, %3, %4, %5, %6, %7, %8, %9, %10 in 0 : vector<16x80xbf16>, vector<16x80xbf16>, vector<16x80xbf16>, vector<16x80xbf16>, vector<16x80xbf16>, vector<16x80xbf16>, vector<16x80xbf16>, vector<16x80xbf16>, vector<16x80xbf16> -> vector<144x80xbf16>
    %c0_2 = arith.constant 0 : index
    %c0_3 = arith.constant 0 : index
    %12 = vector.load %arg2[%c0_2, %c0_3] : memref<32x144xbf16, #tpu.memory_space<vmem>>, vector<32x144xbf16>
    %cst = arith.constant dense<0.000000e+00> : vector<32x80xf32>
    %13 = tpu.matmul %12, %11, %cst {dimension_numbers = #tpu.dot_dimension_numbers<[1], [0], [0], [1], [0, 0, 1, 1], [], []>} : vector<32x144xbf16>, vector<144x80xbf16>, vector<32x80xf32> -> vector<32x80xf32>
    %c0_4 = arith.constant 0 : index
    %c0_5 = arith.constant 0 : index
    %14 = vector.load %arg3[%c0_4, %c0_5] : memref<32x1xf32, #tpu.memory_space<vmem>>, vector<32x1xf32>
    %15 = vector.broadcast %14 : vector<32x1xf32> to vector<32x80xf32>
    %16 = arith.addf %13, %15 : vector<32x80xf32>
    %cst_6 = arith.constant 0.000000e+00 : f32
    %17 = vector.broadcast %cst_6 : f32 to vector<32x80xf32>
    %18 = arith.maximumf %16, %17 : vector<32x80xf32>
    %c0_7 = arith.constant 0 : index
    %c0_8 = arith.constant 0 : index
    %19 = vector.load %arg4[%c0_7, %c0_8] : memref<1x80xf32, #tpu.memory_space<vmem>>, vector<1x80xf32>
    %20 = vector.broadcast %19 : vector<1x80xf32> to vector<32x80xf32>
    %21 = arith.mulf %18, %20 : vector<32x80xf32>
    %22 = arith.truncf %21 : vector<32x80xf32> to vector<32x80xbf16>
    %cst_9 = arith.constant 0.000000e+00 : bf16
    %23 = vector.broadcast %cst_9 : bf16 to vector<32x11xbf16>
    %c0_10 = arith.constant 0 : index
    %c0_11 = arith.constant 0 : index
    %c0_12 = arith.constant 0 : index
    %24 = vector.load %arg5[%c0_10, %c0_11, %c0_12] : memref<1x32x110xbf16, #tpu.memory_space<vmem>>, vector<1x32x11xbf16>
    %25 = vector.shape_cast %24 : vector<1x32x11xbf16> to vector<32x11xbf16>
    %26 = vector.shape_cast %23 : vector<32x11xbf16> to vector<1x32x11xbf16>
    tpu.vector_store %arg5[%c0_10, %c0_11, %c0_12], %26 {strides = array<i32>} : memref<1x32x110xbf16, #tpu.memory_space<vmem>>, vector<1x32x11xbf16>,
    %c0_13 = arith.constant 0 : index
    %c0_14 = arith.constant 0 : index
    %c11 = arith.constant 11 : index
    %27 = vector.load %arg5[%c0_13, %c0_14, %c11] : memref<1x32x110xbf16, #tpu.memory_space<vmem>>, vector<1x32x80xbf16>
    %28 = vector.shape_cast %27 : vector<1x32x80xbf16> to vector<32x80xbf16>
    %29 = vector.shape_cast %22 : vector<32x80xbf16> to vector<1x32x80xbf16>
    tpu.vector_store %arg5[%c0_13, %c0_14, %c11], %29 {strides = array<i32>} : memref<1x32x110xbf16, #tpu.memory_space<vmem>>, vector<1x32x80xbf16>,
    %cst_15 = arith.constant 0.000000e+00 : bf16
    %30 = vector.broadcast %cst_15 : bf16 to vector<32x19xbf16>
    %c0_16 = arith.constant 0 : index
    %c0_17 = arith.constant 0 : index
    %c91 = arith.constant 91 : index
    %31 = vector.load %arg5[%c0_16, %c0_17, %c91] : memref<1x32x110xbf16, #tpu.memory_space<vmem>>, vector<1x32x19xbf16>
    %32 = vector.shape_cast %31 : vector<1x32x19xbf16> to vector<32x19xbf16>
    %33 = vector.shape_cast %30 : vector<32x19xbf16> to vector<1x32x19xbf16>
    tpu.vector_store %arg5[%c0_16, %c0_17, %c91], %33 {strides = array<i32>} : memref<1x32x110xbf16, #tpu.memory_space<vmem>>, vector<1x32x19xbf16>,
    return
  }
  func.func @transform_0(%arg0: i32) -> (i32, i32, i32) {
    %c0_i32 = arith.constant 0 : i32
    %c0_i32_0 = arith.constant 0 : i32
    %c0_i32_1 = arith.constant 0 : i32
    return %arg0, %c0_i32, %c0_i32_0 : i32, i32, i32
  }
  func.func @transform_1(%arg0: i32) -> (i32, i32) {
    %c0_i32 = arith.constant 0 : i32
    %c0_i32_0 = arith.constant 0 : i32
    %c0_i32_1 = arith.constant 0 : i32
    return %c0_i32, %c0_i32_0 : i32, i32
  }
  func.func @transform_2(%arg0: i32) -> (i32, i32) {
    %c0_i32 = arith.constant 0 : i32
    %c0_i32_0 = arith.constant 0 : i32
    %c0_i32_1 = arith.constant 0 : i32
    return %c0_i32, %c0_i32_0 : i32, i32
  }
  func.func @transform_3(%arg0: i32) -> (i32, i32) {
    %c0_i32 = arith.constant 0 : i32
    %c0_i32_0 = arith.constant 0 : i32
    %c0_i32_1 = arith.constant 0 : i32
    return %c0_i32, %c0_i32_0 : i32, i32
  }
  func.func @transform_4(%arg0: i32) -> (i32, i32, i32) {
    %c0_i32 = arith.constant 0 : i32
    %c0_i32_0 = arith.constant 0 : i32
    %c0_i32_1 = arith.constant 0 : i32
    return %arg0, %c0_i32, %c0_i32_0 : i32, i32, i32
  }
}

module attributes {stable_mosaic.version = 11 : i64} {
  func.func @_conv3x3_bn_relu_kernel(%arg0: i32, %arg1: memref<1x64x42xbf16, #tpu.memory_space<vmem>>, %arg2: memref<64x576xbf16, #tpu.memory_space<vmem>>, %arg3: memref<64x1xf32, #tpu.memory_space<vmem>>, %arg4: memref<1x24xf32, #tpu.memory_space<vmem>>, %arg5: memref<1x64x42xbf16, #tpu.memory_space<vmem>>) attributes {dimension_semantics = [#tpu.dimension_semantics<parallel>], iteration_bounds = array<i64: 2>, scalar_prefetch = 0 : i64, scratch_operands = 0 : i64, tpu.core_type = #tpu.core_type<tc>, window_params = [{transform_indices = @transform_0, window_bounds = array<i64: 1, 64, 42>}, {pipeline_mode = #tpu.pipeline_mode<synchronous>, transform_indices = @transform_1, window_bounds = array<i64: 64, 576>}, {pipeline_mode = #tpu.pipeline_mode<synchronous>, transform_indices = @transform_2, window_bounds = array<i64: 64, 1>}, {pipeline_mode = #tpu.pipeline_mode<synchronous>, transform_indices = @transform_3, window_bounds = array<i64: 1, 24>}, {transform_indices = @transform_4, window_bounds = array<i64: 1, 64, 42>}]} {
    %c0 = arith.constant 0 : index
    %c0_0 = arith.constant 0 : index
    %c0_1 = arith.constant 0 : index
    %0 = vector.load %arg1[%c0, %c0_0, %c0_1] : memref<1x64x42xbf16, #tpu.memory_space<vmem>>, vector<1x64x42xbf16>
    %1 = vector.shape_cast %0 : vector<1x64x42xbf16> to vector<64x42xbf16>
    %2 = vector.extract_strided_slice %1 {offsets = [0, 0], sizes = [64, 24], strides = [1, 1]} : vector<64x42xbf16> to vector<64x24xbf16>
    %3 = vector.extract_strided_slice %1 {offsets = [0, 1], sizes = [64, 24], strides = [1, 1]} : vector<64x42xbf16> to vector<64x24xbf16>
    %4 = vector.extract_strided_slice %1 {offsets = [0, 2], sizes = [64, 24], strides = [1, 1]} : vector<64x42xbf16> to vector<64x24xbf16>
    %5 = vector.extract_strided_slice %1 {offsets = [0, 6], sizes = [64, 24], strides = [1, 1]} : vector<64x42xbf16> to vector<64x24xbf16>
    %6 = vector.extract_strided_slice %1 {offsets = [0, 7], sizes = [64, 24], strides = [1, 1]} : vector<64x42xbf16> to vector<64x24xbf16>
    %7 = vector.extract_strided_slice %1 {offsets = [0, 8], sizes = [64, 24], strides = [1, 1]} : vector<64x42xbf16> to vector<64x24xbf16>
    %8 = vector.extract_strided_slice %1 {offsets = [0, 12], sizes = [64, 24], strides = [1, 1]} : vector<64x42xbf16> to vector<64x24xbf16>
    %9 = vector.extract_strided_slice %1 {offsets = [0, 13], sizes = [64, 24], strides = [1, 1]} : vector<64x42xbf16> to vector<64x24xbf16>
    %10 = vector.extract_strided_slice %1 {offsets = [0, 14], sizes = [64, 24], strides = [1, 1]} : vector<64x42xbf16> to vector<64x24xbf16>
    %11 = tpu.concatenate %2, %3, %4, %5, %6, %7, %8, %9, %10 in 0 : vector<64x24xbf16>, vector<64x24xbf16>, vector<64x24xbf16>, vector<64x24xbf16>, vector<64x24xbf16>, vector<64x24xbf16>, vector<64x24xbf16>, vector<64x24xbf16>, vector<64x24xbf16> -> vector<576x24xbf16>
    %c0_2 = arith.constant 0 : index
    %c0_3 = arith.constant 0 : index
    %12 = vector.load %arg2[%c0_2, %c0_3] : memref<64x576xbf16, #tpu.memory_space<vmem>>, vector<64x576xbf16>
    %cst = arith.constant dense<0.000000e+00> : vector<64x24xf32>
    %13 = tpu.matmul %12, %11, %cst {dimension_numbers = #tpu.dot_dimension_numbers<[1], [0], [0], [1], [0, 0, 1, 1], [], []>} : vector<64x576xbf16>, vector<576x24xbf16>, vector<64x24xf32> -> vector<64x24xf32>
    %c0_4 = arith.constant 0 : index
    %c0_5 = arith.constant 0 : index
    %14 = vector.load %arg3[%c0_4, %c0_5] : memref<64x1xf32, #tpu.memory_space<vmem>>, vector<64x1xf32>
    %15 = vector.broadcast %14 : vector<64x1xf32> to vector<64x24xf32>
    %16 = arith.addf %13, %15 : vector<64x24xf32>
    %cst_6 = arith.constant 0.000000e+00 : f32
    %17 = vector.broadcast %cst_6 : f32 to vector<64x24xf32>
    %18 = arith.maximumf %16, %17 : vector<64x24xf32>
    %c0_7 = arith.constant 0 : index
    %c0_8 = arith.constant 0 : index
    %19 = vector.load %arg4[%c0_7, %c0_8] : memref<1x24xf32, #tpu.memory_space<vmem>>, vector<1x24xf32>
    %20 = vector.broadcast %19 : vector<1x24xf32> to vector<64x24xf32>
    %21 = arith.mulf %18, %20 : vector<64x24xf32>
    %22 = arith.truncf %21 : vector<64x24xf32> to vector<64x24xbf16>
    %cst_9 = arith.constant 0.000000e+00 : bf16
    %23 = vector.broadcast %cst_9 : bf16 to vector<64x7xbf16>
    %c0_10 = arith.constant 0 : index
    %c0_11 = arith.constant 0 : index
    %c0_12 = arith.constant 0 : index
    %24 = vector.load %arg5[%c0_10, %c0_11, %c0_12] : memref<1x64x42xbf16, #tpu.memory_space<vmem>>, vector<1x64x7xbf16>
    %25 = vector.shape_cast %24 : vector<1x64x7xbf16> to vector<64x7xbf16>
    %26 = vector.shape_cast %23 : vector<64x7xbf16> to vector<1x64x7xbf16>
    tpu.vector_store %arg5[%c0_10, %c0_11, %c0_12], %26 {strides = array<i32>} : memref<1x64x42xbf16, #tpu.memory_space<vmem>>, vector<1x64x7xbf16>,
    %c0_13 = arith.constant 0 : index
    %c0_14 = arith.constant 0 : index
    %c7 = arith.constant 7 : index
    %27 = vector.load %arg5[%c0_13, %c0_14, %c7] : memref<1x64x42xbf16, #tpu.memory_space<vmem>>, vector<1x64x24xbf16>
    %28 = vector.shape_cast %27 : vector<1x64x24xbf16> to vector<64x24xbf16>
    %29 = vector.shape_cast %22 : vector<64x24xbf16> to vector<1x64x24xbf16>
    tpu.vector_store %arg5[%c0_13, %c0_14, %c7], %29 {strides = array<i32>} : memref<1x64x42xbf16, #tpu.memory_space<vmem>>, vector<1x64x24xbf16>,
    %cst_15 = arith.constant 0.000000e+00 : bf16
    %30 = vector.broadcast %cst_15 : bf16 to vector<64x11xbf16>
    %c0_16 = arith.constant 0 : index
    %c0_17 = arith.constant 0 : index
    %c31 = arith.constant 31 : index
    %31 = vector.load %arg5[%c0_16, %c0_17, %c31] : memref<1x64x42xbf16, #tpu.memory_space<vmem>>, vector<1x64x11xbf16>
    %32 = vector.shape_cast %31 : vector<1x64x11xbf16> to vector<64x11xbf16>
    %33 = vector.shape_cast %30 : vector<64x11xbf16> to vector<1x64x11xbf16>
    tpu.vector_store %arg5[%c0_16, %c0_17, %c31], %33 {strides = array<i32>} : memref<1x64x42xbf16, #tpu.memory_space<vmem>>, vector<1x64x11xbf16>,
    return
  }
  func.func @transform_0(%arg0: i32) -> (i32, i32, i32) {
    %c0_i32 = arith.constant 0 : i32
    %c0_i32_0 = arith.constant 0 : i32
    %c0_i32_1 = arith.constant 0 : i32
    return %arg0, %c0_i32, %c0_i32_0 : i32, i32, i32
  }
  func.func @transform_1(%arg0: i32) -> (i32, i32) {
    %c0_i32 = arith.constant 0 : i32
    %c0_i32_0 = arith.constant 0 : i32
    %c0_i32_1 = arith.constant 0 : i32
    return %c0_i32, %c0_i32_0 : i32, i32
  }
  func.func @transform_2(%arg0: i32) -> (i32, i32) {
    %c0_i32 = arith.constant 0 : i32
    %c0_i32_0 = arith.constant 0 : i32
    %c0_i32_1 = arith.constant 0 : i32
    return %c0_i32, %c0_i32_0 : i32, i32
  }
  func.func @transform_3(%arg0: i32) -> (i32, i32) {
    %c0_i32 = arith.constant 0 : i32
    %c0_i32_0 = arith.constant 0 : i32
    %c0_i32_1 = arith.constant 0 : i32
    return %c0_i32, %c0_i32_0 : i32, i32
  }
  func.func @transform_4(%arg0: i32) -> (i32, i32, i32) {
    %c0_i32 = arith.constant 0 : i32
    %c0_i32_0 = arith.constant 0 : i32
    %c0_i32_1 = arith.constant 0 : i32
    return %arg0, %c0_i32, %c0_i32_0 : i32, i32, i32
  }
}

module attributes {stable_mosaic.version = 11 : i64} {
  func.func @_conv3x3_bn_relu_kernel(%arg0: i32, %arg1: memref<1x32x42xbf16, #tpu.memory_space<vmem>>, %arg2: memref<64x288xbf16, #tpu.memory_space<vmem>>, %arg3: memref<64x1xf32, #tpu.memory_space<vmem>>, %arg4: memref<1x24xf32, #tpu.memory_space<vmem>>, %arg5: memref<1x64x42xbf16, #tpu.memory_space<vmem>>) attributes {dimension_semantics = [#tpu.dimension_semantics<parallel>], iteration_bounds = array<i64: 2>, scalar_prefetch = 0 : i64, scratch_operands = 0 : i64, tpu.core_type = #tpu.core_type<tc>, window_params = [{transform_indices = @transform_0, window_bounds = array<i64: 1, 32, 42>}, {pipeline_mode = #tpu.pipeline_mode<synchronous>, transform_indices = @transform_1, window_bounds = array<i64: 64, 288>}, {pipeline_mode = #tpu.pipeline_mode<synchronous>, transform_indices = @transform_2, window_bounds = array<i64: 64, 1>}, {pipeline_mode = #tpu.pipeline_mode<synchronous>, transform_indices = @transform_3, window_bounds = array<i64: 1, 24>}, {transform_indices = @transform_4, window_bounds = array<i64: 1, 64, 42>}]} {
    %c0 = arith.constant 0 : index
    %c0_0 = arith.constant 0 : index
    %c0_1 = arith.constant 0 : index
    %0 = vector.load %arg1[%c0, %c0_0, %c0_1] : memref<1x32x42xbf16, #tpu.memory_space<vmem>>, vector<1x32x42xbf16>
    %1 = vector.shape_cast %0 : vector<1x32x42xbf16> to vector<32x42xbf16>
    %2 = vector.extract_strided_slice %1 {offsets = [0, 0], sizes = [32, 24], strides = [1, 1]} : vector<32x42xbf16> to vector<32x24xbf16>
    %3 = vector.extract_strided_slice %1 {offsets = [0, 1], sizes = [32, 24], strides = [1, 1]} : vector<32x42xbf16> to vector<32x24xbf16>
    %4 = vector.extract_strided_slice %1 {offsets = [0, 2], sizes = [32, 24], strides = [1, 1]} : vector<32x42xbf16> to vector<32x24xbf16>
    %5 = vector.extract_strided_slice %1 {offsets = [0, 6], sizes = [32, 24], strides = [1, 1]} : vector<32x42xbf16> to vector<32x24xbf16>
    %6 = vector.extract_strided_slice %1 {offsets = [0, 7], sizes = [32, 24], strides = [1, 1]} : vector<32x42xbf16> to vector<32x24xbf16>
    %7 = vector.extract_strided_slice %1 {offsets = [0, 8], sizes = [32, 24], strides = [1, 1]} : vector<32x42xbf16> to vector<32x24xbf16>
    %8 = vector.extract_strided_slice %1 {offsets = [0, 12], sizes = [32, 24], strides = [1, 1]} : vector<32x42xbf16> to vector<32x24xbf16>
    %9 = vector.extract_strided_slice %1 {offsets = [0, 13], sizes = [32, 24], strides = [1, 1]} : vector<32x42xbf16> to vector<32x24xbf16>
    %10 = vector.extract_strided_slice %1 {offsets = [0, 14], sizes = [32, 24], strides = [1, 1]} : vector<32x42xbf16> to vector<32x24xbf16>
    %11 = tpu.concatenate %2, %3, %4, %5, %6, %7, %8, %9, %10 in 0 : vector<32x24xbf16>, vector<32x24xbf16>, vector<32x24xbf16>, vector<32x24xbf16>, vector<32x24xbf16>, vector<32x24xbf16>, vector<32x24xbf16>, vector<32x24xbf16>, vector<32x24xbf16> -> vector<288x24xbf16>
    %c0_2 = arith.constant 0 : index
    %c0_3 = arith.constant 0 : index
    %12 = vector.load %arg2[%c0_2, %c0_3] : memref<64x288xbf16, #tpu.memory_space<vmem>>, vector<64x288xbf16>
    %cst = arith.constant dense<0.000000e+00> : vector<64x24xf32>
    %13 = tpu.matmul %12, %11, %cst {dimension_numbers = #tpu.dot_dimension_numbers<[1], [0], [0], [1], [0, 0, 1, 1], [], []>} : vector<64x288xbf16>, vector<288x24xbf16>, vector<64x24xf32> -> vector<64x24xf32>
    %c0_4 = arith.constant 0 : index
    %c0_5 = arith.constant 0 : index
    %14 = vector.load %arg3[%c0_4, %c0_5] : memref<64x1xf32, #tpu.memory_space<vmem>>, vector<64x1xf32>
    %15 = vector.broadcast %14 : vector<64x1xf32> to vector<64x24xf32>
    %16 = arith.addf %13, %15 : vector<64x24xf32>
    %cst_6 = arith.constant 0.000000e+00 : f32
    %17 = vector.broadcast %cst_6 : f32 to vector<64x24xf32>
    %18 = arith.maximumf %16, %17 : vector<64x24xf32>
    %c0_7 = arith.constant 0 : index
    %c0_8 = arith.constant 0 : index
    %19 = vector.load %arg4[%c0_7, %c0_8] : memref<1x24xf32, #tpu.memory_space<vmem>>, vector<1x24xf32>
    %20 = vector.broadcast %19 : vector<1x24xf32> to vector<64x24xf32>
    %21 = arith.mulf %18, %20 : vector<64x24xf32>
    %22 = arith.truncf %21 : vector<64x24xf32> to vector<64x24xbf16>
    %cst_9 = arith.constant 0.000000e+00 : bf16
    %23 = vector.broadcast %cst_9 : bf16 to vector<64x7xbf16>
    %c0_10 = arith.constant 0 : index
    %c0_11 = arith.constant 0 : index
    %c0_12 = arith.constant 0 : index
    %24 = vector.load %arg5[%c0_10, %c0_11, %c0_12] : memref<1x64x42xbf16, #tpu.memory_space<vmem>>, vector<1x64x7xbf16>
    %25 = vector.shape_cast %24 : vector<1x64x7xbf16> to vector<64x7xbf16>
    %26 = vector.shape_cast %23 : vector<64x7xbf16> to vector<1x64x7xbf16>
    tpu.vector_store %arg5[%c0_10, %c0_11, %c0_12], %26 {strides = array<i32>} : memref<1x64x42xbf16, #tpu.memory_space<vmem>>, vector<1x64x7xbf16>,
    %c0_13 = arith.constant 0 : index
    %c0_14 = arith.constant 0 : index
    %c7 = arith.constant 7 : index
    %27 = vector.load %arg5[%c0_13, %c0_14, %c7] : memref<1x64x42xbf16, #tpu.memory_space<vmem>>, vector<1x64x24xbf16>
    %28 = vector.shape_cast %27 : vector<1x64x24xbf16> to vector<64x24xbf16>
    %29 = vector.shape_cast %22 : vector<64x24xbf16> to vector<1x64x24xbf16>
    tpu.vector_store %arg5[%c0_13, %c0_14, %c7], %29 {strides = array<i32>} : memref<1x64x42xbf16, #tpu.memory_space<vmem>>, vector<1x64x24xbf16>,
    %cst_15 = arith.constant 0.000000e+00 : bf16
    %30 = vector.broadcast %cst_15 : bf16 to vector<64x11xbf16>
    %c0_16 = arith.constant 0 : index
    %c0_17 = arith.constant 0 : index
    %c31 = arith.constant 31 : index
    %31 = vector.load %arg5[%c0_16, %c0_17, %c31] : memref<1x64x42xbf16, #tpu.memory_space<vmem>>, vector<1x64x11xbf16>
    %32 = vector.shape_cast %31 : vector<1x64x11xbf16> to vector<64x11xbf16>
    %33 = vector.shape_cast %30 : vector<64x11xbf16> to vector<1x64x11xbf16>
    tpu.vector_store %arg5[%c0_16, %c0_17, %c31], %33 {strides = array<i32>} : memref<1x64x42xbf16, #tpu.memory_space<vmem>>, vector<1x64x11xbf16>,
    return
  }
  func.func @transform_0(%arg0: i32) -> (i32, i32, i32) {
    %c0_i32 = arith.constant 0 : i32
    %c0_i32_0 = arith.constant 0 : i32
    %c0_i32_1 = arith.constant 0 : i32
    return %arg0, %c0_i32, %c0_i32_0 : i32, i32, i32
  }
  func.func @transform_1(%arg0: i32) -> (i32, i32) {
    %c0_i32 = arith.constant 0 : i32
    %c0_i32_0 = arith.constant 0 : i32
    %c0_i32_1 = arith.constant 0 : i32
    return %c0_i32, %c0_i32_0 : i32, i32
  }
  func.func @transform_2(%arg0: i32) -> (i32, i32) {
    %c0_i32 = arith.constant 0 : i32
    %c0_i32_0 = arith.constant 0 : i32
    %c0_i32_1 = arith.constant 0 : i32
    return %c0_i32, %c0_i32_0 : i32, i32
  }
  func.func @transform_3(%arg0: i32) -> (i32, i32) {
    %c0_i32 = arith.constant 0 : i32
    %c0_i32_0 = arith.constant 0 : i32
    %c0_i32_1 = arith.constant 0 : i32
    return %c0_i32, %c0_i32_0 : i32, i32
  }
  func.func @transform_4(%arg0: i32) -> (i32, i32, i32) {
    %c0_i32 = arith.constant 0 : i32
    %c0_i32_0 = arith.constant 0 : i32
    %c0_i32_1 = arith.constant 0 : i32
    return %arg0, %c0_i32, %c0_i32_0 : i32, i32, i32
  }
}

module attributes {stable_mosaic.version = 11 : i64} {
  func.func @_conv3x3_bn_relu_cat_kernel(%arg0: i32, %arg1: memref<1x64x110xbf16, #tpu.memory_space<vmem>>, %arg2: memref<1x32x110xbf16, #tpu.memory_space<vmem>>, %arg3: memref<32x864xbf16, #tpu.memory_space<vmem>>, %arg4: memref<32x1xf32, #tpu.memory_space<vmem>>, %arg5: memref<1x80xf32, #tpu.memory_space<vmem>>, %arg6: memref<1x32x110xbf16, #tpu.memory_space<vmem>>) attributes {dimension_semantics = [#tpu.dimension_semantics<parallel>], iteration_bounds = array<i64: 2>, scalar_prefetch = 0 : i64, scratch_operands = 0 : i64, tpu.core_type = #tpu.core_type<tc>, window_params = [{transform_indices = @transform_0, window_bounds = array<i64: 1, 64, 110>}, {transform_indices = @transform_1, window_bounds = array<i64: 1, 32, 110>}, {pipeline_mode = #tpu.pipeline_mode<synchronous>, transform_indices = @transform_2, window_bounds = array<i64: 32, 864>}, {pipeline_mode = #tpu.pipeline_mode<synchronous>, transform_indices = @transform_3, window_bounds = array<i64: 32, 1>}, {pipeline_mode = #tpu.pipeline_mode<synchronous>, transform_indices = @transform_4, window_bounds = array<i64: 1, 80>}, {transform_indices = @transform_5, window_bounds = array<i64: 1, 32, 110>}]} {
    %c0 = arith.constant 0 : index
    %c0_0 = arith.constant 0 : index
    %c0_1 = arith.constant 0 : index
    %0 = vector.load %arg1[%c0, %c0_0, %c0_1] : memref<1x64x110xbf16, #tpu.memory_space<vmem>>, vector<1x64x110xbf16>
    %1 = vector.shape_cast %0 : vector<1x64x110xbf16> to vector<64x110xbf16>
    %c0_2 = arith.constant 0 : index
    %c0_3 = arith.constant 0 : index
    %c0_4 = arith.constant 0 : index
    %2 = vector.load %arg2[%c0_2, %c0_3, %c0_4] : memref<1x32x110xbf16, #tpu.memory_space<vmem>>, vector<1x32x110xbf16>
    %3 = vector.shape_cast %2 : vector<1x32x110xbf16> to vector<32x110xbf16>
    %4 = vector.extract_strided_slice %1 {offsets = [0, 0], sizes = [64, 80], strides = [1, 1]} : vector<64x110xbf16> to vector<64x80xbf16>
    %5 = vector.extract_strided_slice %3 {offsets = [0, 0], sizes = [32, 80], strides = [1, 1]} : vector<32x110xbf16> to vector<32x80xbf16>
    %6 = vector.extract_strided_slice %1 {offsets = [0, 1], sizes = [64, 80], strides = [1, 1]} : vector<64x110xbf16> to vector<64x80xbf16>
    %7 = vector.extract_strided_slice %3 {offsets = [0, 1], sizes = [32, 80], strides = [1, 1]} : vector<32x110xbf16> to vector<32x80xbf16>
    %8 = vector.extract_strided_slice %1 {offsets = [0, 2], sizes = [64, 80], strides = [1, 1]} : vector<64x110xbf16> to vector<64x80xbf16>
    %9 = vector.extract_strided_slice %3 {offsets = [0, 2], sizes = [32, 80], strides = [1, 1]} : vector<32x110xbf16> to vector<32x80xbf16>
    %10 = vector.extract_strided_slice %1 {offsets = [0, 10], sizes = [64, 80], strides = [1, 1]} : vector<64x110xbf16> to vector<64x80xbf16>
    %11 = vector.extract_strided_slice %3 {offsets = [0, 10], sizes = [32, 80], strides = [1, 1]} : vector<32x110xbf16> to vector<32x80xbf16>
    %12 = vector.extract_strided_slice %1 {offsets = [0, 11], sizes = [64, 80], strides = [1, 1]} : vector<64x110xbf16> to vector<64x80xbf16>
    %13 = vector.extract_strided_slice %3 {offsets = [0, 11], sizes = [32, 80], strides = [1, 1]} : vector<32x110xbf16> to vector<32x80xbf16>
    %14 = vector.extract_strided_slice %1 {offsets = [0, 12], sizes = [64, 80], strides = [1, 1]} : vector<64x110xbf16> to vector<64x80xbf16>
    %15 = vector.extract_strided_slice %3 {offsets = [0, 12], sizes = [32, 80], strides = [1, 1]} : vector<32x110xbf16> to vector<32x80xbf16>
    %16 = vector.extract_strided_slice %1 {offsets = [0, 20], sizes = [64, 80], strides = [1, 1]} : vector<64x110xbf16> to vector<64x80xbf16>
    %17 = vector.extract_strided_slice %3 {offsets = [0, 20], sizes = [32, 80], strides = [1, 1]} : vector<32x110xbf16> to vector<32x80xbf16>
    %18 = vector.extract_strided_slice %1 {offsets = [0, 21], sizes = [64, 80], strides = [1, 1]} : vector<64x110xbf16> to vector<64x80xbf16>
    %19 = vector.extract_strided_slice %3 {offsets = [0, 21], sizes = [32, 80], strides = [1, 1]} : vector<32x110xbf16> to vector<32x80xbf16>
    %20 = vector.extract_strided_slice %1 {offsets = [0, 22], sizes = [64, 80], strides = [1, 1]} : vector<64x110xbf16> to vector<64x80xbf16>
    %21 = vector.extract_strided_slice %3 {offsets = [0, 22], sizes = [32, 80], strides = [1, 1]} : vector<32x110xbf16> to vector<32x80xbf16>
    %22 = tpu.concatenate %4, %5, %6, %7, %8, %9, %10, %11, %12, %13, %14, %15, %16, %17, %18, %19 in 0 : vector<64x80xbf16>, vector<32x80xbf16>, vector<64x80xbf16>, vector<32x80xbf16>, vector<64x80xbf16>, vector<32x80xbf16>, vector<64x80xbf16>, vector<32x80xbf16>, vector<64x80xbf16>, vector<32x80xbf16>, vector<64x80xbf16>, vector<32x80xbf16>, vector<64x80xbf16>, vector<32x80xbf16>, vector<64x80xbf16>, vector<32x80xbf16> -> vector<768x80xbf16>
    %23 = tpu.concatenate %20, %21 in 0 : vector<64x80xbf16>, vector<32x80xbf16> -> vector<96x80xbf16>
    %24 = tpu.concatenate %22, %23 in 0 : vector<768x80xbf16>, vector<96x80xbf16> -> vector<864x80xbf16>
    %c0_5 = arith.constant 0 : index
    %c0_6 = arith.constant 0 : index
    %25 = vector.load %arg3[%c0_5, %c0_6] : memref<32x864xbf16, #tpu.memory_space<vmem>>, vector<32x864xbf16>
    %cst = arith.constant dense<0.000000e+00> : vector<32x80xf32>
    %26 = tpu.matmul %25, %24, %cst {dimension_numbers = #tpu.dot_dimension_numbers<[1], [0], [0], [1], [0, 0, 1, 1], [], []>} : vector<32x864xbf16>, vector<864x80xbf16>, vector<32x80xf32> -> vector<32x80xf32>
    %c0_7 = arith.constant 0 : index
    %c0_8 = arith.constant 0 : index
    %27 = vector.load %arg4[%c0_7, %c0_8] : memref<32x1xf32, #tpu.memory_space<vmem>>, vector<32x1xf32>
    %28 = vector.broadcast %27 : vector<32x1xf32> to vector<32x80xf32>
    %29 = arith.addf %26, %28 : vector<32x80xf32>
    %cst_9 = arith.constant 0.000000e+00 : f32
    %30 = vector.broadcast %cst_9 : f32 to vector<32x80xf32>
    %31 = arith.maximumf %29, %30 : vector<32x80xf32>
    %c0_10 = arith.constant 0 : index
    %c0_11 = arith.constant 0 : index
    %32 = vector.load %arg5[%c0_10, %c0_11] : memref<1x80xf32, #tpu.memory_space<vmem>>, vector<1x80xf32>
    %33 = vector.broadcast %32 : vector<1x80xf32> to vector<32x80xf32>
    %34 = arith.mulf %31, %33 : vector<32x80xf32>
    %35 = arith.truncf %34 : vector<32x80xf32> to vector<32x80xbf16>
    %cst_12 = arith.constant 0.000000e+00 : bf16
    %36 = vector.broadcast %cst_12 : bf16 to vector<32x11xbf16>
    %c0_13 = arith.constant 0 : index
    %c0_14 = arith.constant 0 : index
    %c0_15 = arith.constant 0 : index
    %37 = vector.load %arg6[%c0_13, %c0_14, %c0_15] : memref<1x32x110xbf16, #tpu.memory_space<vmem>>, vector<1x32x11xbf16>
    %38 = vector.shape_cast %37 : vector<1x32x11xbf16> to vector<32x11xbf16>
    %39 = vector.shape_cast %36 : vector<32x11xbf16> to vector<1x32x11xbf16>
    tpu.vector_store %arg6[%c0_13, %c0_14, %c0_15], %39 {strides = array<i32>} : memref<1x32x110xbf16, #tpu.memory_space<vmem>>, vector<1x32x11xbf16>,
    %c0_16 = arith.constant 0 : index
    %c0_17 = arith.constant 0 : index
    %c11 = arith.constant 11 : index
    %40 = vector.load %arg6[%c0_16, %c0_17, %c11] : memref<1x32x110xbf16, #tpu.memory_space<vmem>>, vector<1x32x80xbf16>
    %41 = vector.shape_cast %40 : vector<1x32x80xbf16> to vector<32x80xbf16>
    %42 = vector.shape_cast %35 : vector<32x80xbf16> to vector<1x32x80xbf16>
    tpu.vector_store %arg6[%c0_16, %c0_17, %c11], %42 {strides = array<i32>} : memref<1x32x110xbf16, #tpu.memory_space<vmem>>, vector<1x32x80xbf16>,
    %cst_18 = arith.constant 0.000000e+00 : bf16
    %43 = vector.broadcast %cst_18 : bf16 to vector<32x19xbf16>
    %c0_19 = arith.constant 0 : index
    %c0_20 = arith.constant 0 : index
    %c91 = arith.constant 91 : index
    %44 = vector.load %arg6[%c0_19, %c0_20, %c91] : memref<1x32x110xbf16, #tpu.memory_space<vmem>>, vector<1x32x19xbf16>
    %45 = vector.shape_cast %44 : vector<1x32x19xbf16> to vector<32x19xbf16>
    %46 = vector.shape_cast %43 : vector<32x19xbf16> to vector<1x32x19xbf16>
    tpu.vector_store %arg6[%c0_19, %c0_20, %c91], %46 {strides = array<i32>} : memref<1x32x110xbf16, #tpu.memory_space<vmem>>, vector<1x32x19xbf16>,
    return
  }
  func.func @transform_0(%arg0: i32) -> (i32, i32, i32) {
    %c0_i32 = arith.constant 0 : i32
    %c0_i32_0 = arith.constant 0 : i32
    %c0_i32_1 = arith.constant 0 : i32
    return %arg0, %c0_i32, %c0_i32_0 : i32, i32, i32
  }
  func.func @transform_1(%arg0: i32) -> (i32, i32, i32) {
    %c0_i32 = arith.constant 0 : i32
    %c0_i32_0 = arith.constant 0 : i32
    %c0_i32_1 = arith.constant 0 : i32
    return %arg0, %c0_i32, %c0_i32_0 : i32, i32, i32
  }
  func.func @transform_2(%arg0: i32) -> (i32, i32) {
    %c0_i32 = arith.constant 0 : i32
    %c0_i32_0 = arith.constant 0 : i32
    %c0_i32_1 = arith.constant 0 : i32
    return %c0_i32, %c0_i32_0 : i32, i32
  }
  func.func @transform_3(%arg0: i32) -> (i32, i32) {
    %c0_i32 = arith.constant 0 : i32
    %c0_i32_0 = arith.constant 0 : i32
    %c0_i32_1 = arith.constant 0 : i32
    return %c0_i32, %c0_i32_0 : i32, i32
  }
  func.func @transform_4(%arg0: i32) -> (i32, i32) {
    %c0_i32 = arith.constant 0 : i32
    %c0_i32_0 = arith.constant 0 : i32
    %c0_i32_1 = arith.constant 0 : i32
    return %c0_i32, %c0_i32_0 : i32, i32
  }
  func.func @transform_5(%arg0: i32) -> (i32, i32, i32) {
    %c0_i32 = arith.constant 0 : i32
    %c0_i32_0 = arith.constant 0 : i32
    %c0_i32_1 = arith.constant 0 : i32
    return %arg0, %c0_i32, %c0_i32_0 : i32, i32, i32
  }
}

module attributes {stable_mosaic.version = 11 : i64} {
  func.func @_conv3x3_head_kernel(%arg0: i32, %arg1: memref<1x16x342xbf16, #tpu.memory_space<vmem>>, %arg2: memref<16x144xbf16, #tpu.memory_space<vmem>>, %arg3: memref<16x1xf32, #tpu.memory_space<vmem>>, %arg4: memref<1x16xbf16, #tpu.memory_space<vmem>>, %arg5: memref<1x1xf32, #tpu.memory_space<vmem>>, %arg6: memref<1x1x288xf32, #tpu.memory_space<vmem>>) attributes {dimension_semantics = [#tpu.dimension_semantics<parallel>], iteration_bounds = array<i64: 2>, scalar_prefetch = 0 : i64, scratch_operands = 0 : i64, tpu.core_type = #tpu.core_type<tc>, window_params = [{transform_indices = @transform_0, window_bounds = array<i64: 1, 16, 342>}, {pipeline_mode = #tpu.pipeline_mode<synchronous>, transform_indices = @transform_1, window_bounds = array<i64: 16, 144>}, {pipeline_mode = #tpu.pipeline_mode<synchronous>, transform_indices = @transform_2, window_bounds = array<i64: 16, 1>}, {pipeline_mode = #tpu.pipeline_mode<synchronous>, transform_indices = @transform_3, window_bounds = array<i64: 1, 16>}, {pipeline_mode = #tpu.pipeline_mode<synchronous>, transform_indices = @transform_4, window_bounds = array<i64: 1, 1>}, {transform_indices = @transform_5, window_bounds = array<i64: 1, 1, 288>}]} {
    %c0 = arith.constant 0 : index
    %c0_0 = arith.constant 0 : index
    %c0_1 = arith.constant 0 : index
    %0 = vector.load %arg1[%c0, %c0_0, %c0_1] : memref<1x16x342xbf16, #tpu.memory_space<vmem>>, vector<1x16x342xbf16>
    %1 = vector.shape_cast %0 : vector<1x16x342xbf16> to vector<16x342xbf16>
    %2 = vector.extract_strided_slice %1 {offsets = [0, 0], sizes = [16, 288], strides = [1, 1]} : vector<16x342xbf16> to vector<16x288xbf16>
    %3 = vector.extract_strided_slice %1 {offsets = [0, 1], sizes = [16, 288], strides = [1, 1]} : vector<16x342xbf16> to vector<16x288xbf16>
    %4 = vector.extract_strided_slice %1 {offsets = [0, 2], sizes = [16, 288], strides = [1, 1]} : vector<16x342xbf16> to vector<16x288xbf16>
    %5 = vector.extract_strided_slice %1 {offsets = [0, 18], sizes = [16, 288], strides = [1, 1]} : vector<16x342xbf16> to vector<16x288xbf16>
    %6 = vector.extract_strided_slice %1 {offsets = [0, 19], sizes = [16, 288], strides = [1, 1]} : vector<16x342xbf16> to vector<16x288xbf16>
    %7 = vector.extract_strided_slice %1 {offsets = [0, 20], sizes = [16, 288], strides = [1, 1]} : vector<16x342xbf16> to vector<16x288xbf16>
    %8 = vector.extract_strided_slice %1 {offsets = [0, 36], sizes = [16, 288], strides = [1, 1]} : vector<16x342xbf16> to vector<16x288xbf16>
    %9 = vector.extract_strided_slice %1 {offsets = [0, 37], sizes = [16, 288], strides = [1, 1]} : vector<16x342xbf16> to vector<16x288xbf16>
    %10 = vector.extract_strided_slice %1 {offsets = [0, 38], sizes = [16, 288], strides = [1, 1]} : vector<16x342xbf16> to vector<16x288xbf16>
    %11 = tpu.concatenate %2, %3, %4, %5, %6, %7, %8, %9, %10 in 0 : vector<16x288xbf16>, vector<16x288xbf16>, vector<16x288xbf16>, vector<16x288xbf16>, vector<16x288xbf16>, vector<16x288xbf16>, vector<16x288xbf16>, vector<16x288xbf16>, vector<16x288xbf16> -> vector<144x288xbf16>
    %c0_2 = arith.constant 0 : index
    %c0_3 = arith.constant 0 : index
    %12 = vector.load %arg2[%c0_2, %c0_3] : memref<16x144xbf16, #tpu.memory_space<vmem>>, vector<16x144xbf16>
    %cst = arith.constant dense<0.000000e+00> : vector<16x288xf32>
    %13 = tpu.matmul %12, %11, %cst {dimension_numbers = #tpu.dot_dimension_numbers<[1], [0], [0], [1], [0, 0, 1, 1], [], []>} : vector<16x144xbf16>, vector<144x288xbf16>, vector<16x288xf32> -> vector<16x288xf32>
    %c0_4 = arith.constant 0 : index
    %c0_5 = arith.constant 0 : index
    %14 = vector.load %arg3[%c0_4, %c0_5] : memref<16x1xf32, #tpu.memory_space<vmem>>, vector<16x1xf32>
    %15 = vector.broadcast %14 : vector<16x1xf32> to vector<16x288xf32>
    %16 = arith.addf %13, %15 : vector<16x288xf32>
    %cst_6 = arith.constant 0.000000e+00 : f32
    %17 = vector.broadcast %cst_6 : f32 to vector<16x288xf32>
    %18 = arith.maximumf %16, %17 : vector<16x288xf32>
    %c0_7 = arith.constant 0 : index
    %c0_8 = arith.constant 0 : index
    %19 = vector.load %arg4[%c0_7, %c0_8] : memref<1x16xbf16, #tpu.memory_space<vmem>>, vector<1x16xbf16>
    %20 = arith.truncf %18 : vector<16x288xf32> to vector<16x288xbf16>
    %cst_9 = arith.constant dense<0.000000e+00> : vector<1x288xf32>
    %21 = tpu.matmul %19, %20, %cst_9 {dimension_numbers = #tpu.dot_dimension_numbers<[1], [0], [0], [1], [0, 0, 1, 1], [], []>} : vector<1x16xbf16>, vector<16x288xbf16>, vector<1x288xf32> -> vector<1x288xf32>
    %c0_10 = arith.constant 0 : index
    %c0_11 = arith.constant 0 : index
    %22 = vector.load %arg5[%c0_10, %c0_11] : memref<1x1xf32, #tpu.memory_space<vmem>>, vector<1x1xf32>
    %23 = vector.broadcast %22 : vector<1x1xf32> to vector<1x288xf32>
    %24 = arith.addf %21, %23 : vector<1x288xf32>
    %cst_12 = arith.constant 0.000000e+00 : f32
    %25 = vector.broadcast %cst_12 : f32 to vector<1x288xf32>
    %26 = arith.subf %25, %24 : vector<1x288xf32>
    %27 = math.exp %26 : vector<1x288xf32>
    %cst_13 = arith.constant 1.000000e+00 : f32
    %28 = vector.broadcast %cst_13 : f32 to vector<1x288xf32>
    %29 = arith.addf %28, %27 : vector<1x288xf32>
    %cst_14 = arith.constant 1.000000e+00 : f32
    %30 = vector.broadcast %cst_14 : f32 to vector<1x288xf32>
    %31 = arith.divf %30, %29 : vector<1x288xf32>
    %c0_15 = arith.constant 0 : index
    %c0_16 = arith.constant 0 : index
    %c0_17 = arith.constant 0 : index
    %32 = vector.load %arg6[%c0_15, %c0_16, %c0_17] : memref<1x1x288xf32, #tpu.memory_space<vmem>>, vector<1x1x288xf32>
    %33 = vector.shape_cast %32 : vector<1x1x288xf32> to vector<1x288xf32>
    %34 = vector.shape_cast %31 : vector<1x288xf32> to vector<1x1x288xf32>
    tpu.vector_store %arg6[%c0_15, %c0_16, %c0_17], %34 {strides = array<i32>} : memref<1x1x288xf32, #tpu.memory_space<vmem>>, vector<1x1x288xf32>,
    return
  }
  func.func @transform_0(%arg0: i32) -> (i32, i32, i32) {
    %c0_i32 = arith.constant 0 : i32
    %c0_i32_0 = arith.constant 0 : i32
    %c0_i32_1 = arith.constant 0 : i32
    return %arg0, %c0_i32, %c0_i32_0 : i32, i32, i32
  }
  func.func @transform_1(%arg0: i32) -> (i32, i32) {
    %c0_i32 = arith.constant 0 : i32
    %c0_i32_0 = arith.constant 0 : i32
    %c0_i32_1 = arith.constant 0 : i32
    return %c0_i32, %c0_i32_0 : i32, i32
  }
  func.func @transform_2(%arg0: i32) -> (i32, i32) {
    %c0_i32 = arith.constant 0 : i32
    %c0_i32_0 = arith.constant 0 : i32
    %c0_i32_1 = arith.constant 0 : i32
    return %c0_i32, %c0_i32_0 : i32, i32
  }
  func.func @transform_3(%arg0: i32) -> (i32, i32) {
    %c0_i32 = arith.constant 0 : i32
    %c0_i32_0 = arith.constant 0 : i32
    %c0_i32_1 = arith.constant 0 : i32
    return %c0_i32, %c0_i32_0 : i32, i32
  }
  func.func @transform_4(%arg0: i32) -> (i32, i32) {
    %c0_i32 = arith.constant 0 : i32
    %c0_i32_0 = arith.constant 0 : i32
    %c0_i32_1 = arith.constant 0 : i32
    return %c0_i32, %c0_i32_0 : i32, i32
  }
  func.func @transform_5(%arg0: i32) -> (i32, i32, i32) {
    %c0_i32 = arith.constant 0 : i32
    %c0_i32_0 = arith.constant 0 : i32
    %c0_i32_1 = arith.constant 0 : i32
    return %arg0, %c0_i32, %c0_i32_0 : i32, i32, i32
  }
}

module attributes {stable_mosaic.version = 11 : i64} {
  func.func @_conv3x3_bn_relu_cat_kernel(%arg0: i32, %arg1: memref<1x32x342xbf16, #tpu.memory_space<vmem>>, %arg2: memref<1x16x342xbf16, #tpu.memory_space<vmem>>, %arg3: memref<16x432xbf16, #tpu.memory_space<vmem>>, %arg4: memref<16x1xf32, #tpu.memory_space<vmem>>, %arg5: memref<1x288xf32, #tpu.memory_space<vmem>>, %arg6: memref<1x16x342xbf16, #tpu.memory_space<vmem>>) attributes {dimension_semantics = [#tpu.dimension_semantics<parallel>], iteration_bounds = array<i64: 2>, scalar_prefetch = 0 : i64, scratch_operands = 0 : i64, tpu.core_type = #tpu.core_type<tc>, window_params = [{transform_indices = @transform_0, window_bounds = array<i64: 1, 32, 342>}, {transform_indices = @transform_1, window_bounds = array<i64: 1, 16, 342>}, {pipeline_mode = #tpu.pipeline_mode<synchronous>, transform_indices = @transform_2, window_bounds = array<i64: 16, 432>}, {pipeline_mode = #tpu.pipeline_mode<synchronous>, transform_indices = @transform_3, window_bounds = array<i64: 16, 1>}, {pipeline_mode = #tpu.pipeline_mode<synchronous>, transform_indices = @transform_4, window_bounds = array<i64: 1, 288>}, {transform_indices = @transform_5, window_bounds = array<i64: 1, 16, 342>}]} {
    %c0 = arith.constant 0 : index
    %c0_0 = arith.constant 0 : index
    %c0_1 = arith.constant 0 : index
    %0 = vector.load %arg1[%c0, %c0_0, %c0_1] : memref<1x32x342xbf16, #tpu.memory_space<vmem>>, vector<1x32x342xbf16>
    %1 = vector.shape_cast %0 : vector<1x32x342xbf16> to vector<32x342xbf16>
    %c0_2 = arith.constant 0 : index
    %c0_3 = arith.constant 0 : index
    %c0_4 = arith.constant 0 : index
    %2 = vector.load %arg2[%c0_2, %c0_3, %c0_4] : memref<1x16x342xbf16, #tpu.memory_space<vmem>>, vector<1x16x342xbf16>
    %3 = vector.shape_cast %2 : vector<1x16x342xbf16> to vector<16x342xbf16>
    %4 = vector.extract_strided_slice %1 {offsets = [0, 0], sizes = [32, 288], strides = [1, 1]} : vector<32x342xbf16> to vector<32x288xbf16>
    %5 = vector.extract_strided_slice %3 {offsets = [0, 0], sizes = [16, 288], strides = [1, 1]} : vector<16x342xbf16> to vector<16x288xbf16>
    %6 = vector.extract_strided_slice %1 {offsets = [0, 1], sizes = [32, 288], strides = [1, 1]} : vector<32x342xbf16> to vector<32x288xbf16>
    %7 = vector.extract_strided_slice %3 {offsets = [0, 1], sizes = [16, 288], strides = [1, 1]} : vector<16x342xbf16> to vector<16x288xbf16>
    %8 = vector.extract_strided_slice %1 {offsets = [0, 2], sizes = [32, 288], strides = [1, 1]} : vector<32x342xbf16> to vector<32x288xbf16>
    %9 = vector.extract_strided_slice %3 {offsets = [0, 2], sizes = [16, 288], strides = [1, 1]} : vector<16x342xbf16> to vector<16x288xbf16>
    %10 = vector.extract_strided_slice %1 {offsets = [0, 18], sizes = [32, 288], strides = [1, 1]} : vector<32x342xbf16> to vector<32x288xbf16>
    %11 = vector.extract_strided_slice %3 {offsets = [0, 18], sizes = [16, 288], strides = [1, 1]} : vector<16x342xbf16> to vector<16x288xbf16>
    %12 = vector.extract_strided_slice %1 {offsets = [0, 19], sizes = [32, 288], strides = [1, 1]} : vector<32x342xbf16> to vector<32x288xbf16>
    %13 = vector.extract_strided_slice %3 {offsets = [0, 19], sizes = [16, 288], strides = [1, 1]} : vector<16x342xbf16> to vector<16x288xbf16>
    %14 = vector.extract_strided_slice %1 {offsets = [0, 20], sizes = [32, 288], strides = [1, 1]} : vector<32x342xbf16> to vector<32x288xbf16>
    %15 = vector.extract_strided_slice %3 {offsets = [0, 20], sizes = [16, 288], strides = [1, 1]} : vector<16x342xbf16> to vector<16x288xbf16>
    %16 = vector.extract_strided_slice %1 {offsets = [0, 36], sizes = [32, 288], strides = [1, 1]} : vector<32x342xbf16> to vector<32x288xbf16>
    %17 = vector.extract_strided_slice %3 {offsets = [0, 36], sizes = [16, 288], strides = [1, 1]} : vector<16x342xbf16> to vector<16x288xbf16>
    %18 = vector.extract_strided_slice %1 {offsets = [0, 37], sizes = [32, 288], strides = [1, 1]} : vector<32x342xbf16> to vector<32x288xbf16>
    %19 = vector.extract_strided_slice %3 {offsets = [0, 37], sizes = [16, 288], strides = [1, 1]} : vector<16x342xbf16> to vector<16x288xbf16>
    %20 = vector.extract_strided_slice %1 {offsets = [0, 38], sizes = [32, 288], strides = [1, 1]} : vector<32x342xbf16> to vector<32x288xbf16>
    %21 = vector.extract_strided_slice %3 {offsets = [0, 38], sizes = [16, 288], strides = [1, 1]} : vector<16x342xbf16> to vector<16x288xbf16>
    %22 = tpu.concatenate %4, %5, %6, %7, %8, %9, %10, %11, %12, %13, %14, %15, %16, %17, %18, %19 in 0 : vector<32x288xbf16>, vector<16x288xbf16>, vector<32x288xbf16>, vector<16x288xbf16>, vector<32x288xbf16>, vector<16x288xbf16>, vector<32x288xbf16>, vector<16x288xbf16>, vector<32x288xbf16>, vector<16x288xbf16>, vector<32x288xbf16>, vector<16x288xbf16>, vector<32x288xbf16>, vector<16x288xbf16>, vector<32x288xbf16>, vector<16x288xbf16> -> vector<384x288xbf16>
    %23 = tpu.concatenate %20, %21 in 0 : vector<32x288xbf16>, vector<16x288xbf16> -> vector<48x288xbf16>
    %24 = tpu.concatenate %22, %23 in 0 : vector<384x288xbf16>, vector<48x288xbf16> -> vector<432x288xbf16>
    %c0_5 = arith.constant 0 : index
    %c0_6 = arith.constant 0 : index
    %25 = vector.load %arg3[%c0_5, %c0_6] : memref<16x432xbf16, #tpu.memory_space<vmem>>, vector<16x432xbf16>
    %cst = arith.constant dense<0.000000e+00> : vector<16x288xf32>
    %26 = tpu.matmul %25, %24, %cst {dimension_numbers = #tpu.dot_dimension_numbers<[1], [0], [0], [1], [0, 0, 1, 1], [], []>} : vector<16x432xbf16>, vector<432x288xbf16>, vector<16x288xf32> -> vector<16x288xf32>
    %c0_7 = arith.constant 0 : index
    %c0_8 = arith.constant 0 : index
    %27 = vector.load %arg4[%c0_7, %c0_8] : memref<16x1xf32, #tpu.memory_space<vmem>>, vector<16x1xf32>
    %28 = vector.broadcast %27 : vector<16x1xf32> to vector<16x288xf32>
    %29 = arith.addf %26, %28 : vector<16x288xf32>
    %cst_9 = arith.constant 0.000000e+00 : f32
    %30 = vector.broadcast %cst_9 : f32 to vector<16x288xf32>
    %31 = arith.maximumf %29, %30 : vector<16x288xf32>
    %c0_10 = arith.constant 0 : index
    %c0_11 = arith.constant 0 : index
    %32 = vector.load %arg5[%c0_10, %c0_11] : memref<1x288xf32, #tpu.memory_space<vmem>>, vector<1x288xf32>
    %33 = vector.broadcast %32 : vector<1x288xf32> to vector<16x288xf32>
    %34 = arith.mulf %31, %33 : vector<16x288xf32>
    %35 = arith.truncf %34 : vector<16x288xf32> to vector<16x288xbf16>
    %cst_12 = arith.constant 0.000000e+00 : bf16
    %36 = vector.broadcast %cst_12 : bf16 to vector<16x19xbf16>
    %c0_13 = arith.constant 0 : index
    %c0_14 = arith.constant 0 : index
    %c0_15 = arith.constant 0 : index
    %37 = vector.load %arg6[%c0_13, %c0_14, %c0_15] : memref<1x16x342xbf16, #tpu.memory_space<vmem>>, vector<1x16x19xbf16>
    %38 = vector.shape_cast %37 : vector<1x16x19xbf16> to vector<16x19xbf16>
    %39 = vector.shape_cast %36 : vector<16x19xbf16> to vector<1x16x19xbf16>
    tpu.vector_store %arg6[%c0_13, %c0_14, %c0_15], %39 {strides = array<i32>} : memref<1x16x342xbf16, #tpu.memory_space<vmem>>, vector<1x16x19xbf16>,
    %c0_16 = arith.constant 0 : index
    %c0_17 = arith.constant 0 : index
    %c19 = arith.constant 19 : index
    %40 = vector.load %arg6[%c0_16, %c0_17, %c19] : memref<1x16x342xbf16, #tpu.memory_space<vmem>>, vector<1x16x288xbf16>
    %41 = vector.shape_cast %40 : vector<1x16x288xbf16> to vector<16x288xbf16>
    %42 = vector.shape_cast %35 : vector<16x288xbf16> to vector<1x16x288xbf16>
    tpu.vector_store %arg6[%c0_16, %c0_17, %c19], %42 {strides = array<i32>} : memref<1x16x342xbf16, #tpu.memory_space<vmem>>, vector<1x16x288xbf16>,
    %cst_18 = arith.constant 0.000000e+00 : bf16
    %43 = vector.broadcast %cst_18 : bf16 to vector<16x35xbf16>
    %c0_19 = arith.constant 0 : index
    %c0_20 = arith.constant 0 : index
    %c307 = arith.constant 307 : index
    %44 = vector.load %arg6[%c0_19, %c0_20, %c307] : memref<1x16x342xbf16, #tpu.memory_space<vmem>>, vector<1x16x35xbf16>
    %45 = vector.shape_cast %44 : vector<1x16x35xbf16> to vector<16x35xbf16>
    %46 = vector.shape_cast %43 : vector<16x35xbf16> to vector<1x16x35xbf16>
    tpu.vector_store %arg6[%c0_19, %c0_20, %c307], %46 {strides = array<i32>} : memref<1x16x342xbf16, #tpu.memory_space<vmem>>, vector<1x16x35xbf16>,
    return
  }
  func.func @transform_0(%arg0: i32) -> (i32, i32, i32) {
    %c0_i32 = arith.constant 0 : i32
    %c0_i32_0 = arith.constant 0 : i32
    %c0_i32_1 = arith.constant 0 : i32
    return %arg0, %c0_i32, %c0_i32_0 : i32, i32, i32
  }
  func.func @transform_1(%arg0: i32) -> (i32, i32, i32) {
    %c0_i32 = arith.constant 0 : i32
    %c0_i32_0 = arith.constant 0 : i32
    %c0_i32_1 = arith.constant 0 : i32
    return %arg0, %c0_i32, %c0_i32_0 : i32, i32, i32
  }
  func.func @transform_2(%arg0: i32) -> (i32, i32) {
    %c0_i32 = arith.constant 0 : i32
    %c0_i32_0 = arith.constant 0 : i32
    %c0_i32_1 = arith.constant 0 : i32
    return %c0_i32, %c0_i32_0 : i32, i32
  }
  func.func @transform_3(%arg0: i32) -> (i32, i32) {
    %c0_i32 = arith.constant 0 : i32
    %c0_i32_0 = arith.constant 0 : i32
    %c0_i32_1 = arith.constant 0 : i32
    return %c0_i32, %c0_i32_0 : i32, i32
  }
  func.func @transform_4(%arg0: i32) -> (i32, i32) {
    %c0_i32 = arith.constant 0 : i32
    %c0_i32_0 = arith.constant 0 : i32
    %c0_i32_1 = arith.constant 0 : i32
    return %c0_i32, %c0_i32_0 : i32, i32
  }
  func.func @transform_5(%arg0: i32) -> (i32, i32, i32) {
    %c0_i32 = arith.constant 0 : i32
    %c0_i32_0 = arith.constant 0 : i32
    %c0_i32_1 = arith.constant 0 : i32
    return %arg0, %c0_i32, %c0_i32_0 : i32, i32, i32
  }
}

</mosaic_0001>

<bundles_post_ra>
// kernel: unet3_forward.16
= control target key start
LH: loop header
LB: loop body
LE: loop exit
PB: predicated region body
PF: predicated region fallthrough
CT: control target
= control target key end

     0   :  { %s643_s15 = smov 0   ;;  %s752_s0 = inlined_call_operand.vmem [shape: bf16[2,16,342], index: 0, kind: input, shape index: {}]   ;;  %s753_s1 = inlined_call_operand.vmem [shape: bf16[16,144], index: 1, kind: input, shape index: {}]   ;;  %s754_s2 = inlined_call_operand.vmem [shape: f32[16,1], index: 2, kind: input, shape index: {}]   ;;  %s755_s3 = inlined_call_operand.vmem [shape: f32[1,288], index: 3, kind: input, shape index: {}]   ;;  %s756_s4 = inlined_call_operand.vmem [shape: bf16[2,16,342], index: 4, kind: output, shape index: {}]  }
   0x1 LB: > { %s542_s16 = sadd.s32 4294967295, %s606_s15   ;;  %p546_p0 = scmp.ge.s32.totalorder %s606_s15, 1  ;;  %s606_s15 = sphi %s643_s15, %s14_s15  }
   0x2   : > { %p162_p1 = scmp.lt.s32.totalorder %s606_s15, 3 }
   0x4   : > { %p163_p2 = pnand %p546_p0, %p162_p1 }
   0x5   : > { %p188_p3 = scmp.lt.s32.totalorder (!%p163_p2), %s542_s16, 1  ;;  %s608_s21 = smov (!%p163_p2), 92  }
   0x6   : > { %166 = sbr.rel (%p163_p2) target bundleno = 479 (0x1df), region = 36  ;;  %s609_s22 = smov (!%p163_p2), 91  }
   0x7   : > { %s610_s23 = smov (!%p163_p2), 108   ;;  %s611_s24 = smov (!%p163_p2), 109  }
   0x8   : > { %s612_s25 = smov (!%p163_p2), 110   ;;  %s613_s26 = smov (!%p163_p2), 90  }
   0x9   : > { %s614_s27 = smov (!%p163_p2), 126   ;;  %s615_s28 = smov (!%p163_p2), 127  }
   0xb   : > { %s758_s16 = smov (!%p188_p3, %s542_s16), 1  ;;  %vm297_vm0 = vcmask 744448   ;;  %vm285_vm1 = vcmask 752640   ;;  %vm273_vm2 = vcmask 883712   ;;  %vm261_vm3 = vcmask 891904   ;;  %v317_v43 = vld [vmem:[%s754_s2] sm:$0xff] }
   0xc   : > { %s579_s17 = smul.u32 24, %s758_s16  ;;  %vm249_vm4 = vcmask 900096   ;;  %vm309_vm5 = vcmask 736256   ;;  %v577_v29 = vld [vmem:[%s753_s1 + $0x4] sm:$0xf]  ;;  %vm338_vm6 = vcmask 130048  }
   0xd   : > { %v565_v30 = vld [vmem:[%s753_s1 + $0x8] sm:$0xf0]  ;;  %vm237_vm7 = vcmask 1031168   ;;  %v616_v41 = vmov 0   ;;  %vm225_vm8 = vcmask 1039360   ;;  %vm450_vm9 = vcmask 150528  }
   0xe   : > { %s192_s20 = scalar_lea.vmem %s752_s0, %s579_s17  ;;  %v568_v35 = vor.u32 %v577_v29, %v565_v30  ;;  %598 = vset.pattern.permute.xlu0 %v616_v41  ;;  %599 = vset.pattern.permute.xlu1 %v616_v41  ;;  %v318_v48 = vld [vmem:[%s754_s2 + $0x8] sm:$0xff]  ;;  %v563_v54 = vld [vmem:[%s753_s1] sm:$0xf]  ;;  %s617_s16 = smov 19   ;;  %vm476_vm10 = vcmask 1043608   ;;  %vm477_vm11 = vcmask 1047556  }
   0xf   : > { %v574_v0 = vld [vmem:[%s192_s20 + $0x4] sm:$0xf]  ;;  %v553_v1 = vld [vmem:[%s192_s20 + $0xc] sm:$0xf0]  ;;  %v551_v3 = vld [vmem:[%s192_s20] sm:$0xf] }
  0x10   : > { %v659_v2 = vor.u32 %v574_v0, %v553_v1  ;;  %v575_v4 = vld [vmem:[%s192_s20 + $0x8] sm:$0xf0]  ;;  %v559_v6 = vld [vmem:[%s192_s20 + $0x8] sm:$0xf]  ;;  %v576_v7 = vld [vmem:[%s192_s20 + $0x10] sm:$0xf0]  ;;  %s728_s20 = scalar_lea.vmem %s756_s4, %s579_s17 }
  0x11   : > { %v661_v5 = vor.u32 %v575_v4, %v551_v3  ;;  %v666_v8 = vor.u32 %v576_v7, %v559_v6  ;;  %v578_v55 = vld [vmem:[%s753_s1 + $0x4] sm:$0xf0]  ;;  %451 = vst.msk [vmem:[%s728_s20] sm:$0xf] %vm450_vm9, %v616_v41  ;;  %v432_v0 = vld [vmem:[%s755_s3] sm:$0x7]  ;;  %vm478_vm13 = vmor %vm477_vm11, %vm476_vm10 }
  0x12   : > { %281 = vrot.lane.b32.xlu1 %v659_v2, %s608_s21  ;;  %293 = vrot.lane.b32.xlu0 %v659_v2, %s609_s22  ;;  %v564_v57 = vor.u32 %v578_v55, %v563_v54  ;;  %452 = vst.msk [vmem:[%s728_s20 + $0xc] sm:$0xf] %vm450_vm9, %v616_v41  ;;  %v435_v7 = vperm.slane %v432_v0, 1  ;;  %vm467_vm12 = vcmask 154624   ;;  %vm480_vm14 = vcmask 412672  }
  0x13   : > { %291 = vrot.lane.b32.xlu2 %v661_v5, %s609_s22  ;;  %vm484_vm15 = vcmask 699800  }
  0x1a   : > { %283 = vrot.lane.b32.xlu1 %v666_v8, %s608_s21  ;;  %295 = vrot.lane.b32.xlu0 %v666_v8, %s609_s22 }
  0x1b   : > { %269 = vrot.lane.b32.xlu2 %v659_v2, %s610_s23 }
  0x22   : > { %279 = vrot.lane.b32.xlu1 %v661_v5, %s608_s21  ;;  %271 = vrot.lane.b32.xlu0 %v666_v8, %s610_s23 }
  0x23   : > { %257 = vrot.lane.b32.xlu2 %v659_v2, %s611_s24 }
  0x2a   : > { %267 = vrot.lane.b32.xlu1 %v661_v5, %s610_s23  ;;  %259 = vrot.lane.b32.xlu0 %v666_v8, %s611_s24 }
  0x2b   : > { %245 = vrot.lane.b32.xlu2 %v659_v2, %s612_s25 }
  0x32   : > { %305 = vrot.lane.b32.xlu1 %v659_v2, %s613_s26  ;;  %247 = vrot.lane.b32.xlu0 %v666_v8, %s612_s25 }
  0x33   : > { %307 = vrot.lane.b32.xlu2 %v666_v8, %s613_s26 }
  0x3a   : > { %233 = vrot.lane.b32.xlu1 %v659_v2, %s614_s27  ;;  %255 = vrot.lane.b32.xlu0 %v661_v5, %s611_s24 }
  0x3b   : > { %235 = vrot.lane.b32.xlu2 %v666_v8, %s614_s27 }
  0x42   : > { %243 = vrot.lane.b32.xlu1 %v661_v5, %s612_s25  ;;  %303 = vrot.lane.b32.xlu0 %v661_v5, %s613_s26 }
  0x43   : > { %221 = vrot.lane.b32.xlu2 %v659_v2, %s615_s28 }
  0x4a   : > { %231 = vrot.lane.b32.xlu1 %v661_v5, %s614_s27  ;;  %223 = vrot.lane.b32.xlu0 %v666_v8, %s615_s28 }
  0x4b   : > { %219 = vrot.lane.b32.xlu2 %v661_v5, %s615_s28 }
  0x52   : > { %321 = vperm.xlu0 %598, %v317_v43   ;;  %326 = vperm.xlu1 %599, %v318_v48  }
  0x6d   : > { %v292_v9 = vpop.permute.xlu2 %291 }
  0x75   : > { %v270_v10 = vpop.permute.xlu2 %269 }
  0x7d   : > { %v258_v14 = vpop.permute.xlu2 %257 }
  0x84   : > { %v282_v11 = vpop.permute.xlu1 %281  ;;  %v294_v12 = vpop.permute.xlu0 %293 }
  0x85   : > { %v298_v13 = vsel %vm297_vm0, %v292_v9, %v294_v12  ;;  %v246_v19 = vpop.permute.xlu2 %245 }
  0x86   : > { %342 = vmatpush.bf16.msra.mxu0 %v298_v13 }
  0x8c   : > { %v284_v15 = vpop.permute.xlu1 %283  ;;  %v296_v16 = vpop.permute.xlu0 %295 }
  0x8d   : > { %v299_v17 = vsel %vm297_vm0, %v294_v12, %v296_v16  ;;  %v287_v18 = vsel %vm285_vm1, %v282_v11, %v284_v15  ;;  %v308_v28 = vpop.permute.xlu2 %307 }
  0x8e   : > { %370 = vmatpush.bf16.msra.mxu2 %v299_v17 }
  0x92   : > { %371 = vmatpush.bf16.msra.mxu2 %v287_v18 }
  0x94   : > { %v280_v20 = vpop.permute.xlu1 %279  ;;  %v272_v21 = vpop.permute.xlu0 %271 }
  0x95   : > { %v286_v22 = vsel %vm285_vm1, %v280_v20, %v282_v11  ;;  %v275_v23 = vsel %vm273_vm2, %v270_v10, %v272_v21  ;;  %v236_v36 = vpop.permute.xlu2 %235 }
  0x96   : > { %343 = vmatpush.bf16.msra.mxu0 %v286_v22  ;;  %372 = vmatpush.bf16.msra.mxu2 %v275_v23 }
  0x9c   : > { %v268_v24 = vpop.permute.xlu1 %267  ;;  %v260_v25 = vpop.permute.xlu0 %259 }
  0x9d   : > { %v274_v26 = vsel %vm273_vm2, %v268_v24, %v270_v10  ;;  %v263_v27 = vsel %vm261_vm3, %v258_v14, %v260_v25  ;;  %v222_v42 = vpop.permute.xlu2 %221 }
  0x9e   : > { %344 = vmatpush.bf16.msra.mxu0 %v274_v26  ;;  %373 = vmatpush.bf16.msra.mxu2 %v263_v27  ;;  %v436_v26 = vperm.slane %v432_v0, 2 }
  0xa4   : > { %v306_v31 = vpop.permute.xlu1 %305  ;;  %v248_v32 = vpop.permute.xlu0 %247 }
  0xa5   : > { %v251_v33 = vsel %vm249_vm4, %v246_v19, %v248_v32  ;;  %v311_v34 = vsel %vm309_vm5, %v306_v31, %v308_v28  ;;  %v220_v49 = vpop.permute.xlu2 %219 }
  0xa6   : > { %374 = vmatpush.bf16.msra.mxu2 %v251_v33  ;;  %391 = vmatpush.bf16.msra.mxu3 %v311_v34  ;;  %v226_v56 = vsel %vm225_vm8, %v220_v49, %v222_v42 }
  0xa9   : > { %570 = vmatmul.msk.bf16.vlgmr.msra.gmra.mxu3 %vm338_vm6, %v568_v35 }
  0xaa   : > { %419 = vmatpush.bf16.msrb.mxu3 %v308_v28 }
  0xac   : > { %v234_v37 = vpop.permute.xlu1 %233  ;;  %v256_v38 = vpop.permute.xlu0 %255 }
  0xad   : > { %v262_v39 = vsel %vm261_vm3, %v256_v38, %v258_v14  ;;  %v239_v40 = vsel %vm237_vm7, %v234_v37, %v236_v36 }
  0xae   : > { %345 = vmatpush.bf16.msra.mxu0 %v262_v39  ;;  %375 = vmatpush.bf16.msra.mxu2 %v239_v40 }
  0xb4   : > { %v244_v44 = vpop.permute.xlu1 %243  ;;  %v304_v45 = vpop.permute.xlu0 %303 }
  0xb5   : > { %v250_v46 = vsel %vm249_vm4, %v244_v44, %v246_v19  ;;  %v310_v47 = vsel %vm309_vm5, %v304_v45, %v306_v31 }
  0xb6   : > { %346 = vmatpush.bf16.msra.mxu0 %v250_v46  ;;  %363 = vmatpush.bf16.msra.mxu1 %v310_v47 }
  0xb9   : > { %569 = vmatmul.msk.bf16.vlgmr.msra.gmra.mxu1 %vm338_vm6, %v568_v35  ;;  %571 = vmatmul.msk.bf16.vlgmr.msrb.gmra.mxu3 %vm338_vm6, %v568_v35 }
  0xba   : > { %398 = vmatpush.bf16.msrb.mxu1 %v296_v16 }
  0xbc   : > { %v232_v50 = vpop.permute.xlu1 %231  ;;  %v224_v51 = vpop.permute.xlu0 %223 }
  0xbd   : > { %v238_v52 = vsel %vm237_vm7, %v232_v50, %v234_v37  ;;  %v227_v53 = vsel %vm225_vm8, %v222_v42, %v224_v51 }
  0xbe   : > { %399 = vmatpush.bf16.msrb.mxu1 %v284_v15  ;;  %347 = vmatpush.bf16.msra.mxu0 %v238_v52 }
  0xbf   : > { %376 = vmatpush.bf16.msra.mxu2 %v227_v53 }
  0xc2   : > { %400 = vmatpush.bf16.msrb.mxu1 %v272_v21  ;;  %348 = vmatpush.bf16.msra.mxu0 %v226_v56 }
  0xc3   : > { %377 = vmatpush.bf16.msra.mxu2 %v659_v2 }
  0xc4   : > { %v322_v60 = vpop.permute.xlu0 %321  ;;  %v327_v9 = vpop.permute.xlu1 %326 }
  0xc6   : > { %401 = vmatpush.bf16.msrb.mxu1 %v260_v25  ;;  %378 = vmatmul.bf16.vlgmr.msra.gmra.mxu2 %v564_v57 }
  0xc7   : > { %349 = vmatpush.bf16.msra.mxu0 %v661_v5 }
  0xca   : > { %402 = vmatpush.bf16.msrb.mxu1 %v248_v32  ;;  %350 = vmatmul.bf16.vlgmr.msra.gmra.mxu0 %v564_v57 }
  0xce   : > { %403 = vmatpush.bf16.msrb.mxu1 %v236_v36 }
  0xd2   : > { %404 = vmatpush.bf16.msrb.mxu1 %v224_v51 }
  0xd6   : > { %405 = vmatpush.bf16.msrb.mxu1 %v666_v8  ;;  %v434_v8 = vperm.slane %v432_v0, 0 }
  0xd9   : > { %406 = vmatmul.bf16.vlgmr.msrb.gmra.mxu1 %v564_v57 }
 0x12c   : > { %v393_v58 = vpop.f32.mrf.mxu3 }
 0x134   : > { %v395_v1 = vpop.f32.mrf.mxu3 }
 0x136   : > { %v365_v59 = vpop.f32.mrf.mxu1 }
 0x13c   : > { %v421_v19 = vpop.f32.mrf.mxu3 }
 0x13e   : > { %v367_v4 = vpop.f32.mrf.mxu1 }
 0x144   : > { %v423_v35 = vpop.f32.mrf.mxu3 }
 0x147   : > { %v351_v61 = vpop.f32.mrf.mxu0 }
 0x148   : > { %v352_v62 = vadd.f32 %v351_v61, %v322_v60 }
 0x149   : > { %v379_v63 = vpop.f32.mrf.mxu2 }
 0x14a   : > { %v366_v2 = vadd.f32 %v365_v59, %v352_v62  ;;  %v380_v3 = vadd.f32 %v379_v63, %v322_v60 }
 0x14c   : > { %v426_v5 = vmax.f32 %v366_v2, 0.0  ;;  %v394_v6 = vadd.f32 %v393_v58, %v380_v3 }
 0x14e   : > { %v427_v10 = vmax.f32 %v394_v6, 0.0  ;;  %v440_v14 = vmul.f32 %v434_v8, %v426_v5 }
 0x14f   : > { %v353_v11 = vpop.f32.mrf.mxu0 }
 0x150   : > { %v441_v12 = vmul.f32 %v435_v7, %v427_v10  ;;  %v354_v13 = vadd.f32 %v353_v11, %v327_v9 }
 0x151   : > { %v381_v15 = vpop.f32.mrf.mxu2 }
 0x152   : > { %v368_v16 = vadd.f32 %v367_v4, %v354_v13  ;;  %v382_v17 = vadd.f32 %v381_v15, %v327_v9  ;;  %v446_v18 = vpack.c.bf16 %v441_v12, %v440_v14 }
 0x154   : > { %v429_v20 = vmax.f32 %v368_v16, 0.0  ;;  %v396_v21 = vadd.f32 %v395_v1, %v382_v17  ;;  %457 = vrot.lane.b32.xlu2 %v446_v18, %s617_s16 }
 0x156   : > { %v407_v22 = vpop.f32.mrf.mxu1  ;;  %v430_v24 = vmax.f32 %v396_v21, 0.0  ;;  %v443_v27 = vmul.f32 %v434_v8, %v429_v20 }
 0x157   : > { %v408_v23 = vadd.f32 %v407_v22, %v322_v60 }
 0x158   : > { %v444_v28 = vmul.f32 %v435_v7, %v430_v24 }
 0x159   : > { %v422_v25 = vadd.f32 %v421_v19, %v408_v23 }
 0x15a   : > { %v448_v30 = vpack.c.bf16 %v444_v28, %v443_v27 }
 0x15b   : > { %v428_v29 = vmax.f32 %v422_v25, 0.0 }
 0x15c   : > { %461 = vrot.lane.b32.xlu1 %v448_v30, %s617_s16 }
 0x15d   : > { %v442_v31 = vmul.f32 %v436_v26, %v428_v29 }
 0x15e   : > { %v409_v32 = vpop.f32.mrf.mxu1 }
 0x15f   : > { %v410_v33 = vadd.f32 %v409_v32, %v327_v9  ;;  %v447_v34 = vpack.c.bf16 %v442_v31, %v442_v31 }
 0x161   : > { %v424_v36 = vadd.f32 %v423_v35, %v410_v33  ;;  %459 = vrot.lane.b32.xlu2 %v447_v34, %s617_s16 }
 0x163   : > { %v431_v37 = vmax.f32 %v424_v36, 0.0 }
 0x165   : > { %v445_v38 = vmul.f32 %v436_v26, %v431_v37 }
 0x167   : > { %v449_v39 = vpack.c.bf16 %v445_v38, %v445_v38 }
 0x169   : > { %463 = vrot.lane.b32.xlu0 %v449_v39, %s617_s16 }
 0x1ae   : > { %v458_v40 = vpop.permute.xlu2 %457 }
 0x1af   : > { %v465_v42 = vrot.slane %v458_v40, 4 }
 0x1b1   : > { %v468_v43 = vsel %vm467_vm12, %v465_v42, %v458_v40 }
 0x1b2   : > { %479 = vst.msk [vmem:[%s728_s20] sm:$0xff] %vm478_vm13, %v468_v43 }
 0x1bb   : > { %v460_v44 = vpop.permute.xlu2 %459 }
 0x1bc   : > { %v469_v45 = vsel %vm467_vm12, %v465_v42, %v460_v44 }
 0x1bd   : > { %481 = vst.msk [vmem:[%s728_s20 + $0x8] sm:$0xf] %vm480_vm14, %v469_v45 }
 0x1be   : > { %485 = vst.msk [vmem:[%s728_s20 + $0x8] sm:$0xf] %vm484_vm15, %v616_v41 }
 0x1ce   : > { %v462_v46 = vpop.permute.xlu1 %461 }
 0x1cf   : > { %v466_v47 = vrot.slane %v462_v46, 4 }
 0x1d1   : > { %v470_v48 = vsel %vm467_vm12, %v466_v47, %v462_v46 }
 0x1d2   : > { %482 = vst.msk [vmem:[%s728_s20 + $0xc] sm:$0xff] %vm478_vm13, %v470_v48 }
 0x1db   : > { %v464_v49 = vpop.permute.xlu0 %463 }
 0x1dc   : > { %v471_v50 = vsel %vm467_vm12, %v466_v47, %v464_v49 }
 0x1dd   : > { %483 = vst.msk [vmem:[%s728_s20 + $0x14] sm:$0xf] %vm480_vm14, %v471_v50 }
 0x1de   : > { %486 = vst.msk [vmem:[%s728_s20 + $0x14] sm:$0xf] %vm484_vm15, %v616_v41 }
 0x1df PF: > { %s14_s15 = sadd.s32 1, %s606_s15  }
 0x1e0   : > { %p11_p4 = scmp.ge.s32.totalorder %s14_s15, 4  }
 0x1e2   :  { %13 = sbr.rel (!%p11_p4) target bundleno = 1 (0x1), region = 66 }

// kernel: unet3_forward.20
= control target key start
LH: loop header
LB: loop body
LE: loop exit
PB: predicated region body
PF: predicated region fallthrough
CT: control target
= control target key end

     0   :  { %s619_s15 = smov 0   ;;  %s745_s0 = inlined_call_operand.vmem [shape: bf16[2,32,110], index: 0, kind: input, shape index: {}]   ;;  %s746_s1 = inlined_call_operand.vmem [shape: bf16[32,288], index: 1, kind: input, shape index: {}]   ;;  %s747_s2 = inlined_call_operand.vmem [shape: f32[32,1], index: 2, kind: input, shape index: {}]   ;;  %s748_s3 = inlined_call_operand.vmem [shape: f32[1,80], index: 3, kind: input, shape index: {}]   ;;  %s749_s4 = inlined_call_operand.vmem [shape: bf16[2,32,110], index: 4, kind: output, shape index: {}]  }
   0x1 LB: > { %s491_s16 = sadd.s32 4294967295, %s582_s15   ;;  %p495_p0 = scmp.ge.s32.totalorder %s582_s15, 1  ;;  %s582_s15 = sphi %s619_s15, %s14_s15  }
   0x2   : > { %p162_p1 = scmp.lt.s32.totalorder %s582_s15, 3 }
   0x4   : > { %p163_p2 = pnand %p495_p0, %p162_p1 }
   0x5   : > { %p188_p3 = scmp.lt.s32.totalorder (!%p163_p2), %s491_s16, 1  ;;  %s584_s21 = smov (!%p163_p2), 118  }
   0x6   : > { %166 = sbr.rel (%p163_p2) target bundleno = 450 (0x1c2), region = 36  ;;  %s585_s22 = smov (!%p163_p2), 107  }
   0x7   : > { %s586_s23 = smov (!%p163_p2), 108   ;;  %s587_s24 = smov (!%p163_p2), 116  }
   0x8   : > { %s588_s25 = smov (!%p163_p2), 126   ;;  %s589_s26 = smov (!%p163_p2), 106  }
   0x9   : > { %s590_s27 = smov (!%p163_p2), 127   ;;  %s591_s28 = smov (!%p163_p2), 117  }
   0xb   : > { %s751_s16 = smov (!%p188_p3, %s491_s16), 1  ;;  %v592_v9 = vmov 0   ;;  %v271_v13 = vld [vmem:[%s747_s2] sm:$0xff]  ;;  %v274_v17 = vld [vmem:[%s747_s2 + $0x18] sm:$0xff]  ;;  %v273_v18 = vld [vmem:[%s747_s2 + $0x10] sm:$0xff]  ;;  %vm325_vm0 = vcmask 261120  }
   0xc   : > { %s536_s17 = sshll.u32 %s751_s16, 4  ;;  %572 = vset.pattern.permute.xlu1 %v592_v9  ;;  %574 = vset.pattern.permute.xlu0 %v592_v9  ;;  %v272_v19 = vld [vmem:[%s747_s2 + $0x8] sm:$0xff]  ;;  %v542_v21 = vld [vmem:[%s746_s1 + $0x10] sm:$0xf0]  ;;  %v510_v25 = vld [vmem:[%s746_s1] sm:$0xf] }
   0xd   : > { %s192_s20 = scalar_lea.vmem %s745_s0, %s536_s17  ;;  %573 = vset.pattern.permute.xlu2 %v592_v9  ;;  %v518_v20 = vld [vmem:[%s746_s1 + $0x8] sm:$0xf]  ;;  %v541_v26 = vld [vmem:[%s746_s1 + $0x8] sm:$0xf0]  ;;  %v522_v27 = vld [vmem:[%s746_s1 + $0x18] sm:$0xf]  ;;  %s717_s14 = scalar_lea.vmem %s749_s4, %s536_s17 }
   0xe   : > { %v635_v0 = vld [vmem:[%s192_s20 + $0x8] sm:$0xff]  ;;  %v637_v1 = vld [vmem:[%s192_s20] sm:$0xff]  ;;  %v519_v24 = vor.u32 %v542_v21, %v518_v20  ;;  %v511_v29 = vor.u32 %v541_v26, %v510_v25  ;;  %v512_v31 = vld [vmem:[%s746_s1 + $0xc] sm:$0xf0]  ;;  %vm405_vm1 = vcmask 84992   ;;  %s593_s16 = smov 11  }
   0xf   : > { %229 = vrot.lane.b32.xlu1 %v635_v0, %s584_s21  ;;  %253 = vrot.lane.b32.xlu0 %v635_v0, %s585_s22  ;;  %v544_v28 = vld [vmem:[%s746_s1 + $0x20] sm:$0xf0]  ;;  %v530_v35 = vld [vmem:[%s746_s1 + $0x20] sm:$0xf]  ;;  %vm426_vm2 = vcmask 740440   ;;  %vm431_vm3 = vcmask 896728  }
  0x10   : > { %227 = vrot.lane.b32.xlu2 %v637_v1, %s584_s21  ;;  %v540_v30 = vld [vmem:[%s746_s1 + $0x4] sm:$0xf]  ;;  %v523_v32 = vor.u32 %v544_v28, %v522_v27  ;;  %v545_v36 = vld [vmem:[%s746_s1 + $0x28] sm:$0xf0]  ;;  %v543_v38 = vld [vmem:[%s746_s1 + $0x1c] sm:$0xf] }
  0x11   : > { %v515_v34 = vor.u32 %v540_v30, %v512_v31  ;;  %v531_v37 = vor.u32 %v545_v36, %v530_v35  ;;  %v524_v39 = vld [vmem:[%s746_s1 + $0x24] sm:$0xf0]  ;;  %v575_v49 = vld [vmem:[%s748_s3] ss:$0 sm:$0xff]  ;;  %406 = vst.msk [vmem:[%s717_s14] sm:$0xf] %vm405_vm1, %v592_v9 }
  0x12   : > { %v527_v40 = vor.u32 %v543_v38, %v524_v39  ;;  %407 = vst.msk [vmem:[%s717_s14 + $0x4] sm:$0xf] %vm405_vm1, %v592_v9 }
  0x13   : > { %408 = vst.msk [vmem:[%s717_s14 + $0x8] sm:$0xf] %vm405_vm1, %v592_v9 }
  0x14   : > { %409 = vst.msk [vmem:[%s717_s14 + $0xc] sm:$0xf] %vm405_vm1, %v592_v9 }
  0x17   : > { %247 = vrot.lane.b32.xlu1 %v635_v0, %s586_s23  ;;  %251 = vrot.lane.b32.xlu0 %v637_v1, %s585_s22 }
  0x18   : > { %245 = vrot.lane.b32.xlu2 %v637_v1, %s586_s23 }
  0x1f   : > { %241 = vrot.lane.b32.xlu1 %v635_v0, %s587_s24  ;;  %223 = vrot.lane.b32.xlu0 %v635_v0, %s588_s25 }
  0x20   : > { %221 = vrot.lane.b32.xlu2 %v637_v1, %s588_s25 }
  0x27   : > { %259 = vrot.lane.b32.xlu1 %v635_v0, %s589_s26  ;;  %239 = vrot.lane.b32.xlu0 %v637_v1, %s587_s24 }
  0x28   : > { %217 = vrot.lane.b32.xlu2 %v635_v0, %s590_s27 }
  0x2f   : > { %257 = vrot.lane.b32.xlu1 %v637_v1, %s589_s26  ;;  %235 = vrot.lane.b32.xlu0 %v635_v0, %s591_s28 }
  0x30   : > { %215 = vrot.lane.b32.xlu2 %v637_v1, %s590_s27 }
  0x37   : > { %233 = vrot.lane.b32.xlu0 %v637_v1, %s591_s28  ;;  %277 = vperm.xlu1 %572, %v271_v13  }
  0x38   : > { %282 = vperm.xlu2 %573, %v272_v19  }
  0x3f   : > { %292 = vperm.xlu1 %572, %v274_v17   ;;  %287 = vperm.xlu0 %574, %v273_v18  }
  0x6a   : > { %v228_v2 = vpop.permute.xlu2 %227 }
  0x72   : > { %v246_v3 = vpop.permute.xlu2 %245 }
  0x7a   : > { %v222_v6 = vpop.permute.xlu2 %221 }
  0x81   : > { %v230_v4 = vpop.permute.xlu1 %229  ;;  %v254_v5 = vpop.permute.xlu0 %253 }
  0x82   : > { %351 = vmatpush.bf16.msra.mxu1 %v254_v5  ;;  %332 = vmatpush.bf16.msra.mxu0 %v230_v4  ;;  %v218_v10 = vpop.permute.xlu2 %217 }
  0x83   : > { %546 = vmatpush.bf16.msra.mxu3 %v230_v4 }
  0x86   : > { %333 = vmatpush.bf16.msra.mxu0 %v228_v2 }
  0x87   : > { %547 = vmatpush.bf16.msra.mxu3 %v228_v2 }
  0x89   : > { %v248_v7 = vpop.permute.xlu1 %247  ;;  %v252_v8 = vpop.permute.xlu0 %251 }
  0x8a   : > { %352 = vmatpush.bf16.msra.mxu1 %v252_v8  ;;  %v216_v16 = vpop.permute.xlu2 %215 }
  0x8e   : > { %353 = vmatpush.bf16.msra.mxu1 %v248_v7 }
  0x91   : > { %v242_v11 = vpop.permute.xlu1 %241  ;;  %v224_v12 = vpop.permute.xlu0 %223 }
  0x92   : > { %334 = vmatpush.bf16.msra.mxu0 %v224_v12  ;;  %548 = vmatpush.bf16.msra.mxu3 %v224_v12  ;;  %v283_v48 = vpop.permute.xlu2 %282 }
  0x93   : > { %354 = vmatpush.bf16.msra.mxu1 %v246_v3 }
  0x96   : > { %335 = vmatpush.bf16.msra.mxu0 %v222_v6  ;;  %549 = vmatpush.bf16.msra.mxu3 %v222_v6 }
  0x97   : > { %355 = vmatpush.bf16.msra.mxu1 %v242_v11 }
  0x99   : > { %v260_v14 = vpop.permute.xlu1 %259  ;;  %v240_v15 = vpop.permute.xlu0 %239 }
  0x9a   : > { %336 = vmatpush.bf16.msra.mxu0 %v218_v10  ;;  %550 = vmatpush.bf16.msra.mxu3 %v218_v10 }
  0x9b   : > { %356 = vmatpush.bf16.msra.mxu1 %v240_v15  ;;  %376 = vmatpush.bf16.msra.mxu2 %v260_v14 }
  0x9e   : > { %337 = vmatpush.bf16.msra.mxu0 %v216_v16  ;;  %551 = vmatpush.bf16.msra.mxu3 %v216_v16 }
  0xa1   : > { %v258_v22 = vpop.permute.xlu1 %257  ;;  %v236_v23 = vpop.permute.xlu0 %235 }
  0xa2   : > { %357 = vmatpush.bf16.msra.mxu1 %v236_v23  ;;  %377 = vmatpush.bf16.msra.mxu2 %v258_v22 }
  0xa3   : > { %338 = vmatpush.bf16.msra.mxu0 %v635_v0  ;;  %552 = vmatpush.bf16.msra.mxu3 %v635_v0 }
  0xa5   : > { %532 = vmatmul.msk.bf16.vlgmr.msra.gmra.mxu2 %vm325_vm0, %v519_v24 }
  0xa7   : > { %339 = vmatpush.bf16.msra.mxu0 %v637_v1  ;;  %553 = vmatpush.bf16.msra.mxu3 %v637_v1 }
  0xa9   : > { %v234_v33 = vpop.permute.xlu0 %233  ;;  %v278_v41 = vpop.permute.xlu1 %277 }
  0xaa   : > { %358 = vmatpush.bf16.msra.mxu1 %v234_v33  ;;  %340 = vmatmul.bf16.vlgmr.msra.gmra.mxu0 %v511_v29 }
  0xab   : > { %345 = vmatmul.bf16.vlgmr.msra.gmra.mxu3 %v523_v32 }
  0xad   : > { %359 = vmatmul.bf16.vlgmr.msra.gmra.mxu1 %v515_v34 }
  0xb1   : > { %v288_v59 = vpop.permute.xlu0 %287  ;;  %v293_v5 = vpop.permute.xlu1 %292 }
  0xb5   : > { %533 = vmatmul.msk.bf16.gmra.mxu2 %vm325_vm0, %v531_v37 }
  0xbd   : > { %364 = vmatmul.bf16.gmra.mxu1 %v527_v40 }
 0x127   : > { %v341_v42 = vpop.f32.mrf.mxu0 }
 0x128   : > { %v379_v43 = vpop.f32.mrf.mxu2  ;;  %v342_v44 = vadd.f32 %v341_v42, %v278_v41 }
 0x12a   : > { %v360_v45 = vpop.f32.mrf.mxu1 }
 0x12b   : > { %v361_v46 = vadd.f32 %v360_v45, %v342_v44 }
 0x12d   : > { %v380_v47 = vadd.f32 %v379_v43, %v361_v46 }
 0x12e   : > { %v346_v58 = vpop.f32.mrf.mxu3 }
 0x12f   : > { %v389_v50 = vmax.f32 %v380_v47, 0.0  ;;  %v343_v51 = vpop.f32.mrf.mxu0  ;;  %v347_v62 = vadd.f32 %v346_v58, %v288_v59 }
 0x130   : > { %v381_v52 = vpop.f32.mrf.mxu2  ;;  %v344_v53 = vadd.f32 %v343_v51, %v283_v48 }
 0x131   : > { %v397_v54 = vmul.f32 %v575_v49, %v389_v50 }
 0x132   : > { %v362_v55 = vpop.f32.mrf.mxu1 }
 0x133   : > { %v363_v56 = vadd.f32 %v362_v55, %v344_v53  ;;  %v401_v57 = vpack.c.bf16 %v397_v54, %v397_v54 }
 0x135   : > { %v382_v60 = vadd.f32 %v381_v52, %v363_v56  ;;  %414 = vrot.lane.b32.xlu2 %v401_v57, %s593_s16 }
 0x136   : > { %v348_v6 = vpop.f32.mrf.mxu3 }
 0x137   : > { %v390_v61 = vmax.f32 %v382_v60, 0.0  ;;  %v349_v8 = vadd.f32 %v348_v6, %v293_v5 }
 0x138   : > { %v384_v0 = vpop.f32.mrf.mxu2 }
 0x139   : > { %v398_v63 = vmul.f32 %v575_v49, %v390_v61 }
 0x13a   : > { %v365_v1 = vpop.f32.mrf.mxu1 }
 0x13b   : > { %v366_v2 = vadd.f32 %v365_v1, %v347_v62  ;;  %v402_v3 = vpack.c.bf16 %v398_v63, %v398_v63 }
 0x13d   : > { %v385_v4 = vadd.f32 %v384_v0, %v366_v2  ;;  %416 = vrot.lane.b32.xlu1 %v402_v3, %s593_s16 }
 0x13f   : > { %v391_v7 = vmax.f32 %v385_v4, 0.0 }
 0x140   : > { %v386_v14 = vpop.f32.mrf.mxu2 }
 0x141   : > { %v399_v10 = vmul.f32 %v575_v49, %v391_v7 }
 0x142   : > { %v367_v11 = vpop.f32.mrf.mxu1 }
 0x143   : > { %v368_v12 = vadd.f32 %v367_v11, %v349_v8  ;;  %v403_v13 = vpack.c.bf16 %v399_v10, %v399_v10 }
 0x145   : > { %v387_v15 = vadd.f32 %v386_v14, %v368_v12  ;;  %418 = vrot.lane.b32.xlu2 %v403_v13, %s593_s16 }
 0x147   : > { %v392_v16 = vmax.f32 %v387_v15, 0.0 }
 0x149   : > { %v400_v17 = vmul.f32 %v575_v49, %v392_v16 }
 0x14b   : > { %v404_v18 = vpack.c.bf16 %v400_v17, %v400_v17 }
 0x14d   : > { %420 = vrot.lane.b32.xlu0 %v404_v18, %s593_s16 }
 0x18f   : > { %v415_v19 = vpop.permute.xlu2 %414 }
 0x190   : > { %427 = vst.msk [vmem:[%s717_s14] sm:$0xf] %vm426_vm2, %v415_v19 }
 0x191   : > { %432 = vst.msk [vmem:[%s717_s14] sm:$0xf] %vm431_vm3, %v592_v9 }
 0x19f   : > { %v419_v20 = vpop.permute.xlu2 %418 }
 0x1a0   : > { %429 = vst.msk [vmem:[%s717_s14 + $0x8] sm:$0xf] %vm426_vm2, %v419_v20 }
 0x1a1   : > { %434 = vst.msk [vmem:[%s717_s14 + $0x8] sm:$0xf] %vm431_vm3, %v592_v9 }
 0x1af   : > { %v417_v21 = vpop.permute.xlu1 %416 }
 0x1b0   : > { %428 = vst.msk [vmem:[%s717_s14 + $0x4] sm:$0xf] %vm426_vm2, %v417_v21 }
 0x1b1   : > { %433 = vst.msk [vmem:[%s717_s14 + $0x4] sm:$0xf] %vm431_vm3, %v592_v9 }
 0x1bf   : > { %v421_v22 = vpop.permute.xlu0 %420 }
 0x1c0   : > { %430 = vst.msk [vmem:[%s717_s14 + $0xc] sm:$0xf] %vm426_vm2, %v421_v22 }
 0x1c1   : > { %435 = vst.msk [vmem:[%s717_s14 + $0xc] sm:$0xf] %vm431_vm3, %v592_v9 }
 0x1c2 PF: > { %s14_s15 = sadd.s32 1, %s582_s15  }
 0x1c3   : > { %p11_p4 = scmp.ge.s32.totalorder %s14_s15, 4  }
 0x1c5   :  { %13 = sbr.rel (!%p11_p4) target bundleno = 1 (0x1), region = 66 }

// kernel: unet3_forward.19
= control target key start
LH: loop header
LB: loop body
LE: loop exit
PB: predicated region body
PF: predicated region fallthrough
CT: control target
= control target key end

     0   :  { %s537_s15 = smov 0   ;;  %s636_s0 = inlined_call_operand.vmem [shape: bf16[2,16,110], index: 0, kind: input, shape index: {}]   ;;  %s637_s1 = inlined_call_operand.vmem [shape: bf16[32,144], index: 1, kind: input, shape index: {}]   ;;  %s638_s2 = inlined_call_operand.vmem [shape: f32[32,1], index: 2, kind: input, shape index: {}]   ;;  %s639_s3 = inlined_call_operand.vmem [shape: f32[1,80], index: 3, kind: input, shape index: {}]   ;;  %s640_s4 = inlined_call_operand.vmem [shape: bf16[2,32,110], index: 4, kind: output, shape index: {}]  }
   0x1 LB: > { %s424_s16 = sadd.s32 4294967295, %s500_s15   ;;  %p428_p0 = scmp.ge.s32.totalorder %s500_s15, 1  ;;  %s500_s15 = sphi %s537_s15, %s14_s15  }
   0x2   : > { %p162_p1 = scmp.lt.s32.totalorder %s500_s15, 3 }
   0x4   : > { %p163_p2 = pnand %p428_p0, %p162_p1 }
   0x5   : > { %p188_p3 = scmp.lt.s32.totalorder (!%p163_p2), %s424_s16, 1  ;;  %s502_s21 = smov (!%p163_p2), 107  }
   0x6   : > { %166 = sbr.rel (%p163_p2) target bundleno = 433 (0x1b1), region = 36  ;;  %s503_s22 = smov (!%p163_p2), 116  }
   0x7   : > { %s504_s23 = smov (!%p163_p2), 118   ;;  %s505_s24 = smov (!%p163_p2), 108  }
   0x8   : > { %s506_s25 = smov (!%p163_p2), 117   ;;  %s507_s26 = smov (!%p163_p2), 126  }
   0x9   : > { %s508_s27 = smov (!%p163_p2), 106   ;;  %s509_s28 = smov (!%p163_p2), 127  }
   0xa   : > { %s511_s8 = smov (!%p163_p2), 11  }
   0xb   : > { %s642_s16 = smov (!%p188_p3, %s424_s16), 1  ;;  %v237_v3 = vld [vmem:[%s638_s2 + $0x10] sm:$0xff]  ;;  %v236_v4 = vld [vmem:[%s638_s2 + $0x8] sm:$0xff]  ;;  %v510_v5 = vmov 0   ;;  %v235_v6 = vld [vmem:[%s638_s2] sm:$0xff]  ;;  %vm277_vm0 = vcmask 130048  }
   0xc   : > { %s457_s17 = sshll.u32 %s642_s16, 3  ;;  %492 = vset.pattern.permute.xlu1 %v510_v5  ;;  %491 = vset.pattern.permute.xlu0 %v510_v5  ;;  %v460_v10 = vld [vmem:[%s637_s1 + $0x4] sm:$0xf]  ;;  %v441_v11 = vld [vmem:[%s637_s1 + $0x8] sm:$0xf0]  ;;  %v238_v12 = vld [vmem:[%s638_s2 + $0x18] sm:$0xff] }
   0xd   : > { %s192_s20 = scalar_lea.vmem %s636_s0, %s457_s17  ;;  %490 = vset.pattern.permute.xlu2 %v510_v5  ;;  %v444_v14 = vor.u32 %v460_v10, %v441_v11  ;;  %v439_v17 = vld [vmem:[%s637_s1] sm:$0xf]  ;;  %v461_v18 = vld [vmem:[%s637_s1 + $0x4] sm:$0xf0]  ;;  %v447_v19 = vld [vmem:[%s637_s1 + $0x10] sm:$0xf] }
   0xe   : > { %v551_v0 = vld [vmem:[%s192_s20] sm:$0xff]  ;;  %v463_v20 = vld [vmem:[%s637_s1 + $0x14] sm:$0xf0]  ;;  %v462_v21 = vld [vmem:[%s637_s1 + $0x14] sm:$0xf]  ;;  %v440_v23 = vor.u32 %v461_v18, %v439_v17  ;;  %s458_s29 = sshll.u32 %s642_s16, 4 }
   0xf   : > { %225 = vrot.lane.b32.xlu0 %v551_v0, %s502_s21  ;;  %219 = vrot.lane.b32.xlu1 %v551_v0, %s503_s22  ;;  %v449_v22 = vld [vmem:[%s637_s1 + $0x18] sm:$0xf0]  ;;  %v448_v24 = vor.u32 %v463_v20, %v447_v19  ;;  %s608_s6 = scalar_lea.vmem %s640_s4, %s458_s29  ;;  %vm338_vm1 = vcmask 84992   ;;  %v493_v32 = vld [vmem:[%s639_s3] ss:$0 sm:$0xff]  ;;  %vm359_vm2 = vcmask 740440  }
  0x10   : > { %213 = vrot.lane.b32.xlu2 %v551_v0, %s504_s23  ;;  %v452_v25 = vor.u32 %v462_v21, %v449_v22  ;;  %340 = vst.msk [vmem:[%s608_s6 + $0x4] sm:$0xf] %vm338_vm1, %v510_v5  ;;  %vm364_vm3 = vcmask 896728  }
  0x11   : > { %339 = vst.msk [vmem:[%s608_s6] sm:$0xf] %vm338_vm1, %v510_v5 }
  0x12   : > { %341 = vst.msk [vmem:[%s608_s6 + $0x8] sm:$0xf] %vm338_vm1, %v510_v5 }
  0x13   : > { %342 = vst.msk [vmem:[%s608_s6 + $0xc] sm:$0xf] %vm338_vm1, %v510_v5 }
  0x17   : > { %222 = vrot.lane.b32.xlu0 %v551_v0, %s505_s24  ;;  %216 = vrot.lane.b32.xlu1 %v551_v0, %s506_s25 }
  0x18   : > { %210 = vrot.lane.b32.xlu2 %v551_v0, %s507_s26 }
  0x1f   : > { %228 = vrot.lane.b32.xlu0 %v551_v0, %s508_s27  ;;  %207 = vrot.lane.b32.xlu1 %v551_v0, %s509_s28 }
  0x20   : > { %241 = vperm.xlu2 %490, %v235_v6  }
  0x27   : > { %251 = vperm.xlu1 %492, %v237_v3   ;;  %246 = vperm.xlu0 %491, %v236_v4  }
  0x28   : > { %256 = vperm.xlu2 %490, %v238_v12  }
  0x6a   : > { %v214_v8 = vpop.permute.xlu2 %213 }
  0x72   : > { %v211_v15 = vpop.permute.xlu2 %210 }
  0x7a   : > { %v242_v28 = vpop.permute.xlu2 %241 }
  0x81   : > { %v226_v1 = vpop.permute.xlu0 %225  ;;  %v220_v2 = vpop.permute.xlu1 %219 }
  0x82   : > { %284 = vmatpush.bf16.msra.mxu0 %v226_v1  ;;  %464 = vmatpush.bf16.msra.mxu2 %v226_v1  ;;  %v257_v48 = vpop.permute.xlu2 %256 }
  0x89   : > { %v223_v7 = vpop.permute.xlu0 %222  ;;  %v217_v9 = vpop.permute.xlu1 %216 }
  0x8a   : > { %285 = vmatpush.bf16.msra.mxu0 %v223_v7  ;;  %465 = vmatpush.bf16.msra.mxu2 %v223_v7 }
  0x8e   : > { %286 = vmatpush.bf16.msra.mxu0 %v220_v2  ;;  %466 = vmatpush.bf16.msra.mxu2 %v220_v2 }
  0x91   : > { %v229_v13 = vpop.permute.xlu0 %228  ;;  %v208_v16 = vpop.permute.xlu1 %207 }
  0x92   : > { %287 = vmatpush.bf16.msra.mxu0 %v217_v9  ;;  %467 = vmatpush.bf16.msra.mxu2 %v217_v9 }
  0x93   : > { %310 = vmatpush.bf16.msra.mxu1 %v229_v13 }
  0x96   : > { %453 = vmatmul.msk.bf16.vlgmr.msra.gmra.mxu1 %vm277_vm0, %v444_v14  ;;  %288 = vmatpush.bf16.msra.mxu0 %v214_v8 }
  0x97   : > { %468 = vmatpush.bf16.msra.mxu2 %v214_v8 }
  0x99   : > { %v252_v34 = vpop.permute.xlu1 %251  ;;  %v247_v35 = vpop.permute.xlu0 %246 }
  0x9a   : > { %289 = vmatpush.bf16.msra.mxu0 %v211_v15 }
  0x9b   : > { %469 = vmatpush.bf16.msra.mxu2 %v211_v15 }
  0x9e   : > { %290 = vmatpush.bf16.msra.mxu0 %v208_v16 }
  0x9f   : > { %470 = vmatpush.bf16.msra.mxu2 %v208_v16 }
  0xa2   : > { %291 = vmatpush.bf16.msra.mxu0 %v551_v0 }
  0xa3   : > { %471 = vmatpush.bf16.msra.mxu2 %v551_v0 }
  0xa5   : > { %292 = vmatmul.bf16.vlgmr.msra.gmra.mxu0 %v440_v23 }
  0xa6   : > { %297 = vmatmul.bf16.vlgmr.msra.gmra.mxu2 %v448_v24  ;;  %454 = vmatmul.msk.bf16.gmra.mxu1 %vm277_vm0, %v452_v25 }
 0x113   : > { %v312_v26 = vpop.f32.mrf.mxu1 }
 0x11b   : > { %v314_v27 = vpop.f32.mrf.mxu1 }
 0x122   : > { %v293_v29 = vpop.f32.mrf.mxu0 }
 0x123   : > { %v294_v30 = vadd.f32 %v293_v29, %v242_v28  ;;  %v317_v36 = vpop.f32.mrf.mxu1 }
 0x125   : > { %v313_v31 = vadd.f32 %v312_v26, %v294_v30 }
 0x127   : > { %v322_v33 = vmax.f32 %v313_v31, 0.0 }
 0x129   : > { %v298_v37 = vpop.f32.mrf.mxu2  ;;  %v330_v38 = vmul.f32 %v493_v32, %v322_v33 }
 0x12a   : > { %v299_v39 = vadd.f32 %v298_v37, %v252_v34  ;;  %v295_v40 = vpop.f32.mrf.mxu0 }
 0x12b   : > { %v296_v41 = vadd.f32 %v295_v40, %v247_v35  ;;  %v334_v42 = vpack.c.bf16 %v330_v38, %v330_v38  ;;  %v319_v53 = vpop.f32.mrf.mxu1 }
 0x12c   : > { %v318_v43 = vadd.f32 %v317_v36, %v299_v39 }
 0x12d   : > { %v315_v44 = vadd.f32 %v314_v27, %v296_v41  ;;  %347 = vrot.lane.b32.xlu1 %v334_v42, %s511_s8 }
 0x12e   : > { %v324_v45 = vmax.f32 %v318_v43, 0.0 }
 0x12f   : > { %v323_v46 = vmax.f32 %v315_v44, 0.0 }
 0x130   : > { %v332_v47 = vmul.f32 %v493_v32, %v324_v45 }
 0x131   : > { %v300_v49 = vpop.f32.mrf.mxu2  ;;  %v331_v50 = vmul.f32 %v493_v32, %v323_v46 }
 0x132   : > { %v301_v51 = vadd.f32 %v300_v49, %v257_v48  ;;  %v336_v52 = vpack.c.bf16 %v332_v47, %v332_v47 }
 0x133   : > { %v335_v54 = vpack.c.bf16 %v331_v50, %v331_v50 }
 0x134   : > { %v320_v55 = vadd.f32 %v319_v53, %v301_v51  ;;  %351 = vrot.lane.b32.xlu0 %v336_v52, %s511_s8 }
 0x135   : > { %349 = vrot.lane.b32.xlu2 %v335_v54, %s511_s8 }
 0x136   : > { %v325_v56 = vmax.f32 %v320_v55, 0.0 }
 0x138   : > { %v333_v57 = vmul.f32 %v493_v32, %v325_v56 }
 0x13a   : > { %v337_v58 = vpack.c.bf16 %v333_v57, %v333_v57 }
 0x13c   : > { %353 = vrot.lane.b32.xlu1 %v337_v58, %s511_s8 }
 0x18f   : > { %v350_v59 = vpop.permute.xlu2 %349 }
 0x190   : > { %361 = vst.msk [vmem:[%s608_s6 + $0x4] sm:$0xf] %vm359_vm2, %v350_v59 }
 0x191   : > { %366 = vst.msk [vmem:[%s608_s6 + $0x4] sm:$0xf] %vm364_vm3, %v510_v5 }
 0x19f   : > { %v348_v60 = vpop.permute.xlu1 %347 }
 0x1a0   : > { %360 = vst.msk [vmem:[%s608_s6] sm:$0xf] %vm359_vm2, %v348_v60 }
 0x1a1   : > { %365 = vst.msk [vmem:[%s608_s6] sm:$0xf] %vm364_vm3, %v510_v5 }
 0x1a6   : > { %v352_v61 = vpop.permute.xlu0 %351 }
 0x1a7   : > { %362 = vst.msk [vmem:[%s608_s6 + $0x8] sm:$0xf] %vm359_vm2, %v352_v61 }
 0x1a8   : > { %367 = vst.msk [vmem:[%s608_s6 + $0x8] sm:$0xf] %vm364_vm3, %v510_v5 }
 0x1ae   : > { %v354_v62 = vpop.permute.xlu1 %353 }
 0x1af   : > { %363 = vst.msk [vmem:[%s608_s6 + $0xc] sm:$0xf] %vm359_vm2, %v354_v62 }
 0x1b0   : > { %368 = vst.msk [vmem:[%s608_s6 + $0xc] sm:$0xf] %vm364_vm3, %v510_v5 }
 0x1b1 PF: > { %s14_s15 = sadd.s32 1, %s500_s15  }
 0x1b2   : > { %p11_p4 = scmp.ge.s32.totalorder %s14_s15, 4  }
 0x1b4   :  { %13 = sbr.rel (!%p11_p4) target bundleno = 1 (0x1), region = 66 }

// kernel: unet3_forward.23
= control target key start
LH: loop header
LB: loop body
LE: loop exit
PB: predicated region body
PF: predicated region fallthrough
CT: control target
= control target key end

     0   :  { %s1017_s15 = smov 0   ;;  %s1343_s0 = inlined_call_operand.vmem [shape: bf16[2,64,42], index: 0, kind: input, shape index: {}]   ;;  %s1344_s1 = inlined_call_operand.vmem [shape: bf16[64,576], index: 1, kind: input, shape index: {}]   ;;  %s1345_s2 = inlined_call_operand.vmem [shape: f32[64,1], index: 2, kind: input, shape index: {}]   ;;  %s1346_s3 = inlined_call_operand.vmem [shape: f32[1,24], index: 3, kind: input, shape index: {}]   ;;  %s1347_s4 = inlined_call_operand.vmem [shape: bf16[2,64,42], index: 4, kind: output, shape index: {}]  }
   0x1 LB: > { %s799_s16 = sadd.s32 4294967295, %s980_s15   ;;  %p803_p0 = scmp.ge.s32.totalorder %s980_s15, 1  ;;  %s980_s15 = sphi %s1017_s15, %s14_s15  }
   0x2   : > { %p162_p1 = scmp.lt.s32.totalorder %s980_s15, 3 }
   0x4   : > { %p163_p2 = pnand %p803_p0, %p162_p1 }
   0x5   : > { %p188_p3 = scmp.lt.s32.totalorder (!%p163_p2), %s799_s16, 1  ;;  %s982_s21 = smov (!%p163_p2), 127  }
   0x6   : > { %166 = sbr.rel (%p163_p2) target bundleno = 524 (0x20c), region = 36  ;;  %s983_s22 = smov (!%p163_p2), 120  }
   0x7   : > { %s984_s23 = smov (!%p163_p2), 115   ;;  %s985_s24 = smov (!%p163_p2), 122  }
   0x8   : > { %s986_s25 = smov (!%p163_p2), 121   ;;  %s987_s26 = smov (!%p163_p2), 116  }
   0x9   : > { %s988_s27 = smov (!%p163_p2), 126   ;;  %s989_s28 = smov (!%p163_p2), 114  }
   0xa   : > { %s991_s9 = smov (!%p163_p2), 7  }
   0xb   : > { %s1349_s16 = smov (!%p188_p3, %s799_s16), 1  ;;  %v990_v19 = vmov 0   ;;  %v353_v20 = vld [vmem:[%s1345_s2 + $0x10] sm:$0xff]  ;;  %v846_v21 = vld [vmem:[%s1344_s1 + $0x28] sm:$0xf]  ;;  %v355_v34 = vld [vmem:[%s1345_s2 + $0x20] sm:$0xff] }
   0xc   : > { %s910_s17 = sshll.u32 %s1349_s16, 5  ;;  %972 = vset.pattern.permute.xlu1 %v990_v19  ;;  %971 = vset.pattern.permute.xlu0 %v990_v19  ;;  %v923_v22 = vld [vmem:[%s1344_s1 + $0x38] sm:$0xf0]  ;;  %v886_v23 = vld [vmem:[%s1344_s1 + $0x78] sm:$0xf]  ;;  %v352_v33 = vld [vmem:[%s1345_s2 + $0x8] sm:$0xff] }
   0xd   : > { %s192_s20 = scalar_lea.vmem %s1343_s0, %s910_s17  ;;  %970 = vset.pattern.permute.xlu2 %v990_v19  ;;  %v933_v24 = vld [vmem:[%s1344_s1 + $0x88] sm:$0xf0]  ;;  %v826_v25 = vld [vmem:[%s1344_s1] sm:$0xf]  ;;  %v918_v26 = vld [vmem:[%s1344_s1 + $0x10] sm:$0xf0]  ;;  %v847_v29 = vor.u32 %v923_v22, %v846_v21  ;;  %s1262_s12 = scalar_lea.vmem %s1347_s4, %s910_s17 }
   0xe   : > { %v1033_v0 = vld [vmem:[%s192_s20 + $0x18] sm:$0xff]  ;;  %v1035_v1 = vld [vmem:[%s192_s20 + $0x8] sm:$0xff]  ;;  %v1040_v2 = vld [vmem:[%s192_s20 + $0x10] sm:$0xff]  ;;  %v827_v30 = vor.u32 %v918_v26, %v826_v25  ;;  %v887_v31 = vor.u32 %v933_v24, %v886_v23  ;;  %vm499_vm0 = vcmask 523264   ;;  %vm685_vm1 = vcmask 52224  }
   0xf   : > { %237 = vrot.lane.b32.xlu0 %v1033_v0, %s982_s21  ;;  %233 = vrot.lane.b32.xlu1 %v1035_v1, %s982_s21  ;;  %v1042_v3 = vld [vmem:[%s192_s20] sm:$0xff]  ;;  %v357_v38 = vld [vmem:[%s1345_s2 + $0x30] sm:$0xff]  ;;  %vm726_vm2 = vcmask 248888   ;;  %vm735_vm3 = vcmask 339192  }
  0x10   : > { %285 = vrot.lane.b32.xlu2 %v1033_v0, %s983_s22  ;;  %v351_v37 = vld [vmem:[%s1345_s2] sm:$0xff]  ;;  %v866_v39 = vld [vmem:[%s1344_s1 + $0x50] sm:$0xf]  ;;  %v358_v41 = vld [vmem:[%s1345_s2 + $0x38] sm:$0xff] }
  0x11   : > { %v928_v40 = vld [vmem:[%s1344_s1 + $0x60] sm:$0xf0]  ;;  %v354_v45 = vld [vmem:[%s1345_s2 + $0x18] sm:$0xff]  ;;  %v834_v49 = vld [vmem:[%s1344_s1 + $0x8] sm:$0xf] }
  0x12   : > { %v867_v44 = vor.u32 %v928_v40, %v866_v39  ;;  %v919_v50 = vld [vmem:[%s1344_s1 + $0x18] sm:$0xf0]  ;;  %v916_v54 = vld [vmem:[%s1344_s1 + $0x4] sm:$0xf]  ;;  %v828_v55 = vld [vmem:[%s1344_s1 + $0x14] sm:$0xf0] }
  0x13   : > { %v835_v51 = vor.u32 %v919_v50, %v834_v49  ;;  %v356_v57 = vld [vmem:[%s1345_s2 + $0x28] sm:$0xff]  ;;  %v831_v58 = vor.u32 %v916_v54, %v828_v55  ;;  %v836_v60 = vld [vmem:[%s1344_s1 + $0x1c] sm:$0xf0]  ;;  %v927_v24 = vld [vmem:[%s1344_s1 + $0x5c] sm:$0xf] }
  0x14   : > { %v917_v59 = vld [vmem:[%s1344_s1 + $0xc] sm:$0xf]  ;;  %v876_v25 = vld [vmem:[%s1344_s1 + $0x6c] sm:$0xf0]  ;;  %v902_v39 = vld [vmem:[%s1344_s1 + $0x88] sm:$0xf] }
  0x15   : > { %v839_v62 = vor.u32 %v917_v59, %v836_v60  ;;  %v925_v21 = vld [vmem:[%s1344_s1 + $0x48] sm:$0xf0]  ;;  %v879_v26 = vor.u32 %v927_v24, %v876_v25  ;;  %v935_v40 = vld [vmem:[%s1344_s1 + $0x98] sm:$0xf0]  ;;  %686 = vst.msk [vmem:[%s1262_s12] sm:$0xf] %vm685_vm1, %v990_v19 }
  0x16   : > { %687 = vst.msk [vmem:[%s1262_s12 + $0x4] sm:$0xf] %vm685_vm1, %v990_v19 }
  0x17   : > { %235 = vrot.lane.b32.xlu0 %v1040_v2, %s982_s21  ;;  %231 = vrot.lane.b32.xlu1 %v1042_v3, %s982_s21  ;;  %688 = vst.msk [vmem:[%s1262_s12 + $0x8] sm:$0xf] %vm685_vm1, %v990_v19 }
  0x18   : > { %309 = vrot.lane.b32.xlu2 %v1033_v0, %s984_s23  ;;  %689 = vst.msk [vmem:[%s1262_s12 + $0xc] sm:$0xf] %vm685_vm1, %v990_v19 }
  0x19   : > { %690 = vst.msk [vmem:[%s1262_s12 + $0x10] sm:$0xf] %vm685_vm1, %v990_v19 }
  0x1a   : > { %691 = vst.msk [vmem:[%s1262_s12 + $0x14] sm:$0xf] %vm685_vm1, %v990_v19 }
  0x1b   : > { %692 = vst.msk [vmem:[%s1262_s12 + $0x18] sm:$0xf] %vm685_vm1, %v990_v19 }
  0x1c   : > { %693 = vst.msk [vmem:[%s1262_s12 + $0x1c] sm:$0xf] %vm685_vm1, %v990_v19 }
  0x1f   : > { %261 = vrot.lane.b32.xlu0 %v1033_v0, %s985_s24  ;;  %283 = vrot.lane.b32.xlu1 %v1040_v2, %s983_s22 }
  0x20   : > { %307 = vrot.lane.b32.xlu2 %v1040_v2, %s984_s23 }
  0x27   : > { %259 = vrot.lane.b32.xlu0 %v1040_v2, %s985_s24  ;;  %281 = vrot.lane.b32.xlu1 %v1035_v1, %s983_s22 }
  0x28   : > { %305 = vrot.lane.b32.xlu2 %v1035_v1, %s984_s23 }
  0x2f   : > { %257 = vrot.lane.b32.xlu0 %v1035_v1, %s985_s24  ;;  %279 = vrot.lane.b32.xlu1 %v1042_v3, %s983_s22 }
  0x30   : > { %303 = vrot.lane.b32.xlu2 %v1042_v3, %s984_s23 }
  0x37   : > { %255 = vrot.lane.b32.xlu0 %v1042_v3, %s985_s24  ;;  %273 = vrot.lane.b32.xlu1 %v1033_v0, %s986_s25 }
  0x38   : > { %297 = vrot.lane.b32.xlu2 %v1033_v0, %s987_s26 }
  0x3f   : > { %249 = vrot.lane.b32.xlu0 %v1033_v0, %s988_s27  ;;  %271 = vrot.lane.b32.xlu1 %v1040_v2, %s986_s25 }
  0x40   : > { %295 = vrot.lane.b32.xlu2 %v1040_v2, %s987_s26 }
  0x47   : > { %247 = vrot.lane.b32.xlu0 %v1040_v2, %s988_s27  ;;  %269 = vrot.lane.b32.xlu1 %v1035_v1, %s986_s25 }
  0x48   : > { %293 = vrot.lane.b32.xlu2 %v1035_v1, %s987_s26 }
  0x4f   : > { %321 = vrot.lane.b32.xlu0 %v1033_v0, %s989_s28  ;;  %245 = vrot.lane.b32.xlu1 %v1035_v1, %s988_s27 }
  0x50   : > { %267 = vrot.lane.b32.xlu2 %v1042_v3, %s986_s25 }
  0x57   : > { %291 = vrot.lane.b32.xlu0 %v1042_v3, %s987_s26  ;;  %319 = vrot.lane.b32.xlu1 %v1040_v2, %s989_s28 }
  0x58   : > { %243 = vrot.lane.b32.xlu2 %v1042_v3, %s988_s27 }
  0x5f   : > { %317 = vrot.lane.b32.xlu0 %v1035_v1, %s989_s28  ;;  %315 = vrot.lane.b32.xlu1 %v1042_v3, %s989_s28 }
  0x60   : > { %361 = vperm.xlu2 %970, %v351_v37   ;;  %v896_v37 = vld [vmem:[%s1344_s1 + $0x94] sm:$0xf0] }
  0x67   : > { %371 = vperm.xlu1 %972, %v353_v20   ;;  %366 = vperm.xlu0 %971, %v352_v33   ;;  %v862_v20 = vld [vmem:[%s1344_s1 + $0x38] sm:$0xf]  ;;  %v930_v33 = vld [vmem:[%s1344_s1 + $0x70] sm:$0xf0] }
  0x68   : > { %376 = vperm.xlu2 %970, %v354_v45   ;;  %v863_v23 = vor.u32 %v925_v21, %v862_v20 }
  0x6a   : > { %v1073_v4 = vpop.permute.xlu2 %285 }
  0x6f   : > { %381 = vperm.xlu1 %972, %v355_v34   ;;  %391 = vperm.xlu0 %971, %v357_v38  }
  0x70   : > { %386 = vperm.xlu2 %970, %v356_v57  }
  0x72   : > { %v310_v5 = vpop.permute.xlu2 %309 }
  0x73   : > { %599 = vmatpush.bf16.msra.mxu3 %v310_v5  ;;  %v848_v5 = vld [vmem:[%s1344_s1 + $0x3c] sm:$0xf0] }
  0x77   : > { %396 = vperm.xlu1 %972, %v358_v41   ;;  %v903_v41 = vor.u32 %v935_v40, %v902_v39 }
  0x7a   : > { %v308_v6 = vpop.permute.xlu2 %307 }
  0x7b   : > { %600 = vmatpush.bf16.msra.mxu3 %v308_v6  ;;  %v842_v6 = vld [vmem:[%s1344_s1 + $0x10] sm:$0xf] }
  0x81   : > { %v238_v7 = vpop.permute.xlu0 %237  ;;  %v234_v8 = vpop.permute.xlu1 %233 }
  0x82   : > { %512 = vmatpush.bf16.msra.mxu0 %v238_v7  ;;  %936 = vmatpush.bf16.msra.mxu1 %v238_v7  ;;  %v306_v9 = vpop.permute.xlu2 %305 }
  0x83   : > { %937 = vmatpush.bf16.msra.mxu2 %v238_v7  ;;  %601 = vmatpush.bf16.msra.mxu3 %v306_v9  ;;  %v920_v7 = vld [vmem:[%s1344_s1 + $0x20] sm:$0xf0] }
  0x89   : > { %v236_v10 = vpop.permute.xlu0 %235  ;;  %v232_v11 = vpop.permute.xlu1 %231 }
  0x8a   : > { %513 = vmatpush.bf16.msra.mxu0 %v236_v10  ;;  %938 = vmatpush.bf16.msra.mxu1 %v236_v10  ;;  %v304_v12 = vpop.permute.xlu2 %303 }
  0x8b   : > { %939 = vmatpush.bf16.msra.mxu2 %v236_v10  ;;  %602 = vmatpush.bf16.msra.mxu3 %v304_v12  ;;  %v843_v10 = vor.u32 %v920_v7, %v842_v6  ;;  %v856_v12 = vld [vmem:[%s1344_s1 + $0x44] sm:$0xf0] }
  0x8e   : > { %514 = vmatpush.bf16.msra.mxu0 %v234_v8  ;;  %940 = vmatpush.bf16.msra.mxu1 %v234_v8 }
  0x8f   : > { %941 = vmatpush.bf16.msra.mxu2 %v234_v8 }
  0x91   : > { %v262_v13 = vpop.permute.xlu0 %261  ;;  %v284_v14 = vpop.permute.xlu1 %283 }
  0x92   : > { %515 = vmatpush.bf16.msra.mxu0 %v232_v11  ;;  %942 = vmatpush.bf16.msra.mxu1 %v232_v11  ;;  %v298_v15 = vpop.permute.xlu2 %297 }
  0x93   : > { %943 = vmatpush.bf16.msra.mxu2 %v232_v11  ;;  %603 = vmatpush.bf16.msra.mxu3 %v298_v15  ;;  %v922_v11 = vld [vmem:[%s1344_s1 + $0x34] sm:$0xf]  ;;  %v929_v15 = vld [vmem:[%s1344_s1 + $0x68] sm:$0xf0] }
  0x96   : > { %944 = vmatpush.bf16.msra.mxu1 %v1033_v0  ;;  %516 = vmatpush.bf16.msra.mxu0 %v1033_v0 }
  0x97   : > { %945 = vmatpush.bf16.msra.mxu2 %v1033_v0  ;;  %v854_v0 = vld [vmem:[%s1344_s1 + $0x30] sm:$0xf] }
  0x99   : > { %v260_v16 = vpop.permute.xlu0 %259  ;;  %v282_v17 = vpop.permute.xlu1 %281 }
  0x9a   : > { %946 = vmatpush.bf16.msra.mxu1 %v1040_v2  ;;  %v296_v18 = vpop.permute.xlu2 %295  ;;  %517 = vmatpush.bf16.msra.mxu0 %v1040_v2 }
  0x9b   : > { %947 = vmatpush.bf16.msra.mxu2 %v1040_v2  ;;  %604 = vmatpush.bf16.msra.mxu3 %v296_v18  ;;  %v868_v18 = vld [vmem:[%s1344_s1 + $0x64] sm:$0xf0] }
  0x9e   : > { %948 = vmatpush.bf16.msra.mxu1 %v1035_v1  ;;  %518 = vmatpush.bf16.msra.mxu0 %v1035_v1 }
  0x9f   : > { %949 = vmatpush.bf16.msra.mxu2 %v1035_v1  ;;  %v924_v1 = vld [vmem:[%s1344_s1 + $0x40] sm:$0xf0] }
  0xa0   : > { %v855_v2 = vor.u32 %v924_v1, %v854_v0 }
  0xa1   : > { %v258_v27 = vpop.permute.xlu0 %257  ;;  %v280_v28 = vpop.permute.xlu1 %279 }
  0xa2   : > { %950 = vmatpush.bf16.msra.mxu1 %v1042_v3  ;;  %519 = vmatpush.bf16.msra.mxu0 %v1042_v3  ;;  %v294_v32 = vpop.permute.xlu2 %293 }
  0xa3   : > { %951 = vmatpush.bf16.msra.mxu2 %v1042_v3  ;;  %605 = vmatpush.bf16.msra.mxu3 %v294_v32  ;;  %v882_v32 = vld [vmem:[%s1344_s1 + $0x60] sm:$0xf] }
  0xa5   : > { %525 = vmatmul.bf16.vlgmr.msra.gmra.mxu1 %v847_v29  ;;  %520 = vmatmul.bf16.vlgmr.msra.gmra.mxu0 %v827_v30  ;;  %v931_v30 = vld [vmem:[%s1344_s1 + $0x7c] sm:$0xf] }
  0xa6   : > { %541 = vmatpush.bf16.msrb.mxu1 %v262_v13  ;;  %535 = vmatmul.bf16.vlgmr.msra.gmra.mxu2 %v887_v31  ;;  %v859_v13 = vor.u32 %v922_v11, %v856_v12  ;;  %v888_v31 = vld [vmem:[%s1344_s1 + $0x8c] sm:$0xf0] }
  0xa7   : > { %570 = vmatpush.bf16.msrb.mxu2 %v1073_v4  ;;  %v921_v4 = vld [vmem:[%s1344_s1 + $0x2c] sm:$0xf]  ;;  %v891_v34 = vor.u32 %v931_v30, %v888_v31 }
  0xa8   : > { %v851_v9 = vor.u32 %v921_v4, %v848_v5 }
  0xa9   : > { %v256_v35 = vpop.permute.xlu0 %255  ;;  %v274_v36 = vpop.permute.xlu1 %273 }
  0xaa   : > { %542 = vmatpush.bf16.msrb.mxu1 %v260_v16  ;;  %v268_v46 = vpop.permute.xlu2 %267 }
  0xab   : > { %571 = vmatpush.bf16.msrb.mxu2 %v284_v14  ;;  %v874_v14 = vld [vmem:[%s1344_s1 + $0x58] sm:$0xf] }
  0xac   : > { %v875_v16 = vor.u32 %v929_v15, %v874_v14 }
  0xae   : > { %543 = vmatpush.bf16.msrb.mxu1 %v258_v27  ;;  %v894_v27 = vld [vmem:[%s1344_s1 + $0x80] sm:$0xf] }
  0xaf   : > { %572 = vmatpush.bf16.msrb.mxu2 %v282_v17  ;;  %v926_v17 = vld [vmem:[%s1344_s1 + $0x54] sm:$0xf] }
  0xb0   : > { %v871_v22 = vor.u32 %v926_v17, %v868_v18 }
  0xb1   : > { %v250_v42 = vpop.permute.xlu0 %249  ;;  %v272_v43 = vpop.permute.xlu1 %271 }
  0xb2   : > { %544 = vmatpush.bf16.msrb.mxu1 %v256_v35  ;;  %v244_v56 = vpop.permute.xlu2 %243  ;;  %v883_v35 = vor.u32 %v930_v33, %v882_v32 }
  0xb3   : > { %573 = vmatpush.bf16.msrb.mxu2 %v280_v28  ;;  %v934_v28 = vld [vmem:[%s1344_s1 + $0x90] sm:$0xf0] }
  0xb4   : > { %v895_v29 = vor.u32 %v934_v28, %v894_v27 }
  0xb5   : > { %530 = vmatmul.bf16.gmra.mxu1 %v867_v44 }
  0xb6   : > { %545 = vmatpush.bf16.msrb.mxu1 %v250_v42 }
  0xb7   : > { %574 = vmatpush.bf16.msrb.mxu2 %v274_v36  ;;  %v932_v36 = vld [vmem:[%s1344_s1 + $0x84] sm:$0xf] }
  0xb8   : > { %v899_v38 = vor.u32 %v932_v36, %v896_v37 }
  0xb9   : > { %v248_v47 = vpop.permute.xlu0 %247  ;;  %v270_v48 = vpop.permute.xlu1 %269 }
  0xba   : > { %546 = vmatpush.bf16.msrb.mxu1 %v248_v47 }
  0xbb   : > { %575 = vmatpush.bf16.msrb.mxu2 %v272_v43 }
  0xbf   : > { %576 = vmatpush.bf16.msrb.mxu2 %v270_v48 }
  0xc1   : > { %v322_v52 = vpop.permute.xlu0 %321  ;;  %v246_v53 = vpop.permute.xlu1 %245 }
  0xc2   : > { %547 = vmatpush.bf16.msrb.mxu1 %v246_v53  ;;  %632 = vmatpush.bf16.msrb.mxu0 %v322_v52 }
  0xc3   : > { %577 = vmatpush.bf16.msrb.mxu2 %v268_v46 }
  0xc6   : > { %578 = vmatmul.bf16.vlgmr.msrb.gmra.mxu2 %v835_v51  ;;  %548 = vmatpush.bf16.msrb.mxu1 %v244_v56  ;;  %v362_v51 = vpop.permute.xlu2 %361 }
  0xc9   : > { %v292_v61 = vpop.permute.xlu0 %291  ;;  %549 = vmatmul.bf16.vlgmr.msrb.gmra.mxu1 %v831_v58  ;;  %v320_v63 = vpop.permute.xlu1 %319 }
  0xca   : > { %606 = vmatpush.bf16.msra.mxu3 %v292_v61  ;;  %633 = vmatpush.bf16.msrb.mxu0 %v320_v63 }
  0xcd   : > { %607 = vmatmul.bf16.vlgmr.msra.gmra.mxu3 %v839_v62 }
  0xce   : > { %v377_v20 = vpop.permute.xlu2 %376 }
  0xd1   : > { %v318_v3 = vpop.permute.xlu0 %317  ;;  %v316_v8 = vpop.permute.xlu1 %315 }
  0xd2   : > { %634 = vmatpush.bf16.msrb.mxu0 %v318_v3 }
  0xd6   : > { %583 = vmatmul.bf16.gmra.mxu2 %v855_v2  ;;  %635 = vmatpush.bf16.msrb.mxu0 %v316_v8  ;;  %v1248_v2 = vld [vmem:[%s1346_s3] ss:$0 sm:$0xff] }
  0xd9   : > { %554 = vmatmul.bf16.gmra.mxu1 %v851_v9  ;;  %904 = vmatmul.msk.bf16.vlgmr.msrb.gmra.mxu0 %vm499_vm0, %v843_v10  ;;  %v367_v59 = vpop.permute.xlu0 %366  ;;  %v372_v6 = vpop.permute.xlu1 %371 }
  0xdd   : > { %612 = vmatmul.bf16.gmra.mxu3 %v859_v13 }
  0xe6   : > { %588 = vmatmul.bf16.gmra.mxu2 %v875_v16 }
  0xe9   : > { %559 = vmatmul.bf16.gmra.mxu1 %v871_v22  ;;  %905 = vmatmul.msk.bf16.gmra.mxu0 %vm499_vm0, %v863_v23 }
  0xed   : > { %617 = vmatmul.bf16.gmra.mxu3 %v879_v26 }
  0xf6   : > { %593 = vmatmul.bf16.gmra.mxu2 %v895_v29 }
  0xf9   : > { %564 = vmatmul.bf16.gmra.mxu1 %v891_v34  ;;  %906 = vmatmul.msk.bf16.gmra.mxu0 %vm499_vm0, %v883_v35  ;;  %v382_v35 = vpop.permute.xlu1 %381 }
  0xfd   : > { %622 = vmatmul.bf16.gmra.mxu3 %v899_v38 }
 0x109   : > { %907 = vmatmul.msk.bf16.gmra.mxu0 %vm499_vm0, %v903_v41 }
 0x122   : > { %v526_v42 = vpop.f32.mrf.mxu1  ;;  %v521_v48 = vpop.f32.mrf.mxu0 }
 0x123   : > { %v522_v52 = vadd.f32 %v521_v48, %v362_v51  ;;  %v527_v9 = vadd.f32 %v526_v42, %v372_v6 }
 0x129   : > { %v1239_v45 = vpop.f32.mrf.mxu2 }
 0x12a   : > { %v528_v43 = vpop.f32.mrf.mxu1  ;;  %v523_v53 = vpop.f32.mrf.mxu0 }
 0x12b   : > { %v524_v60 = vadd.f32 %v523_v53, %v367_v59  ;;  %v529_v23 = vadd.f32 %v528_v43, %v377_v20 }
 0x131   : > { %v1243_v47 = vpop.f32.mrf.mxu2 }
 0x132   : > { %v531_v44 = vpop.f32.mrf.mxu1 }
 0x133   : > { %v532_v36 = vadd.f32 %v531_v44, %v382_v35 }
 0x13a   : > { %v1241_v46 = vpop.f32.mrf.mxu1 }
 0x146   : > { %v550_v49 = vpop.f32.mrf.mxu1 }
 0x147   : > { %v551_v56 = vadd.f32 %v550_v49, %v522_v52  ;;  %v387_v49 = vpop.permute.xlu2 %386 }
 0x148   : > { %v534_v44 = vadd.f32 %v1241_v46, %v387_v49  ;;  %v392_v46 = vpop.permute.xlu0 %391 }
 0x149   : > { %v579_v50 = vpop.f32.mrf.mxu2 }
 0x14a   : > { %v580_v58 = vadd.f32 %v579_v50, %v551_v56 }
 0x14e   : > { %v552_v54 = vpop.f32.mrf.mxu1 }
 0x14f   : > { %v553_v0 = vadd.f32 %v552_v54, %v524_v60 }
 0x150   : > { %v608_v57 = vpop.f32.mrf.mxu3 }
 0x151   : > { %v581_v55 = vpop.f32.mrf.mxu2  ;;  %v609_v61 = vadd.f32 %v608_v57, %v580_v58 }
 0x152   : > { %v582_v7 = vadd.f32 %v581_v55, %v553_v0 }
 0x156   : > { %v555_v62 = vpop.f32.mrf.mxu1  ;;  %v637_v63 = vpop.f32.mrf.mxu0 }
 0x157   : > { %v638_v1 = vadd.f32 %v637_v63, %v609_v61  ;;  %v556_v14 = vadd.f32 %v555_v62, %v527_v9  ;;  %v537_v63 = vadd.f32 %v1239_v45, %v392_v46  ;;  %v397_v45 = vpop.permute.xlu1 %396 }
 0x158   : > { %v610_v4 = vpop.f32.mrf.mxu3 }
 0x159   : > { %v584_v3 = vpop.f32.mrf.mxu2  ;;  %v657_v5 = vmax.f32 %v638_v1, 0.0  ;;  %v611_v11 = vadd.f32 %v610_v4, %v582_v7 }
 0x15a   : > { %v585_v21 = vadd.f32 %v584_v3, %v556_v14 }
 0x15b   : > { %v669_v8 = vmul.f32 %v1248_v2, %v657_v5 }
 0x15d   : > { %v677_v10 = vpack.c.bf16 %v669_v8, %v669_v8 }
 0x15e   : > { %v557_v12 = vpop.f32.mrf.mxu1  ;;  %v639_v13 = vpop.f32.mrf.mxu0 }
 0x15f   : > { %v640_v15 = vadd.f32 %v639_v13, %v611_v11  ;;  %702 = vrot.lane.b32.xlu2 %v677_v10, %s991_s9  ;;  %v558_v28 = vadd.f32 %v557_v12, %v529_v23  ;;  %v539_v12 = vadd.f32 %v1243_v47, %v397_v45 }
 0x160   : > { %v613_v17 = vpop.f32.mrf.mxu3 }
 0x161   : > { %v586_v16 = vpop.f32.mrf.mxu2  ;;  %v658_v18 = vmax.f32 %v640_v15, 0.0  ;;  %v614_v25 = vadd.f32 %v613_v17, %v585_v21 }
 0x162   : > { %v587_v33 = vadd.f32 %v586_v16, %v558_v28 }
 0x163   : > { %v670_v22 = vmul.f32 %v1248_v2, %v658_v18 }
 0x165   : > { %v678_v24 = vpack.c.bf16 %v670_v22, %v670_v22 }
 0x166   : > { %v560_v26 = vpop.f32.mrf.mxu1  ;;  %v642_v27 = vpop.f32.mrf.mxu0 }
 0x167   : > { %v643_v29 = vadd.f32 %v642_v27, %v614_v25  ;;  %704 = vrot.lane.b32.xlu0 %v678_v24, %s991_s9  ;;  %v561_v40 = vadd.f32 %v560_v26, %v532_v36 }
 0x168   : > { %v615_v30 = vpop.f32.mrf.mxu3 }
 0x169   : > { %v659_v31 = vmax.f32 %v643_v29, 0.0  ;;  %v589_v32 = vpop.f32.mrf.mxu2  ;;  %v616_v38 = vadd.f32 %v615_v30, %v587_v33 }
 0x16a   : > { %v590_v50 = vadd.f32 %v589_v32, %v561_v40 }
 0x16b   : > { %v671_v34 = vmul.f32 %v1248_v2, %v659_v31 }
 0x16d   : > { %v679_v37 = vpack.c.bf16 %v671_v34, %v671_v34 }
 0x16e   : > { %v644_v39 = vpop.f32.mrf.mxu0  ;;  %v562_v42 = vpop.f32.mrf.mxu1 }
 0x16f   : > { %v645_v41 = vadd.f32 %v644_v39, %v616_v38  ;;  %706 = vrot.lane.b32.xlu1 %v679_v37, %s991_s9  ;;  %v563_v56 = vadd.f32 %v562_v42, %v534_v44 }
 0x170   : > { %v618_v43 = vpop.f32.mrf.mxu3 }
 0x171   : > { %v660_v48 = vmax.f32 %v645_v41, 0.0  ;;  %v591_v52 = vpop.f32.mrf.mxu2  ;;  %v619_v54 = vadd.f32 %v618_v43, %v590_v50 }
 0x172   : > { %v592_v61 = vadd.f32 %v591_v52, %v563_v56 }
 0x173   : > { %v672_v51 = vmul.f32 %v1248_v2, %v660_v48 }
 0x175   : > { %v680_v53 = vpack.c.bf16 %v672_v51, %v672_v51 }
 0x176   : > { %v647_v55 = vpop.f32.mrf.mxu0  ;;  %v565_v60 = vpop.f32.mrf.mxu1 }
 0x177   : > { %v648_v57 = vadd.f32 %v647_v55, %v619_v54  ;;  %708 = vrot.lane.b32.xlu2 %v680_v53, %s991_s9  ;;  %v566_v5 = vadd.f32 %v565_v60, %v537_v63 }
 0x178   : > { %v620_v58 = vpop.f32.mrf.mxu3 }
 0x179   : > { %v661_v59 = vmax.f32 %v648_v57, 0.0  ;;  %v621_v1 = vadd.f32 %v620_v58, %v592_v61  ;;  %v594_v3 = vpop.f32.mrf.mxu2 }
 0x17a   : > { %v595_v9 = vadd.f32 %v594_v3, %v566_v5 }
 0x17b   : > { %v673_v62 = vmul.f32 %v1248_v2, %v661_v59 }
 0x17d   : > { %v681_v0 = vpack.c.bf16 %v673_v62, %v673_v62 }
 0x17e   : > { %v649_v4 = vpop.f32.mrf.mxu0  ;;  %v567_v11 = vpop.f32.mrf.mxu1 }
 0x17f   : > { %v650_v6 = vadd.f32 %v649_v4, %v621_v1  ;;  %710 = vrot.lane.b32.xlu0 %v681_v0, %s991_s9  ;;  %v568_v16 = vadd.f32 %v567_v11, %v539_v12 }
 0x180   : > { %v623_v7 = vpop.f32.mrf.mxu3 }
 0x181   : > { %v662_v8 = vmax.f32 %v650_v6, 0.0  ;;  %v624_v14 = vadd.f32 %v623_v7, %v595_v9  ;;  %v596_v18 = vpop.f32.mrf.mxu2 }
 0x182   : > { %v597_v22 = vadd.f32 %v596_v18, %v568_v16 }
 0x183   : > { %v674_v10 = vmul.f32 %v1248_v2, %v662_v8 }
 0x185   : > { %v682_v13 = vpack.c.bf16 %v674_v10, %v674_v10 }
 0x186   : > { %v652_v15 = vpop.f32.mrf.mxu0 }
 0x187   : > { %v653_v17 = vadd.f32 %v652_v15, %v624_v14  ;;  %712 = vrot.lane.b32.xlu1 %v682_v13, %s991_s9 }
 0x188   : > { %v625_v21 = vpop.f32.mrf.mxu3 }
 0x189   : > { %v663_v20 = vmax.f32 %v653_v17, 0.0  ;;  %v626_v25 = vadd.f32 %v625_v21, %v597_v22 }
 0x18b   : > { %v675_v23 = vmul.f32 %v1248_v2, %v663_v20 }
 0x18d   : > { %v683_v24 = vpack.c.bf16 %v675_v23, %v675_v23 }
 0x18e   : > { %v654_v47 = vpop.f32.mrf.mxu0 }
 0x18f   : > { %v655_v26 = vadd.f32 %v654_v47, %v626_v25  ;;  %714 = vrot.lane.b32.xlu2 %v683_v24, %s991_s9 }
 0x191   : > { %v664_v27 = vmax.f32 %v655_v26, 0.0 }
 0x193   : > { %v676_v28 = vmul.f32 %v1248_v2, %v664_v27 }
 0x195   : > { %v684_v29 = vpack.c.bf16 %v676_v28, %v676_v28 }
 0x197   : > { %716 = vrot.lane.b32.xlu0 %v684_v29, %s991_s9 }
 0x1b9   : > { %v703_v30 = vpop.permute.xlu2 %702 }
 0x1ba   : > { %727 = vst.msk [vmem:[%s1262_s12] sm:$0xf] %vm726_vm2, %v703_v30 }
 0x1bb   : > { %736 = vst.msk [vmem:[%s1262_s12] sm:$0xf] %vm735_vm3, %v990_v19 }
 0x1d1   : > { %v709_v31 = vpop.permute.xlu2 %708 }
 0x1d2   : > { %730 = vst.msk [vmem:[%s1262_s12 + $0xc] sm:$0xf] %vm726_vm2, %v709_v31 }
 0x1d3   : > { %739 = vst.msk [vmem:[%s1262_s12 + $0xc] sm:$0xf] %vm735_vm3, %v990_v19 }
 0x1d9   : > { %v705_v2 = vpop.permute.xlu0 %704 }
 0x1da   : > { %728 = vst.msk [vmem:[%s1262_s12 + $0x4] sm:$0xf] %vm726_vm2, %v705_v2 }
 0x1db   : > { %737 = vst.msk [vmem:[%s1262_s12 + $0x4] sm:$0xf] %vm735_vm3, %v990_v19 }
 0x1e1   : > { %v707_v32 = vpop.permute.xlu1 %706 }
 0x1e2   : > { %729 = vst.msk [vmem:[%s1262_s12 + $0x8] sm:$0xf] %vm726_vm2, %v707_v32 }
 0x1e3   : > { %738 = vst.msk [vmem:[%s1262_s12 + $0x8] sm:$0xf] %vm735_vm3, %v990_v19 }
 0x1e9   : > { %v715_v33 = vpop.permute.xlu2 %714 }
 0x1ea   : > { %733 = vst.msk [vmem:[%s1262_s12 + $0x18] sm:$0xf] %vm726_vm2, %v715_v33 }
 0x1eb   : > { %742 = vst.msk [vmem:[%s1262_s12 + $0x18] sm:$0xf] %vm735_vm3, %v990_v19 }
 0x1f1   : > { %v711_v34 = vpop.permute.xlu0 %710 }
 0x1f2   : > { %731 = vst.msk [vmem:[%s1262_s12 + $0x10] sm:$0xf] %vm726_vm2, %v711_v34 }
 0x1f3   : > { %740 = vst.msk [vmem:[%s1262_s12 + $0x10] sm:$0xf] %vm735_vm3, %v990_v19 }
 0x1f9   : > { %v713_v35 = vpop.permute.xlu1 %712 }
 0x1fa   : > { %732 = vst.msk [vmem:[%s1262_s12 + $0x14] sm:$0xf] %vm726_vm2, %v713_v35 }
 0x1fb   : > { %741 = vst.msk [vmem:[%s1262_s12 + $0x14] sm:$0xf] %vm735_vm3, %v990_v19 }
 0x209   : > { %v717_v36 = vpop.permute.xlu0 %716 }
 0x20a   : > { %734 = vst.msk [vmem:[%s1262_s12 + $0x1c] sm:$0xf] %vm726_vm2, %v717_v36 }
 0x20b   : > { %743 = vst.msk [vmem:[%s1262_s12 + $0x1c] sm:$0xf] %vm735_vm3, %v990_v19 }
 0x20c PF: > { %s14_s15 = sadd.s32 1, %s980_s15  }
 0x20d   : > { %p11_p4 = scmp.ge.s32.totalorder %s14_s15, 4  }
 0x20f   :  { %13 = sbr.rel (!%p11_p4) target bundleno = 1 (0x1), region = 66 }

// kernel: unet3_forward.22
= control target key start
LH: loop header
LB: loop body
LE: loop exit
PB: predicated region body
PF: predicated region fallthrough
CT: control target
= control target key end

     0   :  { %s797_s15 = smov 0   ;;  %s1032_s0 = inlined_call_operand.vmem [shape: bf16[2,32,42], index: 0, kind: input, shape index: {}]   ;;  %s1033_s1 = inlined_call_operand.vmem [shape: bf16[64,288], index: 1, kind: input, shape index: {}]   ;;  %s1034_s2 = inlined_call_operand.vmem [shape: f32[64,1], index: 2, kind: input, shape index: {}]   ;;  %s1035_s3 = inlined_call_operand.vmem [shape: f32[1,24], index: 3, kind: input, shape index: {}]   ;;  %s1036_s4 = inlined_call_operand.vmem [shape: bf16[2,64,42], index: 4, kind: output, shape index: {}]  }
   0x1 LB: > { %s629_s16 = sadd.s32 4294967295, %s760_s15   ;;  %p633_p0 = scmp.ge.s32.totalorder %s760_s15, 1  ;;  %s760_s15 = sphi %s797_s15, %s14_s15  }
   0x2   : > { %p162_p1 = scmp.lt.s32.totalorder %s760_s15, 3 }
   0x4   : > { %p163_p2 = pnand %p633_p0, %p162_p1 }
   0x5   : > { %p188_p3 = scmp.lt.s32.totalorder (!%p163_p2), %s629_s16, 1  ;;  %s762_s21 = smov (!%p163_p2), 126  }
   0x6   : > { %166 = sbr.rel (%p163_p2) target bundleno = 466 (0x1d2), region = 36  ;;  %s763_s22 = smov (!%p163_p2), 122  }
   0x7   : > { %s764_s23 = smov (!%p163_p2), 115   ;;  %s765_s24 = smov (!%p163_p2), 127  }
   0x8   : > { %s766_s25 = smov (!%p163_p2), 114   ;;  %s767_s26 = smov (!%p163_p2), 116  }
   0x9   : > { %s768_s27 = smov (!%p163_p2), 120   ;;  %s769_s28 = smov (!%p163_p2), 121  }
   0xb   : > { %s1038_s16 = smov (!%p188_p3, %s629_s16), 1  ;;  %v770_v12 = vmov 0   ;;  %v279_v13 = vld [vmem:[%s1034_s2] sm:$0xff]  ;;  %v656_v14 = vld [vmem:[%s1033_s1 + $0x8] sm:$0xf]  ;;  %v281_v16 = vld [vmem:[%s1034_s2 + $0x10] sm:$0xff] }
   0xc   : > { %s700_s17 = sshll.u32 %s1038_s16, 4  ;;  %750 = vset.pattern.permute.xlu1 %v770_v12  ;;  %752 = vset.pattern.permute.xlu0 %v770_v12  ;;  %v706_v15 = vld [vmem:[%s1033_s1 + $0x10] sm:$0xf0]  ;;  %vm387_vm0 = vcmask 261120   ;;  %v648_v20 = vld [vmem:[%s1033_s1] sm:$0xf] }
   0xd   : > { %s192_s20 = scalar_lea.vmem %s1032_s0, %s700_s17  ;;  %751 = vset.pattern.permute.xlu2 %v770_v12  ;;  %v657_v19 = vor.u32 %v706_v15, %v656_v14  ;;  %v705_v21 = vld [vmem:[%s1033_s1 + $0x8] sm:$0xf0]  ;;  %v282_v22 = vld [vmem:[%s1034_s2 + $0x18] sm:$0xff]  ;;  %v708_v24 = vld [vmem:[%s1033_s1 + $0x20] sm:$0xf0]  ;;  %vm515_vm1 = vcmask 52224  }
   0xe   : > { %v811_v0 = vld [vmem:[%s192_s20 + $0x8] sm:$0xff]  ;;  %v813_v1 = vld [vmem:[%s192_s20] sm:$0xff]  ;;  %v660_v23 = vld [vmem:[%s1033_s1 + $0x18] sm:$0xf]  ;;  %v649_v26 = vor.u32 %v705_v21, %v648_v20  ;;  %vm556_vm2 = vcmask 248888   ;;  %vm565_vm3 = vcmask 339192  }
   0xf   : > { %223 = vrot.lane.b32.xlu1 %v811_v0, %s762_s21  ;;  %229 = vrot.lane.b32.xlu0 %v811_v0, %s763_s22  ;;  %v661_v27 = vor.u32 %v708_v24, %v660_v23  ;;  %v284_v29 = vld [vmem:[%s1034_s2 + $0x28] sm:$0xff]  ;;  %v668_v31 = vld [vmem:[%s1033_s1 + $0x20] sm:$0xf] }
  0x10   : > { %221 = vrot.lane.b32.xlu2 %v813_v1, %s762_s21  ;;  %v709_v32 = vld [vmem:[%s1033_s1 + $0x28] sm:$0xf0]  ;;  %v707_v34 = vld [vmem:[%s1033_s1 + $0x1c] sm:$0xf]  ;;  %v662_v35 = vld [vmem:[%s1033_s1 + $0x24] sm:$0xf0] }
  0x11   : > { %v669_v33 = vor.u32 %v709_v32, %v668_v31  ;;  %v665_v37 = vor.u32 %v707_v34, %v662_v35  ;;  %v672_v38 = vld [vmem:[%s1033_s1 + $0x30] sm:$0xf]  ;;  %v711_v39 = vld [vmem:[%s1033_s1 + $0x38] sm:$0xf0]  ;;  %v280_v40 = vld [vmem:[%s1034_s2 + $0x8] sm:$0xff] }
  0x12   : > { %v286_v41 = vld [vmem:[%s1034_s2 + $0x38] sm:$0xff]  ;;  %v673_v42 = vor.u32 %v711_v39, %v672_v38  ;;  %v712_v44 = vld [vmem:[%s1033_s1 + $0x40] sm:$0xf0]  ;;  %v710_v47 = vld [vmem:[%s1033_s1 + $0x34] sm:$0xf] }
  0x13   : > { %v680_v43 = vld [vmem:[%s1033_s1 + $0x38] sm:$0xf]  ;;  %v283_v45 = vld [vmem:[%s1034_s2 + $0x20] sm:$0xff]  ;;  %v650_v50 = vld [vmem:[%s1033_s1 + $0xc] sm:$0xf0] }
  0x14   : > { %v681_v46 = vor.u32 %v712_v44, %v680_v43  ;;  %v674_v48 = vld [vmem:[%s1033_s1 + $0x3c] sm:$0xf0]  ;;  %v704_v49 = vld [vmem:[%s1033_s1 + $0x4] sm:$0xf]  ;;  %v684_v53 = vld [vmem:[%s1033_s1 + $0x48] sm:$0xf] }
  0x15   : > { %v677_v51 = vor.u32 %v710_v47, %v674_v48  ;;  %v653_v52 = vor.u32 %v704_v49, %v650_v50  ;;  %v714_v54 = vld [vmem:[%s1033_s1 + $0x50] sm:$0xf0]  ;;  %v692_v57 = vld [vmem:[%s1033_s1 + $0x50] sm:$0xf]  ;;  %v715_v58 = vld [vmem:[%s1033_s1 + $0x58] sm:$0xf0] }
  0x16   : > { %v285_v55 = vld [vmem:[%s1034_s2 + $0x30] sm:$0xff]  ;;  %v685_v56 = vor.u32 %v714_v54, %v684_v53  ;;  %v693_v59 = vor.u32 %v715_v58, %v692_v57  ;;  %v713_v60 = vld [vmem:[%s1033_s1 + $0x4c] sm:$0xf]  ;;  %v686_v61 = vld [vmem:[%s1033_s1 + $0x54] sm:$0xf0] }
  0x17   : > { %253 = vrot.lane.b32.xlu1 %v811_v0, %s764_s23  ;;  %227 = vrot.lane.b32.xlu0 %v813_v1, %s763_s22  ;;  %v689_v62 = vor.u32 %v713_v60, %v686_v61 }
  0x18   : > { %251 = vrot.lane.b32.xlu2 %v813_v1, %s764_s23  ;;  %s771_s23 = smov 7  }
  0x1f   : > { %217 = vrot.lane.b32.xlu1 %v811_v0, %s765_s24  ;;  %259 = vrot.lane.b32.xlu0 %v811_v0, %s766_s25 }
  0x20   : > { %247 = vrot.lane.b32.xlu2 %v811_v0, %s767_s26 }
  0x27   : > { %215 = vrot.lane.b32.xlu1 %v813_v1, %s765_s24  ;;  %257 = vrot.lane.b32.xlu0 %v813_v1, %s766_s25  ;;  %s701_s24 = sshll.u32 %s1038_s16, 5 }
  0x28   : > { %245 = vrot.lane.b32.xlu2 %v813_v1, %s767_s26 }
  0x2f   : > { %241 = vrot.lane.b32.xlu0 %v811_v0, %s768_s27  ;;  %239 = vrot.lane.b32.xlu1 %v813_v1, %s768_s27  ;;  %s949_s27 = scalar_lea.vmem %s1036_s4, %s701_s24 }
  0x30   : > { %235 = vrot.lane.b32.xlu2 %v811_v0, %s769_s28  ;;  %517 = vst.msk [vmem:[%s949_s27 + $0x4] sm:$0xf] %vm515_vm1, %v770_v12 }
  0x31   : > { %516 = vst.msk [vmem:[%s949_s27] sm:$0xf] %vm515_vm1, %v770_v12 }
  0x32   : > { %518 = vst.msk [vmem:[%s949_s27 + $0x8] sm:$0xf] %vm515_vm1, %v770_v12 }
  0x33   : > { %519 = vst.msk [vmem:[%s949_s27 + $0xc] sm:$0xf] %vm515_vm1, %v770_v12 }
  0x34   : > { %520 = vst.msk [vmem:[%s949_s27 + $0x10] sm:$0xf] %vm515_vm1, %v770_v12 }
  0x35   : > { %521 = vst.msk [vmem:[%s949_s27 + $0x14] sm:$0xf] %vm515_vm1, %v770_v12 }
  0x36   : > { %522 = vst.msk [vmem:[%s949_s27 + $0x18] sm:$0xf] %vm515_vm1, %v770_v12 }
  0x37   : > { %233 = vrot.lane.b32.xlu0 %v813_v1, %s769_s28  ;;  %289 = vperm.xlu1 %750, %v279_v13   ;;  %523 = vst.msk [vmem:[%s949_s27 + $0x1c] sm:$0xf] %vm515_vm1, %v770_v12 }
  0x38   : > { %294 = vperm.xlu2 %751, %v280_v40  }
  0x3f   : > { %299 = vperm.xlu0 %752, %v281_v16   ;;  %304 = vperm.xlu1 %750, %v282_v22  }
  0x40   : > { %309 = vperm.xlu2 %751, %v283_v45  }
  0x47   : > { %314 = vperm.xlu1 %750, %v284_v29   ;;  %324 = vperm.xlu0 %752, %v286_v41  }
  0x48   : > { %319 = vperm.xlu2 %751, %v285_v55  }
  0x6a   : > { %v222_v2 = vpop.permute.xlu2 %221 }
  0x72   : > { %v252_v3 = vpop.permute.xlu2 %251 }
  0x7a   : > { %v248_v8 = vpop.permute.xlu2 %247 }
  0x81   : > { %v224_v4 = vpop.permute.xlu1 %223  ;;  %v230_v5 = vpop.permute.xlu0 %229 }
  0x82   : > { %400 = vmatpush.bf16.msra.mxu0 %v230_v5  ;;  %716 = vmatpush.bf16.msra.mxu3 %v230_v5  ;;  %v246_v11 = vpop.permute.xlu2 %245 }
  0x89   : > { %v254_v6 = vpop.permute.xlu1 %253  ;;  %v228_v7 = vpop.permute.xlu0 %227 }
  0x8a   : > { %401 = vmatpush.bf16.msra.mxu0 %v228_v7  ;;  %717 = vmatpush.bf16.msra.mxu3 %v228_v7  ;;  %v236_v30 = vpop.permute.xlu2 %235 }
  0x8b   : > { %724 = vmatpush.bf16.msra.mxu1 %v254_v6 }
  0x8e   : > { %402 = vmatpush.bf16.msra.mxu0 %v224_v4  ;;  %718 = vmatpush.bf16.msra.mxu3 %v224_v4 }
  0x8f   : > { %725 = vmatpush.bf16.msra.mxu1 %v252_v3 }
  0x91   : > { %v218_v9 = vpop.permute.xlu1 %217  ;;  %v260_v10 = vpop.permute.xlu0 %259 }
  0x92   : > { %403 = vmatpush.bf16.msra.mxu0 %v222_v2  ;;  %719 = vmatpush.bf16.msra.mxu3 %v222_v2 }
  0x93   : > { %464 = vmatpush.bf16.msra.mxu2 %v260_v10  ;;  %726 = vmatpush.bf16.msra.mxu1 %v248_v8 }
  0x96   : > { %404 = vmatpush.bf16.msra.mxu0 %v218_v9  ;;  %720 = vmatpush.bf16.msra.mxu3 %v218_v9 }
  0x97   : > { %727 = vmatpush.bf16.msra.mxu1 %v246_v11 }
  0x99   : > { %v216_v17 = vpop.permute.xlu1 %215  ;;  %v258_v18 = vpop.permute.xlu0 %257 }
  0x9a   : > { %405 = vmatpush.bf16.msra.mxu0 %v216_v17  ;;  %721 = vmatpush.bf16.msra.mxu3 %v216_v17  ;;  %v295_v17 = vpop.permute.xlu2 %294 }
  0x9b   : > { %465 = vmatpush.bf16.msra.mxu2 %v258_v18 }
  0x9e   : > { %694 = vmatmul.msk.bf16.vlgmr.msra.gmra.mxu2 %vm387_vm0, %v657_v19  ;;  %406 = vmatpush.bf16.msra.mxu0 %v811_v0 }
  0x9f   : > { %722 = vmatpush.bf16.msra.mxu3 %v811_v0 }
  0xa1   : > { %v242_v25 = vpop.permute.xlu0 %241  ;;  %v240_v28 = vpop.permute.xlu1 %239 }
  0xa2   : > { %407 = vmatpush.bf16.msra.mxu0 %v813_v1  ;;  %728 = vmatpush.bf16.msra.mxu1 %v242_v25 }
  0xa3   : > { %723 = vmatpush.bf16.msra.mxu3 %v813_v1 }
  0xa5   : > { %408 = vmatmul.bf16.vlgmr.msra.gmra.mxu0 %v649_v26 }
  0xa6   : > { %429 = vmatpush.bf16.msrb.mxu0 %v254_v6  ;;  %413 = vmatmul.bf16.vlgmr.msra.gmra.mxu3 %v661_v27 }
  0xa7   : > { %729 = vmatpush.bf16.msra.mxu1 %v240_v28 }
  0xa9   : > { %v234_v36 = vpop.permute.xlu0 %233  ;;  %v290_v9 = vpop.permute.xlu1 %289 }
  0xaa   : > { %430 = vmatpush.bf16.msrb.mxu0 %v252_v3 }
  0xab   : > { %730 = vmatpush.bf16.msra.mxu1 %v236_v30 }
  0xae   : > { %431 = vmatpush.bf16.msrb.mxu0 %v248_v8  ;;  %695 = vmatmul.msk.bf16.gmra.mxu2 %vm387_vm0, %v669_v33 }
  0xaf   : > { %731 = vmatpush.bf16.msra.mxu1 %v234_v36 }
  0xb1   : > { %v300_v0 = vpop.permute.xlu0 %299  ;;  %v305_v21 = vpop.permute.xlu1 %304 }
  0xb2   : > { %432 = vmatpush.bf16.msrb.mxu0 %v246_v11  ;;  %442 = vmatmul.bf16.vlgmr.msra.gmra.mxu1 %v665_v37  ;;  %v941_v11 = vld [vmem:[%s1035_s3] ss:$0 sm:$0xff] }
  0xb6   : > { %433 = vmatpush.bf16.msrb.mxu0 %v242_v25  ;;  %418 = vmatmul.bf16.gmra.mxu3 %v673_v42 }
  0xb9   : > { %v315_v33 = vpop.permute.xlu1 %314 }
  0xba   : > { %434 = vmatpush.bf16.msrb.mxu0 %v240_v28 }
  0xbe   : > { %435 = vmatpush.bf16.msrb.mxu0 %v236_v30  ;;  %696 = vmatmul.msk.bf16.gmra.mxu2 %vm387_vm0, %v681_v46  ;;  %v310_v30 = vpop.permute.xlu2 %309 }
  0xc2   : > { %436 = vmatpush.bf16.msrb.mxu0 %v234_v36  ;;  %447 = vmatmul.bf16.gmra.mxu1 %v677_v51 }
  0xc5   : > { %437 = vmatmul.bf16.vlgmr.msrb.gmra.mxu0 %v653_v52 }
  0xc6   : > { %423 = vmatmul.bf16.gmra.mxu3 %v685_v56  ;;  %v320_v50 = vpop.permute.xlu2 %319 }
  0xce   : > { %697 = vmatmul.msk.bf16.gmra.mxu2 %vm387_vm0, %v693_v59 }
  0xd2   : > { %452 = vmatmul.bf16.gmra.mxu1 %v689_v62 }
 0x121   : > { %v467_v63 = vpop.f32.mrf.mxu2 }
 0x122   : > { %v409_v4 = vpop.f32.mrf.mxu0 }
 0x123   : > { %v410_v22 = vadd.f32 %v409_v4, %v290_v9  ;;  %v325_v4 = vpop.permute.xlu0 %324 }
 0x129   : > { %v414_v1 = vpop.f32.mrf.mxu3  ;;  %v469_v2 = vpop.f32.mrf.mxu2 }
 0x12a   : > { %v415_v3 = vadd.f32 %v414_v1, %v300_v0  ;;  %v411_v16 = vpop.f32.mrf.mxu0 }
 0x12b   : > { %v412_v37 = vadd.f32 %v411_v16, %v295_v17 }
 0x12f   : > { %v443_v5 = vpop.f32.mrf.mxu1 }
 0x130   : > { %v444_v6 = vadd.f32 %v443_v5, %v415_v3 }
 0x131   : > { %v416_v7 = vpop.f32.mrf.mxu3  ;;  %v472_v8 = vpop.f32.mrf.mxu2 }
 0x132   : > { %v473_v10 = vadd.f32 %v472_v8, %v444_v6  ;;  %v417_v24 = vadd.f32 %v416_v7, %v305_v21 }
 0x134   : > { %v489_v13 = vmax.f32 %v473_v10, 0.0 }
 0x136   : > { %v501_v14 = vmul.f32 %v941_v11, %v489_v13 }
 0x137   : > { %v445_v15 = vpop.f32.mrf.mxu1 }
 0x138   : > { %v509_v18 = vpack.c.bf16 %v501_v14, %v501_v14  ;;  %v446_v27 = vadd.f32 %v445_v15, %v417_v24 }
 0x139   : > { %v419_v19 = vpop.f32.mrf.mxu3  ;;  %v474_v20 = vpop.f32.mrf.mxu2 }
 0x13a   : > { %536 = vrot.lane.b32.xlu0 %v509_v18, %s771_s23  ;;  %v420_v32 = vadd.f32 %v419_v19, %v310_v30  ;;  %v475_v35 = vadd.f32 %v474_v20, %v446_v27 }
 0x13c   : > { %v490_v45 = vmax.f32 %v475_v35, 0.0 }
 0x13e   : > { %v502_v54 = vmul.f32 %v941_v11, %v490_v45 }
 0x13f   : > { %v448_v23 = vpop.f32.mrf.mxu1 }
 0x140   : > { %v449_v42 = vadd.f32 %v448_v23, %v420_v32 }
 0x141   : > { %v421_v28 = vpop.f32.mrf.mxu3  ;;  %v477_v29 = vpop.f32.mrf.mxu2 }
 0x142   : > { %v438_v25 = vpop.f32.mrf.mxu0  ;;  %v422_v36 = vadd.f32 %v421_v28, %v315_v33  ;;  %v478_v51 = vadd.f32 %v477_v29, %v449_v42 }
 0x143   : > { %v439_v26 = vadd.f32 %v438_v25, %v410_v22 }
 0x144   : > { %v491_v60 = vmax.f32 %v478_v51, 0.0 }
 0x145   : > { %v468_v31 = vadd.f32 %v467_v63, %v439_v26  ;;  %v510_v63 = vpack.c.bf16 %v502_v54, %v502_v54 }
 0x146   : > { %v503_v3 = vmul.f32 %v941_v11, %v491_v60 }
 0x147   : > { %v487_v34 = vmax.f32 %v468_v31, 0.0  ;;  %v450_v38 = vpop.f32.mrf.mxu1 }
 0x148   : > { %v451_v40 = vadd.f32 %v450_v38, %v422_v36  ;;  %v511_v10 = vpack.c.bf16 %v503_v3, %v503_v3 }
 0x149   : > { %v499_v39 = vmul.f32 %v941_v11, %v487_v34  ;;  %v424_v46 = vpop.f32.mrf.mxu3  ;;  %v479_v47 = vpop.f32.mrf.mxu2 }
 0x14a   : > { %v440_v41 = vpop.f32.mrf.mxu0  ;;  %v480_v49 = vadd.f32 %v479_v47, %v451_v40  ;;  %v425_v55 = vadd.f32 %v424_v46, %v320_v50 }
 0x14b   : > { %v441_v43 = vadd.f32 %v440_v41, %v412_v37  ;;  %v507_v44 = vpack.c.bf16 %v499_v39, %v499_v39 }
 0x14c   : > { %v492_v53 = vmax.f32 %v480_v49, 0.0 }
 0x14d   : > { %v470_v48 = vadd.f32 %v469_v2, %v441_v43  ;;  %532 = vrot.lane.b32.xlu1 %v507_v44, %s771_s23 }
 0x14e   : > { %v504_v56 = vmul.f32 %v941_v11, %v492_v53 }
 0x14f   : > { %v488_v52 = vmax.f32 %v470_v48, 0.0  ;;  %v453_v57 = vpop.f32.mrf.mxu1 }
 0x150   : > { %v454_v59 = vadd.f32 %v453_v57, %v425_v55  ;;  %v512_v61 = vpack.c.bf16 %v504_v56, %v504_v56 }
 0x151   : > { %v500_v58 = vmul.f32 %v941_v11, %v488_v52  ;;  %v482_v0 = vpop.f32.mrf.mxu2  ;;  %v426_v1 = vpop.f32.mrf.mxu3 }
 0x152   : > { %v483_v2 = vadd.f32 %v482_v0, %v454_v59  ;;  %542 = vrot.lane.b32.xlu0 %v512_v61, %s771_s23  ;;  %v427_v6 = vadd.f32 %v426_v1, %v325_v4 }
 0x153   : > { %v508_v62 = vpack.c.bf16 %v500_v58, %v500_v58 }
 0x154   : > { %v493_v5 = vmax.f32 %v483_v2, 0.0 }
 0x155   : > { %534 = vrot.lane.b32.xlu2 %v508_v62, %s771_s23  ;;  %538 = vrot.lane.b32.xlu1 %v510_v63, %s771_s23 }
 0x156   : > { %v505_v7 = vmul.f32 %v941_v11, %v493_v5 }
 0x157   : > { %v455_v8 = vpop.f32.mrf.mxu1 }
 0x158   : > { %v456_v9 = vadd.f32 %v455_v8, %v427_v6  ;;  %v513_v13 = vpack.c.bf16 %v505_v7, %v505_v7 }
 0x159   : > { %v484_v14 = vpop.f32.mrf.mxu2 }
 0x15a   : > { %v485_v15 = vadd.f32 %v484_v14, %v456_v9 }
 0x15c   : > { %v494_v16 = vmax.f32 %v485_v15, 0.0 }
 0x15d   : > { %540 = vrot.lane.b32.xlu2 %v511_v10, %s771_s23  ;;  %544 = vrot.lane.b32.xlu1 %v513_v13, %s771_s23 }
 0x15e   : > { %v506_v17 = vmul.f32 %v941_v11, %v494_v16 }
 0x160   : > { %v514_v18 = vpack.c.bf16 %v506_v17, %v506_v17 }
 0x165   : > { %546 = vrot.lane.b32.xlu2 %v514_v18, %s771_s23 }
 0x1ac   : > { %v537_v20 = vpop.permute.xlu0 %536 }
 0x1ad   : > { %559 = vst.msk [vmem:[%s949_s27 + $0x8] sm:$0xf] %vm556_vm2, %v537_v20 }
 0x1ae   : > { %568 = vst.msk [vmem:[%s949_s27 + $0x8] sm:$0xf] %vm565_vm3, %v770_v12 }
 0x1af   : > { %v535_v19 = vpop.permute.xlu2 %534 }
 0x1b0   : > { %558 = vst.msk [vmem:[%s949_s27 + $0x4] sm:$0xf] %vm556_vm2, %v535_v19 }
 0x1b1   : > { %567 = vst.msk [vmem:[%s949_s27 + $0x4] sm:$0xf] %vm565_vm3, %v770_v12 }
 0x1b7   : > { %v541_v11 = vpop.permute.xlu2 %540 }
 0x1b8   : > { %561 = vst.msk [vmem:[%s949_s27 + $0x10] sm:$0xf] %vm556_vm2, %v541_v11 }
 0x1b9   : > { %570 = vst.msk [vmem:[%s949_s27 + $0x10] sm:$0xf] %vm565_vm3, %v770_v12 }
 0x1bf   : > { %v533_v21 = vpop.permute.xlu1 %532  ;;  %v547_v22 = vpop.permute.xlu2 %546 }
 0x1c0   : > { %557 = vst.msk [vmem:[%s949_s27] sm:$0xf] %vm556_vm2, %v533_v21 }
 0x1c1   : > { %566 = vst.msk [vmem:[%s949_s27] sm:$0xf] %vm565_vm3, %v770_v12 }
 0x1c2   : > { %564 = vst.msk [vmem:[%s949_s27 + $0x1c] sm:$0xf] %vm556_vm2, %v547_v22 }
 0x1c3   : > { %573 = vst.msk [vmem:[%s949_s27 + $0x1c] sm:$0xf] %vm565_vm3, %v770_v12 }
 0x1c4   : > { %v543_v23 = vpop.permute.xlu0 %542 }
 0x1c5   : > { %562 = vst.msk [vmem:[%s949_s27 + $0x14] sm:$0xf] %vm556_vm2, %v543_v23 }
 0x1c6   : > { %571 = vst.msk [vmem:[%s949_s27 + $0x14] sm:$0xf] %vm565_vm3, %v770_v12 }
 0x1c7   : > { %v539_v24 = vpop.permute.xlu1 %538 }
 0x1c8   : > { %560 = vst.msk [vmem:[%s949_s27 + $0xc] sm:$0xf] %vm556_vm2, %v539_v24 }
 0x1c9   : > { %569 = vst.msk [vmem:[%s949_s27 + $0xc] sm:$0xf] %vm565_vm3, %v770_v12 }
 0x1cf   : > { %v545_v25 = vpop.permute.xlu1 %544 }
 0x1d0   : > { %563 = vst.msk [vmem:[%s949_s27 + $0x18] sm:$0xf] %vm556_vm2, %v545_v25 }
 0x1d1   : > { %572 = vst.msk [vmem:[%s949_s27 + $0x18] sm:$0xf] %vm565_vm3, %v770_v12 }
 0x1d2 PF: > { %s14_s15 = sadd.s32 1, %s760_s15  }
 0x1d3   : > { %p11_p4 = scmp.ge.s32.totalorder %s14_s15, 4  }
 0x1d5   :  { %13 = sbr.rel (!%p11_p4) target bundleno = 1 (0x1), region = 66 }

// kernel: unet3_forward.25
= control target key start
LH: loop header
LB: loop body
LE: loop exit
PB: predicated region body
PF: predicated region fallthrough
CT: control target
= control target key end

     0   :  { %s998_s18 = smov 0   ;;  %s1224_s0 = inlined_call_operand.vmem [shape: bf16[2,64,110], index: 0, kind: input, shape index: {}]   ;;  %s1225_s1 = inlined_call_operand.vmem [shape: bf16[2,32,110], index: 1, kind: input, shape index: {}]   ;;  %s1226_s2 = inlined_call_operand.vmem [shape: bf16[32,864], index: 2, kind: input, shape index: {}]   ;;  %s1227_s3 = inlined_call_operand.vmem [shape: f32[32,1], index: 3, kind: input, shape index: {}]   ;;  %s1228_s4 = inlined_call_operand.vmem [shape: f32[1,80], index: 4, kind: input, shape index: {}]   ;;  %s1229_s5 = inlined_call_operand.vmem [shape: bf16[2,32,110], index: 5, kind: output, shape index: {}]  }
   0x1 LB: > { %s802_s19 = sadd.s32 4294967295, %s956_s18   ;;  %p806_p0 = scmp.ge.s32.totalorder %s956_s18, 1  ;;  %s956_s18 = sphi %s998_s18, %s15_s18  }
   0x2   : > { %p197_p1 = scmp.lt.s32.totalorder %s956_s18, 3 }
   0x4   : > { %p198_p2 = pnand %p806_p0, %p197_p1 }
   0x5   : > { %p230_p3 = scmp.lt.s32.totalorder (!%p198_p2), %s802_s19, 1  ;;  %s958_s28 = smov (!%p198_p2), 118  }
   0x6   : > { %201 = sbr.rel (%p198_p2) target bundleno = 523 (0x20b), region = 40  ;;  %s959_s29 = smov (!%p198_p2), 126  }
   0x7   : > { %s960_s30 = smov (!%p198_p2), 116   ;;  %s961_s6 = smov (!%p198_p2), 127  }
   0x8   : > { %s962_s7 = smov (!%p198_p2), 117   ;;  %s963_s8 = smov (!%p198_p2), 107  }
   0x9   : > { %s964_s9 = smov (!%p198_p2), 106   ;;  %s965_s10 = smov (!%p198_p2), 108  }
   0xa   : > { %s967_s12 = smov (!%p198_p2), 11  }
   0xb   : > { %s1231_s19 = smov (!%p230_p3, %s802_s19), 1  ;;  %v847_v27 = vld [vmem:[%s1226_s2 + $0x8] sm:$0xf]  ;;  %v910_v28 = vld [vmem:[%s1226_s2 + $0x20] sm:$0xf0]  ;;  %v966_v51 = vmov 0  }
   0xc   : > { %s898_s20 = sshll.u32 %s1231_s19, 4  ;;  %s897_s21 = sshll.u32 %s1231_s19, 5  ;;  %v848_v29 = vor.u32 %v910_v28, %v847_v27  ;;  %v906_v33 = vld [vmem:[%s1226_s2 + $0x4] sm:$0xf]  ;;  %v841_v34 = vld [vmem:[%s1226_s2 + $0x1c] sm:$0xf0]  ;;  %947 = vset.pattern.permute.xlu1 %v966_v51  ;;  %946 = vset.pattern.permute.xlu0 %v966_v51 }
   0xd   : > { %s239_s24 = scalar_lea.vmem %s1225_s1, %s898_s20  ;;  %s234_s27 = scalar_lea.vmem %s1224_s0, %s897_s21  ;;  %v844_v37 = vor.u32 %v906_v33, %v841_v34  ;;  %v875_v39 = vld [vmem:[%s1226_s2 + $0x40] sm:$0xf]  ;;  %v917_v40 = vld [vmem:[%s1226_s2 + $0x58] sm:$0xf0]  ;;  %v907_v47 = vld [vmem:[%s1226_s2 + $0xc] sm:$0xf]  ;;  %948 = vset.pattern.permute.xlu2 %v966_v51 }
   0xe   : > { %v1018_v0 = vld [vmem:[%s239_s24 + $0x8] sm:$0xff]  ;;  %v1020_v1 = vld [vmem:[%s239_s24] sm:$0xff]  ;;  %v1022_v2 = vld [vmem:[%s234_s27 + $0x18] sm:$0xff]  ;;  %v876_v43 = vor.u32 %v917_v40, %v875_v39  ;;  %vm548_vm0 = vcmask 785408   ;;  %s1196_s11 = scalar_lea.vmem %s1229_s5, %s898_s20  ;;  %vm704_vm1 = vcmask 84992   ;;  %vm725_vm2 = vcmask 740440  }
   0xf   : > { %344 = vrot.lane.b32.xlu0 %v1018_v0, %s958_s28  ;;  %342 = vrot.lane.b32.xlu1 %v1020_v1, %s958_s28  ;;  %v1027_v3 = vld [vmem:[%s234_s27 + $0x10] sm:$0xff]  ;;  %v1029_v4 = vld [vmem:[%s234_s27 + $0x8] sm:$0xff]  ;;  %vm730_vm3 = vcmask 896728  }
  0x10   : > { %336 = vrot.lane.b32.xlu2 %v1022_v2, %s958_s28  ;;  %v1034_v5 = vld [vmem:[%s234_s27] sm:$0xff]  ;;  %v909_v42 = vld [vmem:[%s1226_s2 + $0x18] sm:$0xf0]  ;;  %v849_v48 = vld [vmem:[%s1226_s2 + $0x24] sm:$0xf0] }
  0x11   : > { %v839_v41 = vld [vmem:[%s1226_s2] sm:$0xf]  ;;  %v455_v52 = vld [vmem:[%s1227_s3 + $0x8] sm:$0xff]  ;;  %v852_v53 = vor.u32 %v907_v47, %v849_v48  ;;  %v913_v54 = vld [vmem:[%s1226_s2 + $0x3c] sm:$0xf] }
  0x12   : > { %v840_v46 = vor.u32 %v909_v42, %v839_v41  ;;  %v454_v50 = vld [vmem:[%s1227_s3] sm:$0xff]  ;;  %v869_v55 = vld [vmem:[%s1226_s2 + $0x54] sm:$0xf0]  ;;  %v916_v61 = vld [vmem:[%s1226_s2 + $0x50] sm:$0xf0] }
  0x13   : > { %v872_v58 = vor.u32 %v913_v54, %v869_v55  ;;  %v867_v60 = vld [vmem:[%s1226_s2 + $0x38] sm:$0xf]  ;;  %v883_v27 = vld [vmem:[%s1226_s2 + $0x48] sm:$0xf]  ;;  %v918_v28 = vld [vmem:[%s1226_s2 + $0x60] sm:$0xf0] }
  0x14   : > { %v915_v34 = vld [vmem:[%s1226_s2 + $0x4c] sm:$0xf]  ;;  %705 = vst.msk [vmem:[%s1196_s11] sm:$0xf] %vm704_vm1, %v966_v51 }
  0x15   : > { %706 = vst.msk [vmem:[%s1196_s11 + $0x4] sm:$0xf] %vm704_vm1, %v966_v51 }
  0x16   : > { %707 = vst.msk [vmem:[%s1196_s11 + $0x8] sm:$0xf] %vm704_vm1, %v966_v51 }
  0x17   : > { %318 = vrot.lane.b32.xlu0 %v1022_v2, %s959_s29  ;;  %316 = vrot.lane.b32.xlu1 %v1027_v3, %s959_s29  ;;  %708 = vst.msk [vmem:[%s1196_s11 + $0xc] sm:$0xf] %vm704_vm1, %v966_v51 }
  0x18   : > { %314 = vrot.lane.b32.xlu2 %v1029_v4, %s959_s29 }
  0x1f   : > { %334 = vrot.lane.b32.xlu0 %v1027_v3, %s958_s28  ;;  %368 = vrot.lane.b32.xlu1 %v1029_v4, %s960_s30 }
  0x20   : > { %312 = vrot.lane.b32.xlu2 %v1034_v5, %s959_s29 }
  0x27   : > { %332 = vrot.lane.b32.xlu0 %v1029_v4, %s958_s28  ;;  %366 = vrot.lane.b32.xlu1 %v1034_v5, %s960_s30 }
  0x28   : > { %296 = vrot.lane.b32.xlu2 %v1029_v4, %s961_s6 }
  0x2f   : > { %308 = vrot.lane.b32.xlu0 %v1018_v0, %s961_s6  ;;  %330 = vrot.lane.b32.xlu1 %v1034_v5, %s958_s28 }
  0x30   : > { %362 = vrot.lane.b32.xlu2 %v1018_v0, %s962_s7 }
  0x37   : > { %294 = vrot.lane.b32.xlu0 %v1034_v5, %s961_s6  ;;  %306 = vrot.lane.b32.xlu1 %v1020_v1, %s961_s6 }
  0x38   : > { %326 = vrot.lane.b32.xlu2 %v1018_v0, %s959_s29 }
  0x3f   : > { %360 = vrot.lane.b32.xlu0 %v1020_v1, %s962_s7  ;;  %300 = vrot.lane.b32.xlu1 %v1022_v2, %s961_s6 }
  0x40   : > { %324 = vrot.lane.b32.xlu2 %v1020_v1, %s959_s29 }
  0x47   : > { %354 = vrot.lane.b32.xlu0 %v1022_v2, %s962_s7  ;;  %298 = vrot.lane.b32.xlu1 %v1027_v3, %s961_s6 }
  0x48   : > { %352 = vrot.lane.b32.xlu2 %v1027_v3, %s962_s7 }
  0x4f   : > { %350 = vrot.lane.b32.xlu0 %v1029_v4, %s962_s7  ;;  %416 = vrot.lane.b32.xlu1 %v1018_v0, %s963_s8 }
  0x50   : > { %348 = vrot.lane.b32.xlu2 %v1034_v5, %s962_s7 }
  0x57   : > { %414 = vrot.lane.b32.xlu0 %v1020_v1, %s963_s8  ;;  %430 = vrot.lane.b32.xlu1 %v1018_v0, %s964_s9 }
  0x58   : > { %390 = vrot.lane.b32.xlu2 %v1022_v2, %s965_s10 }
  0x5f   : > { %408 = vrot.lane.b32.xlu0 %v1022_v2, %s963_s8  ;;  %428 = vrot.lane.b32.xlu1 %v1020_v1, %s964_s9 }
  0x60   : > { %388 = vrot.lane.b32.xlu2 %v1027_v3, %s965_s10 }
  0x67   : > { %406 = vrot.lane.b32.xlu0 %v1027_v3, %s963_s8  ;;  %426 = vrot.lane.b32.xlu1 %v1022_v2, %s964_s9 }
  0x68   : > { %386 = vrot.lane.b32.xlu2 %v1029_v4, %s965_s10 }
  0x6a   : > { %v337_v6 = vpop.permute.xlu2 %336 }
  0x6f   : > { %404 = vrot.lane.b32.xlu0 %v1029_v4, %s963_s8  ;;  %424 = vrot.lane.b32.xlu1 %v1027_v3, %s964_s9 }
  0x70   : > { %384 = vrot.lane.b32.xlu2 %v1034_v5, %s965_s10 }
  0x72   : > { %v315_v7 = vpop.permute.xlu2 %314 }
  0x77   : > { %402 = vrot.lane.b32.xlu0 %v1034_v5, %s963_s8  ;;  %422 = vrot.lane.b32.xlu1 %v1029_v4, %s964_s9 }
  0x78   : > { %380 = vrot.lane.b32.xlu2 %v1018_v0, %s960_s30 }
  0x7a   : > { %v313_v8 = vpop.permute.xlu2 %312 }
  0x7f   : > { %398 = vrot.lane.b32.xlu0 %v1018_v0, %s965_s10  ;;  %420 = vrot.lane.b32.xlu1 %v1034_v5, %s964_s9 }
  0x80   : > { %378 = vrot.lane.b32.xlu2 %v1020_v1, %s960_s30 }
  0x81   : > { %v345_v9 = vpop.permute.xlu0 %344  ;;  %v343_v10 = vpop.permute.xlu1 %342 }
  0x82   : > { %593 = vmatpush.bf16.msra.mxu2 %v345_v9  ;;  %v297_v11 = vpop.permute.xlu2 %296 }
  0x83   : > { %555 = vmatpush.bf16.msra.mxu0 %v297_v11 }
  0x86   : > { %594 = vmatpush.bf16.msra.mxu2 %v343_v10 }
  0x87   : > { %396 = vrot.lane.b32.xlu0 %v1020_v1, %s965_s10  ;;  %372 = vrot.lane.b32.xlu1 %v1022_v2, %s960_s30 }
  0x88   : > { %370 = vrot.lane.b32.xlu2 %v1027_v3, %s960_s30 }
  0x89   : > { %v319_v12 = vpop.permute.xlu0 %318  ;;  %v317_v13 = vpop.permute.xlu1 %316 }
  0x8a   : > { %574 = vmatpush.bf16.msra.mxu1 %v319_v12  ;;  %595 = vmatpush.bf16.msra.mxu2 %v337_v6  ;;  %v363_v14 = vpop.permute.xlu2 %362 }
  0x8e   : > { %575 = vmatpush.bf16.msra.mxu1 %v317_v13  ;;  %v863_v13 = vld [vmem:[%s1226_s2 + $0x18] sm:$0xf] }
  0x8f   : > { %460 = vperm.xlu0 %946, %v454_v50   ;;  %465 = vperm.xlu1 %947, %v455_v52  }
  0x91   : > { %v335_v15 = vpop.permute.xlu0 %334  ;;  %v369_v16 = vpop.permute.xlu1 %368 }
  0x92   : > { %576 = vmatpush.bf16.msra.mxu1 %v315_v7  ;;  %596 = vmatpush.bf16.msra.mxu2 %v335_v15  ;;  %v327_v17 = vpop.permute.xlu2 %326  ;;  %v456_v15 = vld [vmem:[%s1227_s3 + $0x10] sm:$0xff] }
  0x93   : > { %612 = vmatpush.bf16.msra.mxu3 %v369_v16  ;;  %470 = vperm.xlu2 %948, %v456_v15  }
  0x96   : > { %577 = vmatpush.bf16.msra.mxu1 %v313_v8 }
  0x99   : > { %v333_v18 = vpop.permute.xlu0 %332  ;;  %v367_v19 = vpop.permute.xlu1 %366 }
  0x9a   : > { %597 = vmatpush.bf16.msra.mxu2 %v333_v18  ;;  %613 = vmatpush.bf16.msra.mxu3 %v367_v19  ;;  %v325_v20 = vpop.permute.xlu2 %324  ;;  %v908_v19 = vld [vmem:[%s1226_s2 + $0x14] sm:$0xf] }
  0x9e   : > { %614 = vmatpush.bf16.msra.mxu3 %v363_v14  ;;  %v912_v14 = vld [vmem:[%s1226_s2 + $0x30] sm:$0xf0] }
  0x9f   : > { %v864_v18 = vor.u32 %v912_v14, %v863_v13 }
  0xa1   : > { %v309_v21 = vpop.permute.xlu0 %308  ;;  %v331_v22 = vpop.permute.xlu1 %330 }
  0xa2   : > { %578 = vmatpush.bf16.msra.mxu1 %v309_v21  ;;  %598 = vmatpush.bf16.msra.mxu2 %v331_v22  ;;  %v353_v23 = vpop.permute.xlu2 %352 }
  0xa6   : > { %599 = vmatpush.bf16.msra.mxu2 %v327_v17 }
  0xa9   : > { %v295_v24 = vpop.permute.xlu0 %294  ;;  %v307_v25 = vpop.permute.xlu1 %306 }
  0xaa   : > { %556 = vmatpush.bf16.msra.mxu0 %v295_v24  ;;  %579 = vmatpush.bf16.msra.mxu1 %v307_v25  ;;  %v349_v26 = vpop.permute.xlu2 %348  ;;  %v855_v24 = vld [vmem:[%s1226_s2 + $0x10] sm:$0xf]  ;;  %v911_v25 = vld [vmem:[%s1226_s2 + $0x28] sm:$0xf0] }
  0xab   : > { %600 = vmatpush.bf16.msra.mxu2 %v325_v20  ;;  %v857_v20 = vld [vmem:[%s1226_s2 + $0x2c] sm:$0xf0] }
  0xae   : > { %557 = vmatpush.bf16.msra.mxu0 %v1018_v0  ;;  %601 = vmatmul.bf16.vlgmr.msra.gmra.mxu2 %v848_v29  ;;  %v868_v0 = vor.u32 %v916_v61, %v867_v60  ;;  %v856_v29 = vor.u32 %v911_v25, %v855_v24 }
  0xb1   : > { %v361_v30 = vpop.permute.xlu0 %360  ;;  %v301_v31 = vpop.permute.xlu1 %300 }
  0xb2   : > { %615 = vmatpush.bf16.msra.mxu3 %v361_v30  ;;  %580 = vmatpush.bf16.msra.mxu1 %v301_v31  ;;  %v391_v32 = vpop.permute.xlu2 %390  ;;  %v884_v30 = vor.u32 %v918_v28, %v883_v27  ;;  %v891_v31 = vld [vmem:[%s1226_s2 + $0x50] sm:$0xf] }
  0xb3   : > { %558 = vmatpush.bf16.msra.mxu0 %v1020_v1  ;;  %v914_v1 = vld [vmem:[%s1226_s2 + $0x44] sm:$0xf] }
  0xb7   : > { %559 = vmatpush.bf16.msra.mxu0 %v1022_v2  ;;  %v877_v2 = vld [vmem:[%s1226_s2 + $0x5c] sm:$0xf0] }
  0xb9   : > { %v355_v35 = vpop.permute.xlu0 %354  ;;  %v299_v36 = vpop.permute.xlu1 %298 }
  0xba   : > { %616 = vmatpush.bf16.msra.mxu3 %v355_v35  ;;  %581 = vmatpush.bf16.msra.mxu1 %v299_v36  ;;  %v389_v38 = vpop.permute.xlu2 %388  ;;  %v885_v35 = vld [vmem:[%s1226_s2 + $0x64] sm:$0xf0] }
  0xbb   : > { %560 = vmatpush.bf16.msra.mxu0 %v1027_v3  ;;  %v888_v36 = vor.u32 %v915_v34, %v885_v35 }
  0xbd   : > { %582 = vmatmul.bf16.vlgmr.msra.gmra.mxu1 %v844_v37 }
  0xbe   : > { %617 = vmatpush.bf16.msra.mxu3 %v353_v23  ;;  %606 = vmatmul.bf16.gmra.mxu2 %v876_v43  ;;  %v860_v23 = vor.u32 %v908_v19, %v857_v20 }
  0xbf   : > { %561 = vmatpush.bf16.msra.mxu0 %v1029_v4  ;;  %v880_v4 = vor.u32 %v914_v1, %v877_v2 }
  0xc1   : > { %v351_v44 = vpop.permute.xlu0 %350  ;;  %v417_v45 = vpop.permute.xlu1 %416 }
  0xc2   : > { %618 = vmatpush.bf16.msra.mxu3 %v351_v44  ;;  %650 = vmatpush.bf16.msrb.mxu1 %v417_v45  ;;  %v387_v49 = vpop.permute.xlu2 %386 }
  0xc3   : > { %562 = vmatpush.bf16.msra.mxu0 %v1034_v5  ;;  %v457_v5 = vld [vmem:[%s1227_s3 + $0x18] sm:$0xff] }
  0xc4   : > { %475 = vperm.xlu1 %947, %v457_v5  }
  0xc6   : > { %619 = vmatpush.bf16.msra.mxu3 %v349_v26  ;;  %563 = vmatmul.bf16.vlgmr.msra.gmra.mxu0 %v840_v46 }
  0xc7   : > { %631 = vmatpush.bf16.msrb.mxu0 %v391_v32 }
  0xc9   : > { %v415_v56 = vpop.permute.xlu0 %414  ;;  %v431_v57 = vpop.permute.xlu1 %430  ;;  %620 = vmatmul.bf16.vlgmr.msra.gmra.mxu3 %v852_v53 }
  0xca   : > { %920 = vmatpush.bf16.msrb.mxu3 %v391_v32  ;;  %651 = vmatpush.bf16.msrb.mxu1 %v415_v56  ;;  %v385_v59 = vpop.permute.xlu2 %384  ;;  %v919_v32 = vld [vmem:[%s1226_s2 + $0x68] sm:$0xf0] }
  0xcb   : > { %632 = vmatpush.bf16.msrb.mxu0 %v389_v38  ;;  %671 = vmatpush.bf16.msrb.mxu2 %v431_v57  ;;  %v892_v33 = vor.u32 %v919_v32, %v891_v31 }
  0xcd   : > { %587 = vmatmul.bf16.gmra.mxu1 %v872_v58 }
  0xce   : > { %921 = vmatpush.bf16.msrb.mxu3 %v389_v38 }
  0xcf   : > { %633 = vmatpush.bf16.msrb.mxu0 %v387_v49 }
  0xd1   : > { %v409_v62 = vpop.permute.xlu0 %408  ;;  %v429_v63 = vpop.permute.xlu1 %428 }
  0xd2   : > { %922 = vmatpush.bf16.msrb.mxu3 %v387_v49  ;;  %652 = vmatpush.bf16.msrb.mxu1 %v409_v62  ;;  %v381_v3 = vpop.permute.xlu2 %380 }
  0xd3   : > { %634 = vmatpush.bf16.msrb.mxu0 %v385_v59  ;;  %672 = vmatpush.bf16.msrb.mxu2 %v429_v63 }
  0xd6   : > { %923 = vmatpush.bf16.msrb.mxu3 %v385_v59  ;;  %568 = vmatmul.bf16.gmra.mxu0 %v868_v0 }
  0xd7   : > { %635 = vmatpush.bf16.msrb.mxu0 %v381_v3 }
  0xd9   : > { %v407_v6 = vpop.permute.xlu0 %406  ;;  %v427_v7 = vpop.permute.xlu1 %426  ;;  %625 = vmatmul.bf16.gmra.mxu3 %v880_v4 }
  0xda   : > { %924 = vmatpush.bf16.msrb.mxu3 %v381_v3  ;;  %653 = vmatpush.bf16.msrb.mxu1 %v407_v6  ;;  %v379_v8 = vpop.permute.xlu2 %378 }
  0xdb   : > { %673 = vmatpush.bf16.msrb.mxu2 %v427_v7  ;;  %636 = vmatpush.bf16.msrb.mxu0 %v379_v8 }
  0xde   : > { %925 = vmatpush.bf16.msrb.mxu3 %v379_v8 }
  0xe1   : > { %v405_v9 = vpop.permute.xlu0 %404  ;;  %v425_v10 = vpop.permute.xlu1 %424 }
  0xe2   : > { %654 = vmatpush.bf16.msrb.mxu1 %v405_v9  ;;  %674 = vmatpush.bf16.msrb.mxu2 %v425_v10  ;;  %v371_v26 = vpop.permute.xlu2 %370 }
  0xe9   : > { %v403_v11 = vpop.permute.xlu0 %402  ;;  %v423_v12 = vpop.permute.xlu1 %422 }
  0xea   : > { %655 = vmatpush.bf16.msrb.mxu1 %v403_v11  ;;  %675 = vmatpush.bf16.msrb.mxu2 %v423_v12  ;;  %v949_v11 = vld [vmem:[%s1228_s4] ss:$0 sm:$0xff] }
  0xed   : > { %v471_v59 = vpop.permute.xlu2 %470 }
  0xf1   : > { %v399_v16 = vpop.permute.xlu0 %398  ;;  %v421_v17 = vpop.permute.xlu1 %420 }
  0xf2   : > { %656 = vmatpush.bf16.msrb.mxu1 %v399_v16  ;;  %676 = vmatpush.bf16.msrb.mxu2 %v421_v17 }
  0xf5   : > { %893 = vmatmul.msk.bf16.vlgmr.msrb.gmra.mxu2 %vm548_vm0, %v864_v18 }
  0xf9   : > { %v397_v21 = vpop.permute.xlu0 %396  ;;  %v373_v22 = vpop.permute.xlu1 %372 }
  0xfa   : > { %637 = vmatpush.bf16.msrb.mxu0 %v373_v22  ;;  %926 = vmatpush.bf16.msrb.mxu3 %v373_v22 }
  0xfb   : > { %657 = vmatpush.bf16.msrb.mxu1 %v397_v21 }
  0xfe   : > { %658 = vmatmul.bf16.vlgmr.msrb.gmra.mxu1 %v860_v23  ;;  %638 = vmatpush.bf16.msrb.mxu0 %v371_v26 }
  0xff   : > { %927 = vmatpush.bf16.msrb.mxu3 %v371_v26 }
 0x101   : > { %639 = vmatmul.bf16.vlgmr.msrb.gmra.mxu0 %v856_v29  ;;  %v461_v48 = vpop.permute.xlu0 %460  ;;  %v466_v55 = vpop.permute.xlu1 %465 }
 0x102   : > { %644 = vmatmul.bf16.vlgmr.msrb.gmra.mxu3 %v884_v30 }
 0x105   : > { %894 = vmatmul.msk.bf16.gmra.mxu2 %vm548_vm0, %v892_v33 }
 0x10e   : > { %663 = vmatmul.bf16.gmra.mxu1 %v888_v36 }
 0x131   : > { %v602_v37 = vpop.f32.mrf.mxu2 }
 0x136   : > { %v476_v6 = vpop.permute.xlu1 %475 }
 0x139   : > { %v604_v40 = vpop.f32.mrf.mxu2 }
 0x13a   : > { %v583_v38 = vpop.f32.mrf.mxu1 }
 0x141   : > { %v607_v44 = vpop.f32.mrf.mxu2 }
 0x142   : > { %v585_v42 = vpop.f32.mrf.mxu1 }
 0x143   : > { %v564_v39 = vpop.f32.mrf.mxu0 }
 0x144   : > { %v565_v50 = vadd.f32 %v564_v39, %v461_v48 }
 0x146   : > { %v584_v54 = vadd.f32 %v583_v38, %v565_v50 }
 0x148   : > { %v603_v60 = vadd.f32 %v602_v37, %v584_v54 }
 0x149   : > { %v609_v49 = vpop.f32.mrf.mxu2 }
 0x14a   : > { %v588_v46 = vpop.f32.mrf.mxu1 }
 0x14b   : > { %v566_v43 = vpop.f32.mrf.mxu0 }
 0x14c   : > { %v621_v41 = vpop.f32.mrf.mxu3  ;;  %v567_v58 = vadd.f32 %v566_v43, %v466_v55 }
 0x14d   : > { %v622_v1 = vadd.f32 %v621_v41, %v603_v60 }
 0x14e   : > { %v586_v63 = vadd.f32 %v585_v42, %v567_v58 }
 0x150   : > { %v605_v5 = vadd.f32 %v604_v40, %v586_v63 }
 0x152   : > { %v590_v53 = vpop.f32.mrf.mxu1 }
 0x153   : > { %v569_v47 = vpop.f32.mrf.mxu0 }
 0x154   : > { %v623_v45 = vpop.f32.mrf.mxu3  ;;  %v570_v62 = vadd.f32 %v569_v47, %v471_v59 }
 0x155   : > { %v624_v14 = vadd.f32 %v623_v45, %v605_v5 }
 0x156   : > { %v589_v4 = vadd.f32 %v588_v46, %v570_v62 }
 0x158   : > { %v608_v13 = vadd.f32 %v607_v44, %v589_v4 }
 0x15b   : > { %v571_v56 = vpop.f32.mrf.mxu0 }
 0x15c   : > { %v626_v52 = vpop.f32.mrf.mxu3  ;;  %v572_v12 = vadd.f32 %v571_v56, %v476_v6 }
 0x15d   : > { %v627_v21 = vadd.f32 %v626_v52, %v608_v13 }
 0x15e   : > { %v591_v20 = vadd.f32 %v590_v53, %v572_v12 }
 0x160   : > { %v610_v28 = vadd.f32 %v609_v49, %v591_v20 }
 0x164   : > { %v628_v0 = vpop.f32.mrf.mxu3 }
 0x165   : > { %v629_v34 = vadd.f32 %v628_v0, %v610_v28 }
 0x178   : > { %v678_v57 = vpop.f32.mrf.mxu2 }
 0x17b   : > { %v659_v61 = vpop.f32.mrf.mxu1 }
 0x17e   : > { %v640_v2 = vpop.f32.mrf.mxu0 }
 0x17f   : > { %v641_v3 = vadd.f32 %v640_v2, %v622_v1 }
 0x180   : > { %v680_v8 = vpop.f32.mrf.mxu2 }
 0x181   : > { %v660_v7 = vadd.f32 %v659_v61, %v641_v3 }
 0x183   : > { %v679_v9 = vadd.f32 %v678_v57, %v660_v7  ;;  %v661_v10 = vpop.f32.mrf.mxu1 }
 0x185   : > { %v688_v15 = vmax.f32 %v679_v9, 0.0  ;;  %v645_v16 = vpop.f32.mrf.mxu3 }
 0x186   : > { %v642_v17 = vpop.f32.mrf.mxu0  ;;  %v646_v24 = vadd.f32 %v645_v16, %v627_v21 }
 0x187   : > { %v643_v18 = vadd.f32 %v642_v17, %v624_v14  ;;  %v696_v19 = vmul.f32 %v949_v11, %v688_v15 }
 0x188   : > { %v683_v26 = vpop.f32.mrf.mxu2 }
 0x189   : > { %v662_v22 = vadd.f32 %v661_v10, %v643_v18  ;;  %v700_v23 = vpack.c.bf16 %v696_v19, %v696_v19 }
 0x18b   : > { %v681_v25 = vadd.f32 %v680_v8, %v662_v22  ;;  %v664_v27 = vpop.f32.mrf.mxu1  ;;  %713 = vrot.lane.b32.xlu2 %v700_v23, %s967_s12 }
 0x18c   : > { %v665_v29 = vadd.f32 %v664_v27, %v646_v24 }
 0x18d   : > { %v689_v30 = vmax.f32 %v681_v25, 0.0  ;;  %v647_v32 = vpop.f32.mrf.mxu3 }
 0x18e   : > { %v684_v31 = vadd.f32 %v683_v26, %v665_v29  ;;  %v648_v37 = vadd.f32 %v647_v32, %v629_v34 }
 0x18f   : > { %v697_v33 = vmul.f32 %v949_v11, %v689_v30 }
 0x190   : > { %v690_v35 = vmax.f32 %v684_v31, 0.0  ;;  %v685_v42 = vpop.f32.mrf.mxu2 }
 0x191   : > { %v701_v36 = vpack.c.bf16 %v697_v33, %v697_v33 }
 0x192   : > { %v698_v38 = vmul.f32 %v949_v11, %v690_v35 }
 0x193   : > { %v666_v39 = vpop.f32.mrf.mxu1  ;;  %715 = vrot.lane.b32.xlu0 %v701_v36, %s967_s12 }
 0x194   : > { %v667_v40 = vadd.f32 %v666_v39, %v648_v37  ;;  %v702_v41 = vpack.c.bf16 %v698_v38, %v698_v38 }
 0x196   : > { %v686_v43 = vadd.f32 %v685_v42, %v667_v40  ;;  %717 = vrot.lane.b32.xlu1 %v702_v41, %s967_s12 }
 0x198   : > { %v691_v44 = vmax.f32 %v686_v43, 0.0 }
 0x19a   : > { %v699_v45 = vmul.f32 %v949_v11, %v691_v44 }
 0x19c   : > { %v703_v46 = vpack.c.bf16 %v699_v45, %v699_v45 }
 0x19e   : > { %719 = vrot.lane.b32.xlu2 %v703_v46, %s967_s12 }
 0x1e5   : > { %v714_v47 = vpop.permute.xlu2 %713 }
 0x1e6   : > { %726 = vst.msk [vmem:[%s1196_s11] sm:$0xf] %vm725_vm2, %v714_v47 }
 0x1e7   : > { %731 = vst.msk [vmem:[%s1196_s11] sm:$0xf] %vm730_vm3, %v966_v51 }
 0x1f8   : > { %v720_v48 = vpop.permute.xlu2 %719 }
 0x1f9   : > { %729 = vst.msk [vmem:[%s1196_s11 + $0xc] sm:$0xf] %vm725_vm2, %v720_v48 }
 0x1fa   : > { %734 = vst.msk [vmem:[%s1196_s11 + $0xc] sm:$0xf] %vm730_vm3, %v966_v51 }
 0x205   : > { %v716_v49 = vpop.permute.xlu0 %715 }
 0x206   : > { %727 = vst.msk [vmem:[%s1196_s11 + $0x4] sm:$0xf] %vm725_vm2, %v716_v49 }
 0x207   : > { %732 = vst.msk [vmem:[%s1196_s11 + $0x4] sm:$0xf] %vm730_vm3, %v966_v51 }
 0x208   : > { %v718_v50 = vpop.permute.xlu1 %717 }
 0x209   : > { %728 = vst.msk [vmem:[%s1196_s11 + $0x8] sm:$0xf] %vm725_vm2, %v718_v50 }
 0x20a   : > { %733 = vst.msk [vmem:[%s1196_s11 + $0x8] sm:$0xf] %vm730_vm3, %v966_v51 }
 0x20b PF: > { %s15_s18 = sadd.s32 1, %s956_s18  }
 0x20c   : > { %p12_p4 = scmp.ge.s32.totalorder %s15_s18, 4  }
 0x20e   :  { %14 = sbr.rel (!%p12_p4) target bundleno = 1 (0x1), region = 73 }

// kernel: unet3_forward.31
= control target key start
LH: loop header
LB: loop body
LE: loop exit
PB: predicated region body
PF: predicated region fallthrough
CT: control target
= control target key end

     0   :  { %s760_s20 = smov 0   ;;  %s850_s0 = inlined_call_operand.vmem [shape: bf16[2,16,342], index: 0, kind: input, shape index: {}]   ;;  %s851_s1 = inlined_call_operand.vmem [shape: bf16[16,144], index: 1, kind: input, shape index: {}]   ;;  %s852_s2 = inlined_call_operand.vmem [shape: f32[16,1], index: 2, kind: input, shape index: {}]   ;;  %s853_s3 = inlined_call_operand.vmem [shape: bf16[1,16], index: 3, kind: input, shape index: {}]   ;;  %s854_s4 = inlined_call_operand.<no memory space> [shape: f32[1,1], index: 4, kind: input, shape index: {}]   ;;  %s855_s5 = inlined_call_operand.vmem [shape: f32[2,1,288], index: 5, kind: output, shape index: {}]  }
   0x1   :  { %v10_v0 = vstv %s854_s4 }
   0x2   :  { %11 = vst [vmem:[#allocation2] sm:$0x1] %v10_v0 }
   0x3 LB: > { %s637_s21 = sadd.s32 4294967295, %s716_s20   ;;  %p641_p0 = scmp.ge.s32.totalorder %s716_s20, 1  ;;  %s716_s20 = sphi %s760_s20, %s17_s20  }
   0x4   : > { %p189_p1 = scmp.lt.s32.totalorder %s716_s20, 3 }
   0x6   : > { %p190_p2 = pnand %p641_p0, %p189_p1 }
   0x7   : > { %p216_p3 = scmp.lt.s32.totalorder (!%p190_p2), %s637_s21, 1  ;;  %s718_s25 = smov (!%p190_p2), 91  }
   0x8   : > { %193 = sbr.rel (%p190_p2) target bundleno = 516 (0x204), region = 40  ;;  %s719_s26 = smov (!%p190_p2), 92  }
   0x9   : > { %s720_s27 = smov (!%p190_p2), 108   ;;  %s721_s28 = smov (!%p190_p2), 90  }
   0xa   : > { %s722_s29 = smov (!%p190_p2), 109   ;;  %s723_s30 = smov (!%p190_p2), 110  }
   0xb   : > { %s724_s6 = smov (!%p190_p2), 126   ;;  %s725_s7 = smov (!%p190_p2), 127  }
   0xd   : > { %s859_s21 = smov (!%p216_p3, %s637_s21), 1  ;;  %vm324_vm0 = vcmask 744448   ;;  %vm312_vm1 = vcmask 752640   ;;  %vm300_vm2 = vcmask 883712   ;;  %vm336_vm3 = vcmask 736256   ;;  %v344_v39 = vld [vmem:[%s852_s2] sm:$0xff] }
   0xe   : > { %s676_s4 = smul.u32 24, %s859_s21  ;;  %v674_v25 = vld [vmem:[%s851_s1 + $0x4] sm:$0xf]  ;;  %v659_v26 = vld [vmem:[%s851_s1 + $0x8] sm:$0xf0]  ;;  %vm288_vm4 = vcmask 891904  }
   0xf   : > { %v662_v32 = vor.u32 %v674_v25, %v659_v26  ;;  %vm365_vm5 = vcmask 130048   ;;  %v345_v40 = vld [vmem:[%s852_s2 + $0x8] sm:$0xff]  ;;  %v726_v41 = vmov 0   ;;  %vm276_vm6 = vcmask 900096   ;;  %v657_v56 = vld [vmem:[%s851_s1] sm:$0xf] }
  0x10   : > { %s220_s24 = scalar_lea.vmem %s850_s0, %s676_s4  ;;  %695 = vset.pattern.permute.xlu0 %v726_v41  ;;  %696 = vset.pattern.permute.xlu1 %v726_v41  ;;  %vm264_vm7 = vcmask 1031168   ;;  %vm252_vm8 = vcmask 1039360   ;;  %v675_v57 = vld [vmem:[%s851_s1 + $0x4] sm:$0xf0]  ;;  %v463_v63 = vld [vmem:[#allocation2] sm:$0x1] }
  0x11   : > { %v645_v1 = vld [vmem:[%s220_s24] sm:$0xf]  ;;  %v672_v2 = vld [vmem:[%s220_s24 + $0x8] sm:$0xf0]  ;;  %v671_v3 = vld [vmem:[%s220_s24 + $0x4] sm:$0xf]  ;;  %697 = vset.pattern.permute.xlu2 %v726_v41  ;;  %v658_v58 = vor.u32 %v675_v57, %v657_v56 }
  0x12   : > { %v774_v4 = vor.u32 %v672_v2, %v645_v1  ;;  %v647_v5 = vld [vmem:[%s220_s24 + $0xc] sm:$0xf0]  ;;  %v653_v6 = vld [vmem:[%s220_s24 + $0x8] sm:$0xf]  ;;  %v673_v7 = vld [vmem:[%s220_s24 + $0x10] sm:$0xf0] }
  0x13   : > { %v776_v8 = vor.u32 %v671_v3, %v647_v5  ;;  %v778_v9 = vor.u32 %v673_v7, %v653_v6  ;;  %vm574_vm11 = vcmask 1040384   ;;  %s677_s23 = smul.u32 3, %s859_s21 }
  0x14   : > { %318 = vrot.lane.b32.xlu1 %v774_v4, %s718_s25 }
  0x15   : > { %320 = vrot.lane.b32.xlu0 %v776_v8, %s718_s25  ;;  %310 = vrot.lane.b32.xlu2 %v778_v9, %s719_s26 }
  0x1c   : > { %308 = vrot.lane.b32.xlu1 %v776_v8, %s719_s26 }
  0x1d   : > { %322 = vrot.lane.b32.xlu0 %v778_v9, %s718_s25  ;;  %306 = vrot.lane.b32.xlu2 %v774_v4, %s719_s26  ;;  %s224_s26 = scalar_lea.vmem %s855_s5, %s677_s23 }
  0x24   : > { %298 = vrot.lane.b32.xlu1 %v778_v9, %s720_s27 }
  0x25   : > { %296 = vrot.lane.b32.xlu0 %v776_v8, %s720_s27  ;;  %332 = vrot.lane.b32.xlu2 %v776_v8, %s721_s28 }
  0x2c   : > { %294 = vrot.lane.b32.xlu1 %v774_v4, %s720_s27 }
  0x2d   : > { %334 = vrot.lane.b32.xlu0 %v778_v9, %s721_s28  ;;  %284 = vrot.lane.b32.xlu2 %v776_v8, %s722_s29 }
  0x34   : > { %330 = vrot.lane.b32.xlu1 %v774_v4, %s721_s28 }
  0x35   : > { %286 = vrot.lane.b32.xlu0 %v778_v9, %s722_s29  ;;  %282 = vrot.lane.b32.xlu2 %v774_v4, %s722_s29 }
  0x3c   : > { %274 = vrot.lane.b32.xlu1 %v778_v9, %s723_s30 }
  0x3d   : > { %272 = vrot.lane.b32.xlu0 %v776_v8, %s723_s30  ;;  %270 = vrot.lane.b32.xlu2 %v774_v4, %s723_s30 }
  0x44   : > { %262 = vrot.lane.b32.xlu1 %v778_v9, %s724_s6 }
  0x45   : > { %260 = vrot.lane.b32.xlu0 %v776_v8, %s724_s6  ;;  %258 = vrot.lane.b32.xlu2 %v774_v4, %s724_s6 }
  0x4c   : > { %250 = vrot.lane.b32.xlu1 %v778_v9, %s725_s7 }
  0x4d   : > { %248 = vrot.lane.b32.xlu0 %v776_v8, %s725_s7  ;;  %246 = vrot.lane.b32.xlu2 %v774_v4, %s725_s7 }
  0x54   : > { %353 = vperm.xlu1 %696, %v345_v40  }
  0x55   : > { %348 = vperm.xlu0 %695, %v344_v39   ;;  %466 = vperm.xlu2 %697, %v463_v63  }
  0x6f   : > { %v311_v10 = vpop.permute.xlu2 %310 }
  0x77   : > { %v307_v11 = vpop.permute.xlu2 %306 }
  0x7f   : > { %v333_v15 = vpop.permute.xlu2 %332 }
  0x86   : > { %v319_v12 = vpop.permute.xlu1 %318 }
  0x87   : > { %v321_v13 = vpop.permute.xlu0 %320  ;;  %v285_v22 = vpop.permute.xlu2 %284 }
  0x88   : > { %v325_v14 = vsel %vm324_vm0, %v319_v12, %v321_v13 }
  0x89   : > { %369 = vmatpush.bf16.msra.mxu0 %v325_v14 }
  0x8e   : > { %v309_v16 = vpop.permute.xlu1 %308 }
  0x8f   : > { %v323_v17 = vpop.permute.xlu0 %322  ;;  %v313_v18 = vsel %vm312_vm1, %v307_v11, %v309_v16  ;;  %v314_v20 = vsel %vm312_vm1, %v309_v16, %v311_v10  ;;  %v283_v30 = vpop.permute.xlu2 %282 }
  0x90   : > { %370 = vmatpush.bf16.msra.mxu0 %v313_v18  ;;  %v326_v19 = vsel %vm324_vm0, %v321_v13, %v323_v17  ;;  %v289_v33 = vsel %vm288_vm4, %v283_v30, %v285_v22 }
  0x91   : > { %397 = vmatpush.bf16.msra.mxu2 %v326_v19 }
  0x95   : > { %398 = vmatpush.bf16.msra.mxu2 %v314_v20 }
  0x96   : > { %v299_v21 = vpop.permute.xlu1 %298 }
  0x97   : > { %v297_v23 = vpop.permute.xlu0 %296  ;;  %v271_v38 = vpop.permute.xlu2 %270 }
  0x98   : > { %v302_v24 = vsel %vm300_vm2, %v297_v23, %v299_v21 }
  0x99   : > { %399 = vmatpush.bf16.msra.mxu2 %v302_v24 }
  0x9e   : > { %v295_v27 = vpop.permute.xlu1 %294 }
  0x9f   : > { %v335_v28 = vpop.permute.xlu0 %334  ;;  %v301_v29 = vsel %vm300_vm2, %v295_v27, %v297_v23  ;;  %v259_v46 = vpop.permute.xlu2 %258 }
  0xa0   : > { %371 = vmatpush.bf16.msra.mxu0 %v301_v29  ;;  %v338_v31 = vsel %vm336_vm3, %v333_v15, %v335_v28 }
  0xa1   : > { %418 = vmatpush.bf16.msra.mxu3 %v338_v31 }
  0xa4   : > { %372 = vmatpush.bf16.msra.mxu0 %v289_v33  ;;  %664 = vmatmul.msk.bf16.vlgmr.msra.gmra.mxu3 %vm365_vm5, %v662_v32 }
  0xa5   : > { %446 = vmatpush.bf16.msrb.mxu3 %v335_v28  ;;  %v459_v28 = vld [vmem:[%s853_s3] sm:$0x1] }
  0xa6   : > { %v331_v34 = vpop.permute.xlu1 %330 }
  0xa7   : > { %v287_v35 = vpop.permute.xlu0 %286  ;;  %v337_v36 = vsel %vm336_vm3, %v331_v34, %v333_v15  ;;  %v247_v51 = vpop.permute.xlu2 %246 }
  0xa8   : > { %390 = vmatpush.bf16.msra.mxu1 %v337_v36  ;;  %v290_v37 = vsel %vm288_vm4, %v285_v22, %v287_v35 }
  0xa9   : > { %400 = vmatpush.bf16.msra.mxu2 %v290_v37 }
  0xab   : > { %663 = vmatmul.msk.bf16.vlgmr.msra.gmra.mxu1 %vm365_vm5, %v662_v32 }
  0xac   : > { %425 = vmatpush.bf16.msrb.mxu1 %v323_v17 }
  0xae   : > { %v275_v42 = vpop.permute.xlu1 %274 }
  0xaf   : > { %v273_v43 = vpop.permute.xlu0 %272 }
  0xb0   : > { %426 = vmatpush.bf16.msrb.mxu1 %v311_v10  ;;  %v277_v44 = vsel %vm276_vm6, %v271_v38, %v273_v43  ;;  %v278_v45 = vsel %vm276_vm6, %v273_v43, %v275_v42  ;;  %vm576_vm6 = vcmask 1041408  }
  0xb1   : > { %373 = vmatpush.bf16.msra.mxu0 %v277_v44  ;;  %401 = vmatpush.bf16.msra.mxu2 %v278_v45 }
  0xb4   : > { %427 = vmatpush.bf16.msrb.mxu1 %v299_v21  ;;  %665 = vmatmul.msk.bf16.vlgmr.msrb.gmra.mxu3 %vm365_vm5, %v662_v32  ;;  %v467_v32 = vpop.permute.xlu2 %466 }
  0xb5   : > { %v469_v33 = vperm.slane %v467_v32, 0 }
  0xb6   : > { %v263_v47 = vpop.permute.xlu1 %262 }
  0xb7   : > { %v261_v48 = vpop.permute.xlu0 %260 }
  0xb8   : > { %428 = vmatpush.bf16.msrb.mxu1 %v287_v35  ;;  %v265_v49 = vsel %vm264_vm7, %v259_v46, %v261_v48  ;;  %v266_v50 = vsel %vm264_vm7, %v261_v48, %v263_v47 }
  0xb9   : > { %374 = vmatpush.bf16.msra.mxu0 %v265_v49  ;;  %402 = vmatpush.bf16.msra.mxu2 %v266_v50 }
  0xbc   : > { %429 = vmatpush.bf16.msrb.mxu1 %v275_v42 }
  0xbe   : > { %v251_v52 = vpop.permute.xlu1 %250 }
  0xbf   : > { %v249_v53 = vpop.permute.xlu0 %248 }
  0xc0   : > { %430 = vmatpush.bf16.msrb.mxu1 %v263_v47  ;;  %v253_v54 = vsel %vm252_vm8, %v247_v51, %v249_v53  ;;  %v254_v55 = vsel %vm252_vm8, %v249_v53, %v251_v52 }
  0xc1   : > { %375 = vmatpush.bf16.msra.mxu0 %v253_v54  ;;  %403 = vmatpush.bf16.msra.mxu2 %v254_v55 }
  0xc4   : > { %431 = vmatpush.bf16.msrb.mxu1 %v251_v52 }
  0xc5   : > { %376 = vmatpush.bf16.msra.mxu0 %v774_v4  ;;  %404 = vmatpush.bf16.msra.mxu2 %v776_v8 }
  0xc6   : > { %v354_v7 = vpop.permute.xlu1 %353 }
  0xc7   : > { %v349_v3 = vpop.permute.xlu0 %348 }
  0xc8   : > { %432 = vmatpush.bf16.msrb.mxu1 %v778_v9  ;;  %377 = vmatmul.bf16.vlgmr.msra.gmra.mxu0 %v658_v58 }
  0xc9   : > { %405 = vmatmul.bf16.vlgmr.msra.gmra.mxu2 %v658_v58 }
  0xcb   : > { %433 = vmatmul.bf16.vlgmr.msrb.gmra.mxu1 %v658_v58 }
 0x127   : > { %v420_v59 = vpop.f32.mrf.mxu3 }
 0x128   : > { %v392_v60 = vpop.f32.mrf.mxu1 }
 0x12f   : > { %v422_v61 = vpop.f32.mrf.mxu3 }
 0x130   : > { %v394_v62 = vpop.f32.mrf.mxu1 }
 0x137   : > { %v448_v1 = vpop.f32.mrf.mxu3 }
 0x13f   : > { %v450_v14 = vpop.f32.mrf.mxu3 }
 0x145   : > { %v378_v0 = vpop.f32.mrf.mxu0 }
 0x146   : > { %v379_v5 = vadd.f32 %v378_v0, %v349_v3 }
 0x148   : > { %v434_v2 = vpop.f32.mrf.mxu1  ;;  %v393_v10 = vadd.f32 %v392_v60, %v379_v5 }
 0x149   : > { %v435_v6 = vadd.f32 %v434_v2, %v349_v3 }
 0x14a   : > { %v453_v18 = vmax.f32 %v393_v10, 0.0 }
 0x14b   : > { %v449_v12 = vadd.f32 %v448_v1, %v435_v6 }
 0x14c   : > { %v406_v4 = vpop.f32.mrf.mxu2 }
 0x14d   : > { %v380_v8 = vpop.f32.mrf.mxu0  ;;  %v407_v15 = vadd.f32 %v406_v4, %v349_v3  ;;  %v455_v20 = vmax.f32 %v449_v12, 0.0 }
 0x14e   : > { %v381_v9 = vadd.f32 %v380_v8, %v354_v7 }
 0x14f   : > { %v421_v23 = vadd.f32 %v420_v59, %v407_v15  ;;  %v579_v15 = vlaneseq }
 0x150   : > { %v436_v11 = vpop.f32.mrf.mxu1  ;;  %v395_v16 = vadd.f32 %v394_v62, %v381_v9 }
 0x151   : > { %v437_v13 = vadd.f32 %v436_v11, %v354_v7  ;;  %v454_v29 = vmax.f32 %v421_v23, 0.0  ;;  %vm581_vm7 = vcmp.lt.s32.totalorder %v579_v15, 288 }
 0x152   : > { %v456_v19 = vmax.f32 %v395_v16, 0.0 }
 0x153   : > { %v451_v17 = vadd.f32 %v450_v14, %v437_v13 }
 0x154   : > { %v408_v22 = vpop.f32.mrf.mxu2  ;;  %v460_v24 = vpack.c.bf16 %v456_v19, %v453_v18 }
 0x155   : > { %v458_v21 = vmax.f32 %v451_v17, 0.0  ;;  %v409_v25 = vadd.f32 %v408_v22, %v354_v7 }
 0x156   : > { %480 = vmatpush.bf16.msra.mxu3 %v460_v24 }
 0x157   : > { %v462_v26 = vpack.c.bf16 %v458_v21, %v455_v20  ;;  %v423_v27 = vadd.f32 %v422_v61, %v409_v25 }
 0x159   : > { %506 = vmatpush.bf16.msrb.mxu2 %v462_v26  ;;  %v457_v30 = vmax.f32 %v423_v27, 0.0  ;;  %666 = vmatmul.msk.bf16.vlgmr.msra.gmra.mxu3 %vm365_vm5, %v459_v28 }
 0x15b   : > { %v461_v31 = vpack.c.bf16 %v457_v30, %v454_v29 }
 0x15c   : > { %668 = vmatmul.msk.bf16.vlgmr.msrb.gmra.mxu2 %vm365_vm5, %v459_v28 }
 0x15d   : > { %493 = vmatpush.bf16.msrb.mxu0 %v461_v31 }
 0x160   : > { %667 = vmatmul.msk.bf16.vlgmr.msrb.gmra.mxu0 %vm365_vm5, %v459_v28 }
 0x1dc   : > { %v482_v34 = vpop.f32.mrf.mxu3 }
 0x1dd   : > { %v495_v35 = vpop.f32.mrf.mxu0  ;;  %v483_v36 = vadd.f32 %v482_v34, %v469_v33 }
 0x1de   : > { %v496_v37 = vadd.f32 %v495_v35, %v469_v33 }
 0x1df   : > { %v508_v38 = vpop.f32.mrf.mxu2  ;;  %v512_v40 = vsub.f32 0.0, %v483_v36 }
 0x1e0   : > { %v509_v39 = vadd.f32 %v508_v38, %v469_v33  ;;  %v513_v41 = vsub.f32 0.0, %v496_v37 }
 0x1e1   : > { %v515_v43 = vmul.f32 1.442695, %v512_v40 }
 0x1e2   : > { %v514_v42 = vsub.f32 0.0, %v509_v39  ;;  %v517_v44 = vmul.f32 1.442695, %v513_v41 }
 0x1e3   : > { %698 = vpow2.f32 %v515_v43 }
 0x1e4   : > { %v519_v45 = vmul.f32 1.442695, %v514_v42  ;;  %700 = vpow2.f32 %v517_v44  ;;  %v484_v47 = vpop.f32.mrf.mxu3 }
 0x1e5   : > { %v497_v46 = vpop.f32.mrf.mxu0 }
 0x1e6   : > { %702 = vpow2.f32 %v519_v45 }
 0x1e7   : > { %v510_v48 = vpop.f32.mrf.mxu2 }
 0x1e9   : > { %v699_v49 = vpop.eup %698 }
 0x1ea   : > { %v701_v50 = vpop.eup %700  ;;  %v521_v51 = vadd.f32 1.0, %v699_v49 }
 0x1eb   : > { %v522_v53 = vadd.f32 1.0, %v701_v50 }
 0x1ec   : > { %v703_v52 = vpop.eup %702  ;;  %704 = vrcp.f32 %v521_v51  ;;  %vm529_vm12 = vweird.f32 %v521_v51  ;;  %v535_v5 = vand.u32 2147483648, %v521_v51  ;;  %v533_v7 = vand.u32 2147483647, %v521_v51 }
 0x1ed   : > { %706 = vrcp.f32 %v522_v53  ;;  %v523_v54 = vadd.f32 1.0, %v703_v52  ;;  %v550_v63 = vand.u32 2147483648, %v522_v53  ;;  %v548_v2 = vand.u32 2147483647, %v522_v53 }
 0x1ee   : > { %vm544_vm14 = vweird.f32 %v522_v53  ;;  %v536_v16 = vor.u32 1.1754944e-38, %v535_v5  ;;  %vm534_vm3 = vcmp.eq.f32.partialorder %v533_v7, 8.507059e+37 }
 0x1ef   : > { %708 = vrcp.f32 %v523_v54  ;;  %v565_v10 = vand.u32 2147483648, %v523_v54  ;;  %v551_v9 = vor.u32 1.1754944e-38, %v550_v63  ;;  %v563_v12 = vand.u32 2147483647, %v523_v54 }
 0x1f0   : > { %vm549_vm1 = vcmp.eq.f32.partialorder %v548_v2, 8.507059e+37  ;;  %vm559_vm2 = vweird.f32 %v523_v54 }
 0x1f1   : > { %v566_v20 = vor.u32 1.1754944e-38, %v565_v10  ;;  %vm564_vm5 = vcmp.eq.f32.partialorder %v563_v12, 8.507059e+37 }
 0x1f2   : > { %v705_v55 = vpop.eup %704 }
 0x1f3   : > { %v707_v56 = vpop.eup %706  ;;  %v525_v57 = vmul.f32 %v705_v55, %v521_v51  ;;  %vm530_vm9 = vweird.f32 %v705_v55 }
 0x1f4   : > { %v540_v58 = vmul.f32 %v707_v56, %v522_v53  ;;  %vm545_vm10 = vweird.f32 %v707_v56  ;;  %vm836_vm13 = vmor %vm529_vm12, %vm530_vm9 }
 0x1f5   : > { %v526_v59 = vsub.f32 1.0, %v525_v57  ;;  %v709_v60 = vpop.eup %708  ;;  %vm546_vm15 = vmor %vm544_vm14, %vm545_vm10 }
 0x1f6   : > { %v541_v61 = vsub.f32 1.0, %v540_v58  ;;  %v555_v0 = vmul.f32 %v709_v60, %v523_v54  ;;  %vm560_vm0 = vweird.f32 %v709_v60 }
 0x1f7   : > { %v527_v62 = vmul.f32 %v705_v55, %v526_v59  ;;  %vm561_vm4 = vmor %vm559_vm2, %vm560_vm0 }
 0x1f8   : > { %v542_v1 = vmul.f32 %v707_v56, %v541_v61  ;;  %v556_v6 = vsub.f32 1.0, %v555_v0 }
 0x1f9   : > { %v528_v3 = vadd.f32 %v705_v55, %v527_v62 }
 0x1fa   : > { %v543_v8 = vadd.f32 %v707_v56, %v542_v1  ;;  %v557_v11 = vmul.f32 %v709_v60, %v556_v6 }
 0x1fb   : > { %v532_v13 = vsel %vm836_vm13, %v705_v55, %v528_v3 }
 0x1fc   : > { %v547_v14 = vsel %vm546_vm15, %v707_v56, %v543_v8  ;;  %v558_v18 = vadd.f32 %v709_v60, %v557_v11  ;;  %v537_v21 = vsel %vm534_vm3, %v536_v16, %v532_v13 }
 0x1fd   : > { %v552_v17 = vsel %vm549_vm1, %v551_v9, %v547_v14 }
 0x1fe   : > { %v572_v19 = vrot.slane %v552_v17, 7  ;;  %v562_v22 = vsel %vm561_vm4, %v709_v60, %v558_v18 }
 0x1ff   : > { %v567_v24 = vsel %vm564_vm5, %v566_v20, %v562_v22 }
 0x200   : > { %v575_v23 = vsel %vm574_vm11, %v537_v21, %v572_v19  ;;  %v573_v25 = vrot.slane %v567_v24, 6 }
 0x202   : > { %v577_v26 = vsel %vm576_vm6, %v575_v23, %v573_v25 }
 0x203   : > { %583 = vst.msk [vmem:[%s224_s26] sm:$0x7] %vm581_vm7, %v577_v26 }
 0x204 PF: > { %s17_s20 = sadd.s32 1, %s716_s20  }
 0x205   : > { %p14_p4 = scmp.ge.s32.totalorder %s17_s20, 4  }
 0x207   :  { %16 = sbr.rel (!%p14_p4) target bundleno = 3 (0x3), region = 70 }

// kernel: unet3_forward.28
= control target key start
LH: loop header
LB: loop body
LE: loop exit
PB: predicated region body
PF: predicated region fallthrough
CT: control target
= control target key end

     0   :  { %s1061_s18 = smov 0   ;;  %s1550_s0 = inlined_call_operand.vmem [shape: bf16[2,32,342], index: 0, kind: input, shape index: {}]   ;;  %s1551_s1 = inlined_call_operand.vmem [shape: bf16[2,16,342], index: 1, kind: input, shape index: {}]   ;;  %s1552_s2 = inlined_call_operand.vmem [shape: bf16[16,432], index: 2, kind: input, shape index: {}]   ;;  %s1553_s3 = inlined_call_operand.vmem [shape: f32[16,1], index: 3, kind: input, shape index: {}]   ;;  %s1554_s4 = inlined_call_operand.vmem [shape: f32[1,288], index: 4, kind: input, shape index: {}]   ;;  %s1555_s5 = inlined_call_operand.vmem [shape: bf16[2,16,342], index: 5, kind: output, shape index: {}]  }
   0x1 LB: > { %s913_s19 = sadd.s32 4294967295, %s1019_s18   ;;  %p917_p0 = scmp.ge.s32.totalorder %s1019_s18, 1  ;;  %s1019_s18 = sphi %s1061_s18, %s15_s18  }
   0x2   : > { %p197_p1 = scmp.lt.s32.totalorder %s1019_s18, 3 }
   0x4   : > { %p198_p2 = pnand %p917_p0, %p197_p1 }
   0x5   : > { %p230_p3 = scmp.lt.s32.totalorder (!%p198_p2), %s913_s19, 1  ;;  %s1021_s28 = smov (!%p198_p2), 91  }
   0x6   : > { %201 = sbr.rel (%p198_p2) target bundleno = 617 (0x269), region = 40  ;;  %s1022_s29 = smov (!%p198_p2), 126  }
   0x7   : > { %s1023_s30 = smov (!%p198_p2), 108   ;;  %s1024_s6 = smov (!%p198_p2), 92  }
   0x8   : > { %s1025_s7 = smov (!%p198_p2), 109   ;;  %s1026_s8 = smov (!%p198_p2), 127  }
   0x9   : > { %s1027_s9 = smov (!%p198_p2), 90   ;;  %s1028_s10 = smov (!%p198_p2), 110  }
   0xa   : > { %s1030_s14 = smov (!%p198_p2), 19  }
   0xb   : > { %s1557_s19 = smov (!%p230_p3, %s913_s19), 1  ;;  %vm352_vm0 = vcmask 1031168   ;;  %vm522_vm1 = vcmask 744448   ;;  %vm454_vm2 = vcmask 883712   ;;  %vm488_vm3 = vcmask 752640  }
   0xc   : > { %s992_s20 = smul.u32 24, %s1557_s19  ;;  %vm420_vm4 = vcmask 891904   ;;  %vm318_vm5 = vcmask 1039360   ;;  %vm562_vm6 = vcmask 736256   ;;  %vm386_vm7 = vcmask 900096  }
   0xd   : > { %s991_s21 = smul.u32 48, %s1557_s19  ;;  %vm613_vm8 = vcmask 392192   ;;  %vm809_vm9 = vcmask 150528   ;;  %vm835_vm10 = vcmask 1043608   ;;  %vm836_vm11 = vcmask 1047556  }
   0xe   : > { %s1078_s24 = scalar_lea.vmem %s1551_s1, %s992_s20  ;;  %s1525_s13 = scalar_lea.vmem %s1555_s5, %s992_s20  ;;  %vm826_vm12 = vcmask 154624   ;;  %vm837_vm13 = vmor %vm836_vm11, %vm835_vm10  ;;  %vm839_vm14 = vcmask 412672   ;;  %vm843_vm15 = vcmask 699800  }
   0xf   : > { %v947_v0 = vld [vmem:[%s1078_s24] sm:$0xf]  ;;  %v985_v1 = vld [vmem:[%s1078_s24 + $0x8] sm:$0xf0]  ;;  %s1085_s27 = scalar_lea.vmem %s1550_s0, %s991_s21  ;;  %v984_v6 = vld [vmem:[%s1078_s24 + $0x4] sm:$0xf] }
  0x10   : > { %v1087_v2 = vor.u32 %v985_v1, %v947_v0  ;;  %v935_v3 = vld [vmem:[%s1085_s27 + $0x18] sm:$0xf]  ;;  %v982_v4 = vld [vmem:[%s1085_s27 + $0x20] sm:$0xf0]  ;;  %v949_v7 = vld [vmem:[%s1078_s24 + $0xc] sm:$0xf0] }
  0x11   : > { %v1091_v5 = vor.u32 %v982_v4, %v935_v3  ;;  %v981_v8 = vld [vmem:[%s1085_s27 + $0x1c] sm:$0xf]  ;;  %v937_v9 = vld [vmem:[%s1085_s27 + $0x24] sm:$0xf0]  ;;  %v1103_v10 = vor.u32 %v984_v6, %v949_v7  ;;  %v923_v12 = vld [vmem:[%s1085_s27] sm:$0xf] }
  0x12   : > { %533 = vrot.lane.b32.xlu0 %v1087_v2, %s1021_s28  ;;  %v1105_v11 = vor.u32 %v981_v8, %v937_v9  ;;  %v979_v13 = vld [vmem:[%s1085_s27 + $0x8] sm:$0xf0]  ;;  %v978_v14 = vld [vmem:[%s1085_s27 + $0x4] sm:$0xf]  ;;  %v925_v15 = vld [vmem:[%s1085_s27 + $0xc] sm:$0xf0] }
  0x13   : > { %346 = vrot.lane.b32.xlu2 %v1091_v5, %s1022_s29  ;;  %516 = vrot.lane.b32.xlu1 %v1091_v5, %s1021_s28  ;;  %v1117_v16 = vor.u32 %v979_v13, %v923_v12  ;;  %v1119_v17 = vor.u32 %v978_v14, %v925_v15  ;;  %v943_v18 = vld [vmem:[%s1085_s27 + $0x20] sm:$0xf]  ;;  %v983_v19 = vld [vmem:[%s1085_s27 + $0x28] sm:$0xf0] }
  0x14   : > { %v1135_v20 = vor.u32 %v983_v19, %v943_v18  ;;  %v931_v21 = vld [vmem:[%s1085_s27 + $0x8] sm:$0xf]  ;;  %v980_v22 = vld [vmem:[%s1085_s27 + $0x10] sm:$0xf0] }
  0x15   : > { %v1157_v23 = vor.u32 %v980_v22, %v931_v21  ;;  %v955_v24 = vld [vmem:[%s1078_s24 + $0x8] sm:$0xf]  ;;  %v986_v25 = vld [vmem:[%s1078_s24 + $0x10] sm:$0xf0] }
  0x16   : > { %v1179_v26 = vor.u32 %v986_v25, %v955_v24 }
  0x1a   : > { %535 = vrot.lane.b32.xlu0 %v1103_v10, %s1021_s28 }
  0x1b   : > { %348 = vrot.lane.b32.xlu2 %v1105_v11, %s1022_s29  ;;  %518 = vrot.lane.b32.xlu1 %v1105_v11, %s1021_s28 }
  0x22   : > { %510 = vrot.lane.b32.xlu0 %v1117_v16, %s1021_s28 }
  0x23   : > { %442 = vrot.lane.b32.xlu2 %v1117_v16, %s1023_s30  ;;  %512 = vrot.lane.b32.xlu1 %v1119_v17, %s1021_s28 }
  0x2a   : > { %444 = vrot.lane.b32.xlu0 %v1119_v17, %s1023_s30 }
  0x2b   : > { %342 = vrot.lane.b32.xlu2 %v1119_v17, %s1022_s29  ;;  %340 = vrot.lane.b32.xlu1 %v1117_v16, %s1022_s29 }
  0x32   : > { %499 = vrot.lane.b32.xlu0 %v1087_v2, %s1024_s6 }
  0x33   : > { %350 = vrot.lane.b32.xlu2 %v1135_v20, %s1022_s29  ;;  %501 = vrot.lane.b32.xlu1 %v1103_v10, %s1024_s6 }
  0x3a   : > { %431 = vrot.lane.b32.xlu0 %v1087_v2, %s1025_s7 }
  0x3b   : > { %329 = vrot.lane.b32.xlu2 %v1087_v2, %s1026_s8  ;;  %433 = vrot.lane.b32.xlu1 %v1103_v10, %s1025_s7 }
  0x42   : > { %331 = vrot.lane.b32.xlu0 %v1103_v10, %s1026_s8 }
  0x43   : > { %484 = vrot.lane.b32.xlu2 %v1105_v11, %s1024_s6  ;;  %482 = vrot.lane.b32.xlu1 %v1091_v5, %s1024_s6 }
  0x4a   : > { %344 = vrot.lane.b32.xlu0 %v1157_v23, %s1022_s29 }
  0x4b   : > { %416 = vrot.lane.b32.xlu2 %v1105_v11, %s1025_s7  ;;  %414 = vrot.lane.b32.xlu1 %v1091_v5, %s1025_s7 }
  0x52   : > { %556 = vrot.lane.b32.xlu0 %v1087_v2, %s1027_s9 }
  0x53   : > { %312 = vrot.lane.b32.xlu2 %v1091_v5, %s1026_s8  ;;  %558 = vrot.lane.b32.xlu1 %v1103_v10, %s1027_s9 }
  0x5a   : > { %314 = vrot.lane.b32.xlu0 %v1105_v11, %s1026_s8 }
  0x5b   : > { %478 = vrot.lane.b32.xlu2 %v1119_v17, %s1024_s6  ;;  %476 = vrot.lane.b32.xlu1 %v1117_v16, %s1024_s6 }
  0x62   : > { %333 = vrot.lane.b32.xlu0 %v1179_v26, %s1026_s8 }
  0x63   : > { %410 = vrot.lane.b32.xlu2 %v1119_v17, %s1025_s7  ;;  %408 = vrot.lane.b32.xlu1 %v1117_v16, %s1025_s7 }
  0x6a   : > { %550 = vrot.lane.b32.xlu0 %v1091_v5, %s1027_s9 }
  0x6b   : > { %306 = vrot.lane.b32.xlu2 %v1117_v16, %s1026_s8  ;;  %552 = vrot.lane.b32.xlu1 %v1105_v11, %s1027_s9 }
  0x6d   : > { %v347_v27 = vpop.permute.xlu2 %346 }
  0x72   : > { %308 = vrot.lane.b32.xlu0 %v1119_v17, %s1026_s8 }
  0x73   : > { %465 = vrot.lane.b32.xlu2 %v1087_v2, %s1023_s30  ;;  %446 = vrot.lane.b32.xlu1 %v1157_v23, %s1023_s30 }
  0x75   : > { %v1199_v28 = vpop.permute.xlu2 %348 }
  0x76   : > { %v355_v29 = vsel %vm352_vm0, %v347_v27, %v1199_v28 }
  0x77   : > { %617 = vmatpush.bf16.msra.mxu0 %v355_v29 }
  0x7a   : > { %467 = vrot.lane.b32.xlu0 %v1103_v10, %s1023_s30 }
  0x7b   : > { %397 = vrot.lane.b32.xlu2 %v1087_v2, %s1028_s10  ;;  %316 = vrot.lane.b32.xlu1 %v1135_v20, %s1026_s8 }
  0x7d   : > { %v443_v30 = vpop.permute.xlu2 %442 }
  0x82   : > { %399 = vrot.lane.b32.xlu0 %v1103_v10, %s1028_s10 }
  0x83   : > { %544 = vrot.lane.b32.xlu2 %v1117_v16, %s1027_s9  ;;  %537 = vrot.lane.b32.xlu1 %v1179_v26, %s1021_s28 }
  0x84   : > { %v534_v31 = vpop.permute.xlu0 %533 }
  0x85   : > { %v517_v32 = vpop.permute.xlu1 %516  ;;  %v1215_v33 = vpop.permute.xlu2 %342 }
  0x8a   : > { %546 = vrot.lane.b32.xlu0 %v1119_v17, %s1027_s9 }
  0x8b   : > { %448 = vrot.lane.b32.xlu2 %v1091_v5, %s1023_s30  ;;  %435 = vrot.lane.b32.xlu1 %v1179_v26, %s1025_s7 }
  0x8c   : > { %v1223_v34 = vpop.permute.xlu0 %535 }
  0x8d   : > { %v1225_v35 = vpop.permute.xlu1 %518  ;;  %v1227_v36 = vpop.permute.xlu2 %350  ;;  %v539_v37 = vsel %vm522_vm1, %v534_v31, %v1223_v34 }
  0x8e   : > { %645 = vmatpush.bf16.msra.mxu2 %v539_v37  ;;  %v525_v38 = vsel %vm522_vm1, %v517_v32, %v1225_v35 }
  0x92   : > { %646 = vmatpush.bf16.msra.mxu2 %v525_v38  ;;  %450 = vrot.lane.b32.xlu0 %v1105_v11, %s1023_s30 }
  0x93   : > { %380 = vrot.lane.b32.xlu2 %v1091_v5, %s1028_s10  ;;  %310 = vrot.lane.b32.xlu1 %v1157_v23, %s1026_s8 }
  0x94   : > { %v511_v39 = vpop.permute.xlu0 %510 }
  0x95   : > { %v330_v40 = vpop.permute.xlu2 %329  ;;  %v1239_v41 = vpop.permute.xlu1 %512 }
  0x96   : > { %v523_v42 = vsel %vm522_vm1, %v511_v39, %v1239_v41 }
  0x97   : > { %647 = vmatpush.bf16.msra.mxu2 %v523_v42 }
  0x9a   : > { %382 = vrot.lane.b32.xlu0 %v1105_v11, %s1028_s10 }
  0x9b   : > { %418 = vrot.lane.b32.xlu2 %v1135_v20, %s1025_s7  ;;  %520 = vrot.lane.b32.xlu1 %v1135_v20, %s1021_s28 }
  0x9c   : > { %v1249_v43 = vpop.permute.xlu0 %444 }
  0x9d   : > { %v1251_v44 = vpop.permute.xlu2 %484  ;;  %v341_v45 = vpop.permute.xlu1 %340  ;;  %v455_v46 = vsel %vm454_vm2, %v443_v30, %v1249_v43 }
  0x9e   : > { %v353_v47 = vsel %vm352_vm0, %v341_v45, %v1215_v33  ;;  %631 = vmatpush.bf16.msra.mxu1 %v455_v46 }
  0x9f   : > { %618 = vmatpush.bf16.msra.mxu0 %v353_v47 }
  0xa2   : > { %374 = vrot.lane.b32.xlu0 %v1117_v16, %s1028_s10 }
  0xa3   : > { %514 = vrot.lane.b32.xlu2 %v1157_v23, %s1021_s28  ;;  %376 = vrot.lane.b32.xlu1 %v1119_v17, %s1028_s10 }
  0xa4   : > { %v500_v48 = vpop.permute.xlu0 %499 }
  0xa5   : > { %v1263_v49 = vpop.permute.xlu2 %416  ;;  %v1265_v50 = vpop.permute.xlu1 %501 }
  0xa6   : > { %v505_v51 = vsel %vm488_vm3, %v500_v48, %v1265_v50 }
  0xa7   : > { %648 = vmatpush.bf16.msra.mxu2 %v505_v51 }
  0xaa   : > { %412 = vrot.lane.b32.xlu0 %v1157_v23, %s1025_s7 }
  0xab   : > { %363 = vrot.lane.b32.xlu2 %v1087_v2, %s1022_s29  ;;  %560 = vrot.lane.b32.xlu1 %v1179_v26, %s1027_s9 }
  0xac   : > { %v432_v52 = vpop.permute.xlu0 %431 }
  0xad   : > { %v313_v53 = vpop.permute.xlu2 %312  ;;  %v1275_v54 = vpop.permute.xlu1 %433 }
  0xae   : > { %v437_v55 = vsel %vm420_vm4, %v432_v52, %v1275_v54 }
  0xaf   : > { %632 = vmatpush.bf16.msra.mxu1 %v437_v55  ;;  %v356_v55 = vsel %vm352_vm0, %v1199_v28, %v1227_v36 }
  0xb2   : > { %365 = vrot.lane.b32.xlu0 %v1103_v10, %s1022_s29 }
  0xb3   : > { %401 = vrot.lane.b32.xlu2 %v1179_v26, %s1028_s10  ;;  %503 = vrot.lane.b32.xlu1 %v1179_v26, %s1024_s6 }
  0xb4   : > { %v1285_v56 = vpop.permute.xlu0 %331 }
  0xb5   : > { %v1287_v57 = vpop.permute.xlu2 %478  ;;  %v483_v58 = vpop.permute.xlu1 %482  ;;  %v335_v59 = vsel %vm318_vm5, %v330_v40, %v1285_v56 }
  0xb6   : > { %619 = vmatpush.bf16.msra.mxu0 %v335_v59  ;;  %v491_v60 = vsel %vm488_vm3, %v483_v58, %v1251_v44 }
  0xb7   : > { %649 = vmatpush.bf16.msra.mxu2 %v491_v60 }
  0xba   : > { %554 = vrot.lane.b32.xlu0 %v1135_v20, %s1027_s9 }
  0xbb   : > { %384 = vrot.lane.b32.xlu2 %v1135_v20, %s1028_s10  ;;  %486 = vrot.lane.b32.xlu1 %v1135_v20, %s1024_s6 }
  0xbc   : > { %v1299_v61 = vpop.permute.xlu0 %344 }
  0xbd   : > { %v1301_v62 = vpop.permute.xlu2 %410  ;;  %v415_v63 = vpop.permute.xlu1 %414  ;;  %v354_v59 = vsel %vm352_vm0, %v1215_v33, %v1299_v61  ;;  %v967_v33 = vld [vmem:[%s1552_s2 + $0x8] sm:$0xf] }
  0xbe   : > { %v423_v0 = vsel %vm420_vm4, %v415_v63, %v1263_v49 }
  0xbf   : > { %633 = vmatpush.bf16.msra.mxu1 %v423_v0  ;;  %v990_v0 = vld [vmem:[%s1552_s2 + $0x14] sm:$0xf0] }
  0xc2   : > { %548 = vrot.lane.b32.xlu0 %v1157_v23, %s1027_s9 }
  0xc3   : > { %378 = vrot.lane.b32.xlu2 %v1157_v23, %s1028_s10  ;;  %480 = vrot.lane.b32.xlu1 %v1157_v23, %s1024_s6 }
  0xc4   : > { %v557_v1 = vpop.permute.xlu0 %556 }
  0xc5   : > { %v307_v3 = vpop.permute.xlu2 %306  ;;  %v1311_v4 = vpop.permute.xlu1 %558 }
  0xc6   : > { %v567_v6 = vsel %vm562_vm6, %v557_v1, %v1311_v4  ;;  %v1403_v1 = vor.u32 %v990_v0, %v967_v33 }
  0xc7   : > { %664 = vmatpush.bf16.msra.mxu3 %v567_v6  ;;  %v989_v6 = vld [vmem:[%s1552_s2 + $0xc] sm:$0xf0] }
  0xca   : > { %469 = vrot.lane.b32.xlu0 %v1179_v26, %s1023_s30 }
  0xcb   : > { %452 = vrot.lane.b32.xlu2 %v1135_v20, %s1023_s30  ;;  %367 = vrot.lane.b32.xlu1 %v1179_v26, %s1022_s29 }
  0xcc   : > { %v1321_v7 = vpop.permute.xlu0 %314 }
  0xcd   : > { %v466_v8 = vpop.permute.xlu2 %465  ;;  %v477_v9 = vpop.permute.xlu1 %476  ;;  %v321_v12 = vsel %vm318_vm5, %v313_v53, %v1321_v7 }
  0xce   : > { %620 = vmatpush.bf16.msra.mxu0 %v321_v12  ;;  %v489_v13 = vsel %vm488_vm3, %v477_v9, %v1287_v57 }
  0xcf   : > { %650 = vmatpush.bf16.msra.mxu2 %v489_v13 }
  0xd4   : > { %v1327_v14 = vpop.permute.xlu0 %333 }
  0xd5   : > { %v398_v15 = vpop.permute.xlu2 %397  ;;  %v409_v18 = vpop.permute.xlu1 %408  ;;  %v336_v63 = vsel %vm318_vm5, %v1285_v56, %v1327_v14  ;;  %v959_v56 = vld [vmem:[%s1552_s2] sm:$0xf] }
  0xd6   : > { %v421_v19 = vsel %vm420_vm4, %v409_v18, %v1301_v62 }
  0xd7   : > { %634 = vmatpush.bf16.msra.mxu1 %v421_v19 }
  0xdc   : > { %v551_v21 = vpop.permute.xlu0 %550 }
  0xdd   : > { %v545_v22 = vpop.permute.xlu2 %544  ;;  %v1331_v24 = vpop.permute.xlu1 %552 }
  0xde   : > { %v565_v25 = vsel %vm562_vm6, %v551_v21, %v1331_v24 }
  0xdf   : > { %665 = vmatpush.bf16.msra.mxu3 %v565_v25 }
  0xe4   : > { %v309_v27 = vpop.permute.xlu0 %308 }
  0xe5   : > { %v449_v29 = vpop.permute.xlu2 %448  ;;  %v1335_v30 = vpop.permute.xlu1 %446  ;;  %v319_v31 = vsel %vm318_vm5, %v307_v3, %v309_v27 }
  0xe6   : > { %621 = vmatpush.bf16.msra.mxu0 %v319_v31  ;;  %v456_v40 = vsel %vm454_vm2, %v1249_v43, %v1335_v30  ;;  %v961_v31 = vld [vmem:[%s1552_s2 + $0x10] sm:$0xf0] }
  0xea   : > { %622 = vmatpush.bf16.msra.mxu0 %v1087_v2 }
  0xec   : > { %v1339_v32 = vpop.permute.xlu0 %467 }
  0xed   : > { %v381_v37 = vpop.permute.xlu2 %380  ;;  %v1341_v38 = vpop.permute.xlu1 %316  ;;  %v471_v39 = vsel %vm454_vm2, %v466_v8, %v1339_v32  ;;  %v1415_v8 = vor.u32 %v989_v6, %v959_v56 }
  0xee   : > { %623 = vmatpush.bf16.msra.mxu0 %v1091_v5  ;;  %651 = vmatpush.bf16.msra.mxu2 %v471_v39  ;;  %v988_v5 = vld [vmem:[%s1552_s2 + $0xc] sm:$0xf]  ;;  %v322_v3 = vsel %vm318_vm5, %v1321_v7, %v1341_v38 }
  0xf2   : > { %624 = vmatpush.bf16.msra.mxu0 %v1117_v16  ;;  %v969_v16 = vld [vmem:[%s1552_s2 + $0x18] sm:$0xf0] }
  0xf3   : > { %v1370_v51 = vor.u32 %v988_v5, %v969_v16 }
  0xf4   : > { %v1350_v2 = vpop.permute.xlu0 %399 }
  0xf5   : > { %v1352_v42 = vpop.permute.xlu2 %418  ;;  %v1354_v45 = vpop.permute.xlu1 %537  ;;  %v403_v46 = vsel %vm386_vm7, %v398_v15, %v1350_v2  ;;  %625 = vmatmul.bf16.vlgmr.msra.gmra.mxu0 %v1415_v8 }
  0xf6   : > { %687 = vmatpush.bf16.msrb.mxu0 %v456_v40  ;;  %635 = vmatpush.bf16.msra.mxu1 %v403_v46  ;;  %v424_v58 = vsel %vm420_vm4, %v1263_v49, %v1352_v42  ;;  %v540_v5 = vsel %vm522_vm1, %v1223_v34, %v1354_v45 }
  0xfc   : > { %v1364_v43 = vpop.permute.xlu0 %546 }
  0xfd   : > { %v1366_v47 = vpop.permute.xlu1 %435  ;;  %v563_v48 = vsel %vm562_vm6, %v545_v22, %v1364_v43  ;;  %v1372_v52 = vpop.permute.xlu2 %514 }
  0xfe   : > { %666 = vmatpush.bf16.msra.mxu3 %v563_v48  ;;  %v438_v53 = vsel %vm420_vm4, %v1275_v54, %v1366_v47 }
  0xff   : > { %688 = vmatpush.bf16.msrb.mxu0 %v438_v53 }
 0x101   : > { %973 = vmatmul.msk.bf16.vlgmr.msra.gmra.mxu3 %vm613_vm8, %v1370_v51 }
 0x102   : > { %673 = vmatpush.bf16.msrb.mxu3 %v356_v55 }
 0x103   : > { %689 = vmatpush.bf16.msrb.mxu0 %v424_v58 }
 0x104   : > { %v1388_v54 = vpop.permute.xlu0 %450 }
 0x105   : > { %v1390_v60 = vpop.permute.xlu1 %310  ;;  %v457_v28 = vsel %vm454_vm2, %v449_v29, %v1388_v54  ;;  %v364_v49 = vpop.permute.xlu2 %363 }
 0x106   : > { %674 = vmatpush.bf16.msrb.mxu3 %v354_v59  ;;  %652 = vmatpush.bf16.msra.mxu2 %v457_v28  ;;  %v320_v7 = vsel %vm318_vm5, %v309_v27, %v1390_v60 }
 0x109   : > { %653 = vmatmul.bf16.vlgmr.msra.gmra.mxu2 %v1403_v1 }
 0x10a   : > { %675 = vmatpush.bf16.msrb.mxu3 %v336_v63 }
 0x10c   : > { %v383_v9 = vpop.permute.xlu0 %382 }
 0x10d   : > { %v1417_v12 = vpop.permute.xlu1 %520  ;;  %v389_v13 = vsel %vm386_vm7, %v381_v37, %v383_v9  ;;  %v1423_v15 = vpop.permute.xlu2 %401 }
 0x10e   : > { %676 = vmatpush.bf16.msrb.mxu3 %v322_v3  ;;  %636 = vmatpush.bf16.msra.mxu1 %v389_v13  ;;  %v526_v16 = vsel %vm522_vm1, %v1225_v35, %v1417_v12 }
 0x112   : > { %677 = vmatpush.bf16.msrb.mxu3 %v320_v7 }
 0x114   : > { %v375_v18 = vpop.permute.xlu0 %374 }
 0x115   : > { %v377_v19 = vpop.permute.xlu1 %376  ;;  %v1429_v22 = vpop.permute.xlu2 %384 }
 0x116   : > { %678 = vmatpush.bf16.msrb.mxu3 %v1103_v10  ;;  %v387_v21 = vsel %vm386_vm7, %v375_v18, %v377_v19  ;;  %v390_v40 = vsel %vm386_vm7, %v383_v9, %v1429_v22  ;;  %v791_v9 = vld [vmem:[%s1554_s4] sm:$0x7] }
 0x117   : > { %637 = vmatpush.bf16.msra.mxu1 %v387_v21 }
 0x11a   : > { %679 = vmatpush.bf16.msrb.mxu3 %v1105_v11  ;;  %v1029_v11 = vmov 0  }
 0x11b   : > { %1012 = vset.pattern.permute.xlu1 %v1029_v11  ;;  %1011 = vset.pattern.permute.xlu0 %v1029_v11  ;;  %810 = vst.msk [vmem:[%s1525_s13] sm:$0xf] %vm809_vm9, %v1029_v11 }
 0x11c   : > { %v1431_v25 = vpop.permute.xlu0 %412  ;;  %811 = vst.msk [vmem:[%s1525_s13 + $0xc] sm:$0xf] %vm809_vm9, %v1029_v11 }
 0x11d   : > { %v1434_v27 = vpop.permute.xlu1 %560  ;;  %v422_v10 = vsel %vm420_vm4, %v1301_v62, %v1431_v25  ;;  %v404_v62 = vsel %vm386_vm7, %v1350_v2, %v1423_v15  ;;  %v379_v46 = vpop.permute.xlu2 %378 }
 0x11e   : > { %680 = vmatpush.bf16.msrb.mxu3 %v1119_v17  ;;  %690 = vmatpush.bf16.msrb.mxu0 %v422_v10  ;;  %v568_v29 = vsel %vm562_vm6, %v1311_v4, %v1434_v27  ;;  %v582_v17 = vld [vmem:[%s1553_s3] sm:$0xff] }
 0x11f   : > { %720 = vmatpush.bf16.msrb.mxu2 %v568_v29  ;;  %586 = vperm.xlu0 %1011, %v582_v17   ;;  %v987_v4 = vld [vmem:[%s1552_s2 + $0x4] sm:$0xf] }
 0x120   : > { %v1465_v2 = vor.u32 %v987_v4, %v961_v31 }
 0x121   : > { %681 = vmatmul.bf16.vlgmr.msrb.gmra.mxu3 %v1415_v8 }
 0x122   : > { %729 = vmatpush.bf16.msra.mxu3 %v1227_v36  ;;  %v583_v36 = vld [vmem:[%s1553_s3 + $0x8] sm:$0xff]  ;;  %691 = vmatpush.bf16.msrb.mxu0 %v404_v62 }
 0x123   : > { %591 = vperm.xlu1 %1012, %v583_v36  }
 0x124   : > { %v366_v37 = vpop.permute.xlu0 %365 }
 0x125   : > { %v369_v39 = vsel %vm352_vm0, %v364_v49, %v366_v37 }
 0x126   : > { %730 = vmatpush.bf16.msra.mxu3 %v1299_v61  ;;  %v504_v61 = vpop.permute.xlu1 %503  ;;  %638 = vmatpush.bf16.msra.mxu1 %v369_v39 }
 0x127   : > { %692 = vmatpush.bf16.msrb.mxu0 %v390_v40  ;;  %v506_v55 = vsel %vm488_vm3, %v1265_v50, %v504_v61 }
 0x129   : > { %639 = vmatmul.bf16.vlgmr.msra.gmra.mxu1 %v1465_v2 }
 0x12a   : > { %731 = vmatpush.bf16.msra.mxu3 %v1327_v14  ;;  %701 = vmatpush.bf16.msrb.mxu1 %v540_v5  ;;  %v388_v14 = vsel %vm386_vm7, %v377_v19, %v379_v46  ;;  %v793_v19 = vperm.slane %v791_v9, 0 }
 0x12b   : > { %693 = vmatpush.bf16.msrb.mxu0 %v388_v14 }
 0x12c   : > { %v555_v48 = vpop.permute.xlu0 %554 }
 0x12d   : > { %v566_v34 = vsel %vm562_vm6, %v1331_v24, %v555_v48 }
 0x12e   : > { %732 = vmatpush.bf16.msra.mxu3 %v1341_v38  ;;  %702 = vmatpush.bf16.msrb.mxu1 %v526_v16  ;;  %v487_v53 = vpop.permute.xlu1 %486  ;;  %v524_v38 = vsel %vm522_vm1, %v1239_v41, %v1372_v52 }
 0x12f   : > { %721 = vmatpush.bf16.msrb.mxu2 %v566_v34  ;;  %v492_v24 = vsel %vm488_vm3, %v1251_v44, %v487_v53 }
 0x132   : > { %733 = vmatpush.bf16.msra.mxu3 %v1390_v60  ;;  %703 = vmatpush.bf16.msrb.mxu1 %v524_v38 }
 0x134   : > { %v549_v35 = vpop.permute.xlu0 %548 }
 0x135   : > { %v564_v59 = vsel %vm562_vm6, %v1364_v43, %v549_v35 }
 0x136   : > { %734 = vmatpush.bf16.msra.mxu3 %v1179_v26  ;;  %704 = vmatpush.bf16.msrb.mxu1 %v506_v55  ;;  %v481_v58 = vpop.permute.xlu1 %480 }
 0x137   : > { %722 = vmatpush.bf16.msrb.mxu2 %v564_v59  ;;  %v490_v26 = vsel %vm488_vm3, %v1287_v57, %v481_v58 }
 0x13a   : > { %735 = vmatpush.bf16.msra.mxu3 %v1135_v20  ;;  %705 = vmatpush.bf16.msrb.mxu1 %v492_v24 }
 0x13b   : > { %743 = vmatpush.bf16.msra.mxu2 %v1335_v30  ;;  %v453_v30 = vpop.permute.xlu2 %452 }
 0x13c   : > { %974 = vmatmul.msk.bf16.vlgmr.msrb.gmra.mxu2 %vm613_vm8, %v1370_v51  ;;  %v470_v20 = vpop.permute.xlu0 %469 }
 0x13d   : > { %v472_v44 = vsel %vm454_vm2, %v1339_v32, %v470_v20 }
 0x13e   : > { %736 = vmatpush.bf16.msra.mxu3 %v1157_v23  ;;  %706 = vmatpush.bf16.msrb.mxu1 %v490_v26  ;;  %v368_v41 = vpop.permute.xlu1 %367  ;;  %v458_v23 = vsel %vm454_vm2, %v1388_v54, %v453_v30  ;;  %v795_v26 = vperm.slane %v791_v9, 2 }
 0x13f   : > { %744 = vmatpush.bf16.msra.mxu2 %v1366_v47  ;;  %v370_v50 = vsel %vm352_vm0, %v366_v37, %v368_v41 }
 0x140   : > { %694 = vmatpush.bf16.msrb.mxu0 %v370_v50 }
 0x141   : > { %737 = vmatmul.bf16.vlgmr.msra.gmra.mxu3 %v1415_v8 }
 0x142   : > { %707 = vmatpush.bf16.msrb.mxu1 %v472_v44 }
 0x143   : > { %745 = vmatpush.bf16.msra.mxu2 %v1352_v42  ;;  %695 = vmatmul.bf16.vlgmr.msrb.gmra.mxu0 %v1465_v2 }
 0x144   : > { %757 = vmatpush.bf16.msra.mxu0 %v1354_v45 }
 0x146   : > { %708 = vmatpush.bf16.msrb.mxu1 %v458_v23 }
 0x147   : > { %746 = vmatpush.bf16.msra.mxu2 %v1431_v25  ;;  %v794_v25 = vperm.slane %v791_v9, 1 }
 0x148   : > { %758 = vmatpush.bf16.msra.mxu0 %v1417_v12 }
 0x149   : > { %709 = vmatmul.bf16.vlgmr.msrb.gmra.mxu1 %v1403_v1 }
 0x14a   : > { %776 = vmatpush.bf16.msra.mxu1 %v1434_v27 }
 0x14b   : > { %747 = vmatpush.bf16.msra.mxu2 %v1423_v15 }
 0x14c   : > { %759 = vmatpush.bf16.msra.mxu0 %v1372_v52 }
 0x14e   : > { %777 = vmatpush.bf16.msra.mxu1 %v555_v48 }
 0x14f   : > { %748 = vmatpush.bf16.msra.mxu2 %v1429_v22 }
 0x150   : > { %760 = vmatpush.bf16.msra.mxu0 %v504_v61 }
 0x152   : > { %778 = vmatpush.bf16.msra.mxu1 %v549_v35 }
 0x153   : > { %749 = vmatpush.bf16.msra.mxu2 %v379_v46 }
 0x154   : > { %761 = vmatpush.bf16.msra.mxu0 %v487_v53 }
 0x157   : > { %750 = vmatpush.bf16.msra.mxu2 %v368_v41 }
 0x158   : > { %762 = vmatpush.bf16.msra.mxu0 %v481_v58 }
 0x159   : > { %975 = vmatmul.msk.bf16.vlgmr.msra.gmra.mxu1 %vm613_vm8, %v1370_v51 }
 0x15a   : > { %751 = vmatmul.bf16.vlgmr.msra.gmra.mxu2 %v1465_v2 }
 0x15c   : > { %763 = vmatpush.bf16.msra.mxu0 %v470_v20 }
 0x160   : > { %764 = vmatpush.bf16.msra.mxu0 %v453_v30 }
 0x163   : > { %765 = vmatmul.bf16.vlgmr.msra.gmra.mxu0 %v1403_v1 }
 0x172   : > { %v626_v32 = vpop.f32.mrf.mxu0 }
 0x17a   : > { %v628_v54 = vpop.f32.mrf.mxu0 }
 0x184   : > { %v668_v57 = vpop.f32.mrf.mxu3 }
 0x18c   : > { %v670_v42 = vpop.f32.mrf.mxu3  ;;  %v654_v43 = vpop.f32.mrf.mxu2 }
 0x191   : > { %v587_v47 = vpop.permute.xlu0 %586 }
 0x192   : > { %v627_v52 = vadd.f32 %v626_v32, %v587_v47 }
 0x194   : > { %v656_v33 = vpop.f32.mrf.mxu2 }
 0x195   : > { %v592_v63 = vpop.permute.xlu1 %591 }
 0x196   : > { %v629_v3 = vadd.f32 %v628_v54, %v592_v63 }
 0x1a4   : > { %v682_v60 = vpop.f32.mrf.mxu3 }
 0x1a5   : > { %v683_v51 = vadd.f32 %v682_v60, %v587_v47 }
 0x1a6   : > { %v640_v45 = vpop.f32.mrf.mxu1 }
 0x1a7   : > { %v641_v28 = vadd.f32 %v640_v45, %v627_v52 }
 0x1a9   : > { %v655_v0 = vadd.f32 %v654_v43, %v641_v28 }
 0x1ab   : > { %v669_v12 = vadd.f32 %v668_v57, %v655_v0 }
 0x1ac   : > { %v684_v8 = vpop.f32.mrf.mxu3 }
 0x1ad   : > { %v685_v18 = vadd.f32 %v684_v8, %v592_v63  ;;  %v785_v27 = vmax.f32 %v669_v12, 0.0 }
 0x1ae   : > { %v642_v49 = vpop.f32.mrf.mxu1 }
 0x1af   : > { %v643_v1 = vadd.f32 %v642_v49, %v629_v3  ;;  %v799_v4 = vmul.f32 %v793_v19, %v785_v27 }
 0x1b1   : > { %v657_v21 = vadd.f32 %v656_v33, %v643_v1 }
 0x1b3   : > { %v671_v36 = vadd.f32 %v670_v42, %v657_v21 }
 0x1b5   : > { %v788_v40 = vmax.f32 %v671_v36, 0.0 }
 0x1b7   : > { %v802_v5 = vmul.f32 %v793_v19, %v788_v40 }
 0x1bf   : > { %v724_v13 = vpop.f32.mrf.mxu2 }
 0x1c0   : > { %v696_v56 = vpop.f32.mrf.mxu0 }
 0x1c1   : > { %v697_v6 = vadd.f32 %v696_v56, %v683_v51 }
 0x1c4   : > { %v738_v16 = vpop.f32.mrf.mxu3 }
 0x1c5   : > { %v739_v53 = vadd.f32 %v738_v16, %v587_v47 }
 0x1c6   : > { %v710_v7 = vpop.f32.mrf.mxu1 }
 0x1c7   : > { %v711_v15 = vadd.f32 %v710_v7, %v697_v6  ;;  %v726_v39 = vpop.f32.mrf.mxu2 }
 0x1c8   : > { %v698_v10 = vpop.f32.mrf.mxu0 }
 0x1c9   : > { %v725_v22 = vadd.f32 %v724_v13, %v711_v15  ;;  %v699_v17 = vadd.f32 %v698_v10, %v685_v18 }
 0x1cb   : > { %v786_v29 = vmax.f32 %v725_v22, 0.0 }
 0x1cc   : > { %v740_v59 = vpop.f32.mrf.mxu3 }
 0x1cd   : > { %v800_v62 = vmul.f32 %v794_v25, %v786_v29  ;;  %v741_v20 = vadd.f32 %v740_v59, %v592_v63 }
 0x1ce   : > { %v712_v31 = vpop.f32.mrf.mxu1 }
 0x1cf   : > { %v713_v37 = vadd.f32 %v712_v31, %v699_v17  ;;  %v805_v61 = vpack.c.bf16 %v800_v62, %v799_v4 }
 0x1d1   : > { %v727_v2 = vadd.f32 %v726_v39, %v713_v37  ;;  %816 = vrot.lane.b32.xlu2 %v805_v61, %s1030_s14 }
 0x1d3   : > { %v789_v46 = vmax.f32 %v727_v2, 0.0 }
 0x1d5   : > { %v803_v14 = vmul.f32 %v794_v25, %v789_v46 }
 0x1d6   : > { %v780_v55 = vpop.f32.mrf.mxu1 }
 0x1d7   : > { %v807_v48 = vpack.c.bf16 %v803_v14, %v802_v5 }
 0x1d9   : > { %820 = vrot.lane.b32.xlu1 %v807_v48, %s1030_s14 }
 0x1dd   : > { %v752_v34 = vpop.f32.mrf.mxu2 }
 0x1de   : > { %v753_v38 = vadd.f32 %v752_v34, %v739_v53  ;;  %v782_v42 = vpop.f32.mrf.mxu1 }
 0x1e0   : > { %v766_v35 = vpop.f32.mrf.mxu0 }
 0x1e1   : > { %v767_v58 = vadd.f32 %v766_v35, %v753_v38 }
 0x1e3   : > { %v781_v24 = vadd.f32 %v780_v55, %v767_v58 }
 0x1e5   : > { %v787_v41 = vmax.f32 %v781_v24, 0.0  ;;  %v754_v44 = vpop.f32.mrf.mxu2 }
 0x1e6   : > { %v755_v50 = vadd.f32 %v754_v44, %v741_v20 }
 0x1e7   : > { %v801_v30 = vmul.f32 %v795_v26, %v787_v41 }
 0x1e8   : > { %v768_v23 = vpop.f32.mrf.mxu0 }
 0x1e9   : > { %v769_v57 = vadd.f32 %v768_v23, %v755_v50  ;;  %v806_v32 = vpack.c.bf16 %v801_v30, %v801_v30 }
 0x1eb   : > { %v783_v45 = vadd.f32 %v782_v42, %v769_v57  ;;  %818 = vrot.lane.b32.xlu2 %v806_v32, %s1030_s14 }
 0x1ed   : > { %v790_v43 = vmax.f32 %v783_v45, 0.0 }
 0x1ef   : > { %v804_v47 = vmul.f32 %v795_v26, %v790_v43 }
 0x1f1   : > { %v808_v52 = vpack.c.bf16 %v804_v47, %v804_v47 }
 0x1f3   : > { %822 = vrot.lane.b32.xlu0 %v808_v52, %s1030_s14 }
 0x22b   : > { %v817_v54 = vpop.permute.xlu2 %816 }
 0x22c   : > { %v824_v60 = vrot.slane %v817_v54, 4 }
 0x22e   : > { %v827_v28 = vsel %vm826_vm12, %v824_v60, %v817_v54 }
 0x22f   : > { %838 = vst.msk [vmem:[%s1525_s13] sm:$0xff] %vm837_vm13, %v827_v28 }
 0x245   : > { %v819_v63 = vpop.permute.xlu2 %818 }
 0x246   : > { %v828_v49 = vsel %vm826_vm12, %v824_v60, %v819_v63 }
 0x247   : > { %840 = vst.msk [vmem:[%s1525_s13 + $0x8] sm:$0xf] %vm839_vm14, %v828_v49 }
 0x248   : > { %844 = vst.msk [vmem:[%s1525_s13 + $0x8] sm:$0xf] %vm843_vm15, %v1029_v11 }
 0x24b   : > { %v821_v33 = vpop.permute.xlu1 %820 }
 0x24c   : > { %v825_v51 = vrot.slane %v821_v33, 4 }
 0x24e   : > { %v829_v0 = vsel %vm826_vm12, %v825_v51, %v821_v33 }
 0x24f   : > { %841 = vst.msk [vmem:[%s1525_s13 + $0xc] sm:$0xff] %vm837_vm13, %v829_v0 }
 0x265   : > { %v823_v3 = vpop.permute.xlu0 %822 }
 0x266   : > { %v830_v56 = vsel %vm826_vm12, %v825_v51, %v823_v3 }
 0x267   : > { %842 = vst.msk [vmem:[%s1525_s13 + $0x14] sm:$0xf] %vm839_vm14, %v830_v56 }
 0x268   : > { %845 = vst.msk [vmem:[%s1525_s13 + $0x14] sm:$0xf] %vm843_vm15, %v1029_v11 }
 0x269 PF: > { %s15_s18 = sadd.s32 1, %s1019_s18  }
 0x26a   : > { %p12_p4 = scmp.ge.s32.totalorder %s15_s18, 4  }
 0x26c   :  { %14 = sbr.rel (!%p12_p4) target bundleno = 1 (0x1), region = 73 }

</bundles_post_ra>
